<compile_context>
chip_gen: v7x
topology: tpu7x:2x2x1
jax: 0.10.0
libtpu: 0.0.40
codegen_flags: <defaults>
</compile_context>

<pallas_src>
import jax
import jax.numpy as jnp
from jax.experimental import pallas as pl
from jax.experimental.pallas import tpu as pltpu


# -----------------------------------------------------------------------------
# Static network geometry (derived from the module, input spatial size 20x12).
# -----------------------------------------------------------------------------
H0, W0 = 20, 12                                  # input spatial size, Cin = 1
FC_TRUE = [64 * 3 * 1, 1000, 500, 300, 100, 10, 3]
FC_PAD  = [192, 1024, 512, 384, 128, 128, 128]   # lane-padded FC widths


# -----------------------------------------------------------------------------
# The single fused kernel.  One grid step == B images.
# Activation layout everywhere: slab row = h*B + b, lanes = w*C + c.
# -----------------------------------------------------------------------------
def _make_kernel(B):
    f32, bf16 = jnp.float32, jnp.bfloat16

    def kernel(x_ref,
               cw1, csh1, cw2, csh2, cw3, csh3,
               p1te, p1to, p2te, p2to,
               fw0, fb0, fw1, fb1, fw2, fb2, fw3, fb3, fw4, fb4, fw5, fb5,
               o_ref):

        def conv(a, cw_ref, csh_ref, ho):
            # a: (hi*B, Win*Cin) bf16, h-major interleaved rows.
            # out[h*B + b] = ReLU( sum_i a[(h+i)*B + b] @ cw[i] + shift )
            # Row shifts are multiples of B -> aligned sublane slices, batched M=ho*B.
            acc = jnp.dot(a[0:ho * B, :], cw_ref[0], preferred_element_type=f32)
            for i in (1, 2):
                acc = acc + jnp.dot(a[i * B:(i + ho) * B, :], cw_ref[i],
                                    preferred_element_type=f32)
            return jnp.maximum(acc + csh_ref[...], 0.0).astype(bf16)

        def pool(a, hi, te_ref, to_ref):
            # 2x2 max pool.  Height half: VPU max of adjacent B-row blocks
            # (leading-dim reshape only, minor dim untouched).  Width half:
            # exact 0/1 lane-selection matmuls in bf16 (single MXU pass).
            c = a.shape[-1]
            a3 = a.reshape(hi // 2, 2 * B, c)
            hp = jnp.maximum(a3[:, :B, :], a3[:, B:, :]).reshape((hi // 2) * B, c)
            pe = jnp.dot(hp, te_ref[...], preferred_element_type=f32)
            po = jnp.dot(hp, to_ref[...], preferred_element_type=f32)
            return jnp.maximum(pe, po).astype(bf16)

        x = x_ref[...].astype(bf16)            # (20B, 12)   Cin = 1
        a = conv(x, cw1, csh1, ho=18)          # (18B, 160)  Conv(1->16) + ReLU
        a = conv(a, cw2, csh2, ho=16)          # (16B, 256)  Conv(16->32) + BN + ReLU
        a = pool(a, 16, p1te, p1to)            # (8B, 128)   MaxPool 2x2
        a = conv(a, cw3, csh3, ho=6)           # (6B, 128)   Conv(32->64) + BN + ReLU
        a = pool(a, 6, p2te, p2to)             # (3B, 64)    MaxPool 2x2

        # fc0: the PyTorch NCHW flatten (flat index c*3 + h) is folded into
        # fw0's row order (h*64 + c); the features of spatial row h are the
        # contiguous B rows a[h*B:(h+1)*B]  ->  three (B,64)@(64,1024) matmuls.
        y = jnp.dot(a[0:B, :], fw0[0:64, :], preferred_element_type=f32)
        for h in (1, 2):
            y = y + jnp.dot(a[h * B:(h + 1) * B, :], fw0[h * 64:(h + 1) * 64, :],
                            preferred_element_type=f32)
        y = jnp.maximum(y + fb0[...], 0.0)

        # fc1..fc5.  NOTE: the module applies ReLU after EVERY Linear, including
        # the last one before Softmax, so the uniform ReLU here is correct.
        for w_ref, b_ref in ((fw1, fb1), (fw2, fb2), (fw3, fb3), (fw4, fb4), (fw5, fb5)):
            y = jnp.dot(y.astype(bf16), w_ref[...], preferred_element_type=f32)
            y = jnp.maximum(y + b_ref[...], 0.0)

        # Softmax over the 3 real lanes; padding lanes masked; exact normalization.
        lane = jax.lax.broadcasted_iota(jnp.int32, y.shape, 1)
        y = jnp.where(lane < 3, y, -1e30)
        m = jnp.max(y, axis=1, keepdims=True)
        e = jnp.exp(y - m)
        o_ref[...] = (e / jnp.sum(e, axis=1, keepdims=True)).astype(o_ref.dtype)

    return kernel


# -----------------------------------------------------------------------------
# Host-side folding: conv/BN -> shifted-block matmul weights (bf16), width-pool
# lane selectors (bf16), lane-padded FC weights.  PyTorch layouts in, TPU out.
# -----------------------------------------------------------------------------
def _prep_conv(w_oihw, bias, bn, win, wo):
    cout, cin, kh, kw = w_oihw.shape
    if bn is None:
        scale = jnp.ones((cout,), jnp.float32)
        shift = bias.astype(jnp.float32)
    else:
        gamma, beta, mean, var, eps = bn
        scale = gamma / jnp.sqrt(var + eps)
        shift = beta - mean * scale + bias * scale
    w_idx = jnp.arange(win)[:, None]
    wo_idx = jnp.arange(wo)[None, :]
    mats = []
    for i in range(kh):
        acc = jnp.zeros((win * cin, wo * cout), jnp.float32)
        for j in range(kw):
            wij = w_oihw[:, :, i, j].T * scale[None, :]            # (cin, cout)
            sel = (w_idx == wo_idx + j).astype(jnp.float32)        # (win, wo)
            acc = acc + jnp.kron(sel, wij)
        mats.append(acc)
    cw = jnp.stack(mats, axis=0).astype(jnp.bfloat16)              # (3, win*cin, wo*cout)
    csh = jnp.tile(shift, (wo,)).reshape(1, wo * cout).astype(jnp.float32)
    return cw, csh


def _prep_pool_lane(w_in, c):
    # Width half of a 2x2 maxpool as exact 0/1 selection matrices (bf16).
    w = jnp.arange(w_in)[:, None]
    w2 = jnp.arange(w_in // 2)[None, :]
    eye_c = jnp.eye(c, dtype=jnp.float32)
    te = jnp.kron((w == 2 * w2).astype(jnp.float32), eye_c).astype(jnp.bfloat16)
    to = jnp.kron((w == 2 * w2 + 1).astype(jnp.float32), eye_c).astype(jnp.bfloat16)
    return te, to                                                  # (w_in*c, w_in//2*c)


def _prep_fc(w_torch, bias, k_pad, n_pad, row_perm=None):
    wt = w_torch.T.astype(jnp.float32)                             # (in, out)
    if row_perm is not None:
        wt = wt[row_perm, :]
    k, n = wt.shape
    wp = jnp.zeros((k_pad, n_pad), jnp.float32).at[:k, :n].set(wt).astype(jnp.bfloat16)
    bp = jnp.zeros((1, n_pad), jnp.float32).at[0, :n].set(bias.astype(jnp.float32))
    return wp, bp


def prepare_operands(p):
    ops = []
    ops += list(_prep_conv(p["conv1_w"], p["conv1_b"], None,     win=12, wo=10))
    ops += list(_prep_conv(p["conv2_w"], p["conv2_b"], p["bn2"], win=10, wo=8))
    ops += list(_prep_conv(p["conv3_w"], p["conv3_b"], p["bn3"], win=4,  wo=2))
    ops += list(_prep_pool_lane(8, 32))                            # pool after conv2
    ops += list(_prep_pool_lane(2, 64))                            # pool after conv3
    # fc0: fold the NCHW flatten (torch flat index c*3+h) into row order h*64+c.
    h_idx = jnp.repeat(jnp.arange(3), 64)
    c_idx = jnp.tile(jnp.arange(64), 3)
    perm = c_idx * 3 + h_idx
    for i in range(6):
        wp, bp = _prep_fc(p[f"fc{i}_w"], p[f"fc{i}_b"], FC_PAD[i], FC_PAD[i + 1],
                          row_perm=perm if i == 0 else None)
        ops += [wp, bp]
    return tuple(ops)                                              # 22 operands


# -----------------------------------------------------------------------------
# Wrapper: one pallas_call, grid over batch blocks of `block_b` images.
# block_b: 128 fills a v5e MXU; use 256 on v6e/v7x; keep grid >= 2 on v7x.
# -----------------------------------------------------------------------------
def _round_up(v, m):
    return ((v + m - 1) // m) * m


def cnn2_forward(operands, x_nchw, block_b=128):
    assert block_b % 16 == 0
    n = x_nchw.shape[0]
    bb = min(block_b, _round_up(n, 16))          # don't over-pad tiny batches
    g = (n + bb - 1) // bb
    n_pad = g * bb

    x = x_nchw.reshape(n, H0, W0)                # Cin=1: (N,1,20,12) -> (N,20,12)
    if n_pad != n:
        x = jnp.concatenate([x, jnp.zeros((n_pad - n, H0, W0), x.dtype)], axis=0)
    # h-major interleave within each block of bb images: slab row = h*bb + b.
    x = x.reshape(g, bb, H0, W0).transpose(0, 2, 1, 3).reshape(g * H0 * bb, W0)

    def full_spec(shape):
        zeros = (0,) * len(shape)
        return pl.BlockSpec(shape, lambda gi: zeros)

    in_specs = [pl.BlockSpec((H0 * bb, W0), lambda gi: (gi, 0))]
    in_specs += [full_spec(op.shape) for op in operands]

    out = pl.pallas_call(
        _make_kernel(bb),
        out_shape=jax.ShapeDtypeStruct((n_pad, 128), jnp.float32),
        grid=(g,),
        in_specs=in_specs,
        out_specs=pl.BlockSpec((bb, 128), lambda gi: (gi, 0)),
        compiler_params=pltpu.CompilerParams(
            dimension_semantics=("parallel",),
            vmem_limit_bytes=32 * 1024 * 1024),
    )(x, *operands)
    return out[:n, :3]                           # drop batch padding + lane padding


# -----------------------------------------------------------------------------
# Synthetic parameters in PyTorch layouts (conv: OIHW, linear: (out, in)).
# -----------------------------------------------------------------------------
def make_params(key):
    ks = jax.random.split(key, 18)
    p = {}

    def conv_w(k, cout, cin):
        return 0.1 * jax.random.normal(k, (cout, cin, 3, 3), jnp.float32)

    def lin_w(k, fout, fin):
        return 0.05 * jax.random.normal(k, (fout, fin), jnp.float32)

    p["conv1_w"] = conv_w(ks[0], 16, 1)
    p["conv1_b"] = 0.01 * jax.random.normal(ks[1], (16,), jnp.float32)
    p["conv2_w"] = conv_w(ks[2], 32, 16)
    p["conv2_b"] = 0.01 * jax.random.normal(ks[3], (32,), jnp.float32)
    p["conv3_w"] = conv_w(ks[4], 64, 32)
    p["conv3_b"] = 0.01 * jax.random.normal(ks[5], (64,), jnp.float32)
    # eval-mode BatchNorm2d: (gamma, beta, running_mean, running_var, eps)
    p["bn2"] = (jnp.ones((32,)), jnp.zeros((32,)), jnp.zeros((32,)), jnp.ones((32,)), 1e-5)
    p["bn3"] = (jnp.ones((64,)), jnp.zeros((64,)), jnp.zeros((64,)), jnp.ones((64,)), 1e-5)
    for i in range(6):
        p[f"fc{i}_w"] = lin_w(ks[6 + 2 * i], FC_TRUE[i + 1], FC_TRUE[i])
        p[f"fc{i}_b"] = 0.01 * jax.random.normal(ks[7 + 2 * i], (FC_TRUE[i + 1],), jnp.float32)
    return p


if __name__ == "__main__":
    key = jax.random.PRNGKey(0)
    pkey, xkey = jax.random.split(key)
    params = make_params(pkey)
    operands = prepare_operands(params)

    # Small demo: 32 images, 16 per grid step -> grid=(2,) (exercises the batched
    # path and keeps both v7x TensorCores busy).  Production: block_b=128/256.
    x = jax.random.normal(xkey, (32, 1, 20, 12), jnp.float32)

    out = jax.block_until_ready(cnn2_forward(operands, x, block_b=16))

    assert out.shape == (32, 3)
    assert bool(jnp.all(jnp.isfinite(out))) and bool(jnp.all(out >= 0.0))
    # exact softmax normalization -> rows sum to 1 up to f32 rounding
    assert bool(jnp.allclose(jnp.sum(out, axis=1), 1.0, atol=1e-2))
    print("KERNEL_OK")
</pallas_src>

<mosaic_0001>
module attributes {stable_mosaic.version = 11 : i64} {
  func.func @kernel(%arg0: i32, %arg1: memref<320x12xf32, #tpu.memory_space<vmem>>, %arg2: memref<3x12x160xbf16, #tpu.memory_space<vmem>>, %arg3: memref<1x160xf32, #tpu.memory_space<vmem>>, %arg4: memref<3x160x256xbf16, #tpu.memory_space<vmem>>, %arg5: memref<1x256xf32, #tpu.memory_space<vmem>>, %arg6: memref<3x128x128xbf16, #tpu.memory_space<vmem>>, %arg7: memref<1x128xf32, #tpu.memory_space<vmem>>, %arg8: memref<256x128xbf16, #tpu.memory_space<vmem>>, %arg9: memref<256x128xbf16, #tpu.memory_space<vmem>>, %arg10: memref<128x64xbf16, #tpu.memory_space<vmem>>, %arg11: memref<128x64xbf16, #tpu.memory_space<vmem>>, %arg12: memref<192x1024xbf16, #tpu.memory_space<vmem>>, %arg13: memref<1x1024xf32, #tpu.memory_space<vmem>>, %arg14: memref<1024x512xbf16, #tpu.memory_space<vmem>>, %arg15: memref<1x512xf32, #tpu.memory_space<vmem>>, %arg16: memref<512x384xbf16, #tpu.memory_space<vmem>>, %arg17: memref<1x384xf32, #tpu.memory_space<vmem>>, %arg18: memref<384x128xbf16, #tpu.memory_space<vmem>>, %arg19: memref<1x128xf32, #tpu.memory_space<vmem>>, %arg20: memref<128x128xbf16, #tpu.memory_space<vmem>>, %arg21: memref<1x128xf32, #tpu.memory_space<vmem>>, %arg22: memref<128x128xbf16, #tpu.memory_space<vmem>>, %arg23: memref<1x128xf32, #tpu.memory_space<vmem>>, %arg24: memref<16x128xf32, #tpu.memory_space<vmem>>) attributes {dimension_semantics = [#tpu.dimension_semantics<parallel>], iteration_bounds = array<i64: 2>, scalar_prefetch = 0 : i64, scratch_operands = 0 : i64, tpu.core_type = #tpu.core_type<tc>, window_params = [{transform_indices = @transform_0, window_bounds = array<i64: 320, 12>}, {pipeline_mode = #tpu.pipeline_mode<synchronous>, transform_indices = @transform_1, window_bounds = array<i64: 3, 12, 160>}, {pipeline_mode = #tpu.pipeline_mode<synchronous>, transform_indices = @transform_2, window_bounds = array<i64: 1, 160>}, {pipeline_mode = #tpu.pipeline_mode<synchronous>, transform_indices = @transform_3, window_bounds = array<i64: 3, 160, 256>}, {pipeline_mode = #tpu.pipeline_mode<synchronous>, transform_indices = @transform_4, window_bounds = array<i64: 1, 256>}, {pipeline_mode = #tpu.pipeline_mode<synchronous>, transform_indices = @transform_5, window_bounds = array<i64: 3, 128, 128>}, {pipeline_mode = #tpu.pipeline_mode<synchronous>, transform_indices = @transform_6, window_bounds = array<i64: 1, 128>}, {pipeline_mode = #tpu.pipeline_mode<synchronous>, transform_indices = @transform_7, window_bounds = array<i64: 256, 128>}, {pipeline_mode = #tpu.pipeline_mode<synchronous>, transform_indices = @transform_8, window_bounds = array<i64: 256, 128>}, {pipeline_mode = #tpu.pipeline_mode<synchronous>, transform_indices = @transform_9, window_bounds = array<i64: 128, 64>}, {pipeline_mode = #tpu.pipeline_mode<synchronous>, transform_indices = @transform_10, window_bounds = array<i64: 128, 64>}, {pipeline_mode = #tpu.pipeline_mode<synchronous>, transform_indices = @transform_11, window_bounds = array<i64: 192, 1024>}, {pipeline_mode = #tpu.pipeline_mode<synchronous>, transform_indices = @transform_12, window_bounds = array<i64: 1, 1024>}, {pipeline_mode = #tpu.pipeline_mode<synchronous>, transform_indices = @transform_13, window_bounds = array<i64: 1024, 512>}, {pipeline_mode = #tpu.pipeline_mode<synchronous>, transform_indices = @transform_14, window_bounds = array<i64: 1, 512>}, {pipeline_mode = #tpu.pipeline_mode<synchronous>, transform_indices = @transform_15, window_bounds = array<i64: 512, 384>}, {pipeline_mode = #tpu.pipeline_mode<synchronous>, transform_indices = @transform_16, window_bounds = array<i64: 1, 384>}, {pipeline_mode = #tpu.pipeline_mode<synchronous>, transform_indices = @transform_17, window_bounds = array<i64: 384, 128>}, {pipeline_mode = #tpu.pipeline_mode<synchronous>, transform_indices = @transform_18, window_bounds = array<i64: 1, 128>}, {pipeline_mode = #tpu.pipeline_mode<synchronous>, transform_indices = @transform_19, window_bounds = array<i64: 128, 128>}, {pipeline_mode = #tpu.pipeline_mode<synchronous>, transform_indices = @transform_20, window_bounds = array<i64: 1, 128>}, {pipeline_mode = #tpu.pipeline_mode<synchronous>, transform_indices = @transform_21, window_bounds = array<i64: 128, 128>}, {pipeline_mode = #tpu.pipeline_mode<synchronous>, transform_indices = @transform_22, window_bounds = array<i64: 1, 128>}, {transform_indices = @transform_23, window_bounds = array<i64: 16, 128>}]} {
    %c0 = arith.constant 0 : index
    %c0_0 = arith.constant 0 : index
    %0 = vector.load %arg1[%c0, %c0_0] : memref<320x12xf32, #tpu.memory_space<vmem>>, vector<320x12xf32>
    %1 = arith.truncf %0 : vector<320x12xf32> to vector<320x12xbf16>
    %2 = vector.extract_strided_slice %1 {offsets = [0, 0], sizes = [288, 12], strides = [1, 1]} : vector<320x12xbf16> to vector<288x12xbf16>
    %c0_1 = arith.constant 0 : index
    %c0_2 = arith.constant 0 : index
    %c0_3 = arith.constant 0 : index
    %3 = vector.load %arg2[%c0_1, %c0_2, %c0_3] : memref<3x12x160xbf16, #tpu.memory_space<vmem>>, vector<1x12x160xbf16>
    %4 = vector.shape_cast %3 : vector<1x12x160xbf16> to vector<12x160xbf16>
    %cst = arith.constant dense<0.000000e+00> : vector<288x160xf32>
    %5 = tpu.matmul %2, %4, %cst {dimension_numbers = #tpu.dot_dimension_numbers<[1], [0], [0], [1], [0, 0, 1, 1], [], []>} : vector<288x12xbf16>, vector<12x160xbf16>, vector<288x160xf32> -> vector<288x160xf32>
    %6 = vector.extract_strided_slice %1 {offsets = [16, 0], sizes = [288, 12], strides = [1, 1]} : vector<320x12xbf16> to vector<288x12xbf16>
    %c1 = arith.constant 1 : index
    %c0_4 = arith.constant 0 : index
    %c0_5 = arith.constant 0 : index
    %7 = vector.load %arg2[%c1, %c0_4, %c0_5] : memref<3x12x160xbf16, #tpu.memory_space<vmem>>, vector<1x12x160xbf16>
    %8 = vector.shape_cast %7 : vector<1x12x160xbf16> to vector<12x160xbf16>
    %cst_6 = arith.constant dense<0.000000e+00> : vector<288x160xf32>
    %9 = tpu.matmul %6, %8, %cst_6 {dimension_numbers = #tpu.dot_dimension_numbers<[1], [0], [0], [1], [0, 0, 1, 1], [], []>} : vector<288x12xbf16>, vector<12x160xbf16>, vector<288x160xf32> -> vector<288x160xf32>
    %10 = arith.addf %5, %9 : vector<288x160xf32>
    %11 = vector.extract_strided_slice %1 {offsets = [32, 0], sizes = [288, 12], strides = [1, 1]} : vector<320x12xbf16> to vector<288x12xbf16>
    %c2 = arith.constant 2 : index
    %c0_7 = arith.constant 0 : index
    %c0_8 = arith.constant 0 : index
    %12 = vector.load %arg2[%c2, %c0_7, %c0_8] : memref<3x12x160xbf16, #tpu.memory_space<vmem>>, vector<1x12x160xbf16>
    %13 = vector.shape_cast %12 : vector<1x12x160xbf16> to vector<12x160xbf16>
    %cst_9 = arith.constant dense<0.000000e+00> : vector<288x160xf32>
    %14 = tpu.matmul %11, %13, %cst_9 {dimension_numbers = #tpu.dot_dimension_numbers<[1], [0], [0], [1], [0, 0, 1, 1], [], []>} : vector<288x12xbf16>, vector<12x160xbf16>, vector<288x160xf32> -> vector<288x160xf32>
    %15 = arith.addf %10, %14 : vector<288x160xf32>
    %c0_10 = arith.constant 0 : index
    %c0_11 = arith.constant 0 : index
    %16 = vector.load %arg3[%c0_10, %c0_11] : memref<1x160xf32, #tpu.memory_space<vmem>>, vector<1x160xf32>
    %17 = vector.broadcast %16 : vector<1x160xf32> to vector<288x160xf32>
    %18 = arith.addf %15, %17 : vector<288x160xf32>
    %cst_12 = arith.constant 0.000000e+00 : f32
    %19 = vector.broadcast %cst_12 : f32 to vector<288x160xf32>
    %20 = arith.maximumf %18, %19 : vector<288x160xf32>
    %21 = arith.truncf %20 : vector<288x160xf32> to vector<288x160xbf16>
    %22 = vector.extract_strided_slice %21 {offsets = [0, 0], sizes = [256, 160], strides = [1, 1]} : vector<288x160xbf16> to vector<256x160xbf16>
    %c0_13 = arith.constant 0 : index
    %c0_14 = arith.constant 0 : index
    %c0_15 = arith.constant 0 : index
    %23 = vector.load %arg4[%c0_13, %c0_14, %c0_15] : memref<3x160x256xbf16, #tpu.memory_space<vmem>>, vector<1x160x256xbf16>
    %24 = vector.shape_cast %23 : vector<1x160x256xbf16> to vector<160x256xbf16>
    %cst_16 = arith.constant dense<0.000000e+00> : vector<256x256xf32>
    %25 = tpu.matmul %22, %24, %cst_16 {dimension_numbers = #tpu.dot_dimension_numbers<[1], [0], [0], [1], [0, 0, 1, 1], [], []>} : vector<256x160xbf16>, vector<160x256xbf16>, vector<256x256xf32> -> vector<256x256xf32>
    %26 = vector.extract_strided_slice %21 {offsets = [16, 0], sizes = [256, 160], strides = [1, 1]} : vector<288x160xbf16> to vector<256x160xbf16>
    %c1_17 = arith.constant 1 : index
    %c0_18 = arith.constant 0 : index
    %c0_19 = arith.constant 0 : index
    %27 = vector.load %arg4[%c1_17, %c0_18, %c0_19] : memref<3x160x256xbf16, #tpu.memory_space<vmem>>, vector<1x160x256xbf16>
    %28 = vector.shape_cast %27 : vector<1x160x256xbf16> to vector<160x256xbf16>
    %cst_20 = arith.constant dense<0.000000e+00> : vector<256x256xf32>
    %29 = tpu.matmul %26, %28, %cst_20 {dimension_numbers = #tpu.dot_dimension_numbers<[1], [0], [0], [1], [0, 0, 1, 1], [], []>} : vector<256x160xbf16>, vector<160x256xbf16>, vector<256x256xf32> -> vector<256x256xf32>
    %30 = arith.addf %25, %29 : vector<256x256xf32>
    %31 = vector.extract_strided_slice %21 {offsets = [32, 0], sizes = [256, 160], strides = [1, 1]} : vector<288x160xbf16> to vector<256x160xbf16>
    %c2_21 = arith.constant 2 : index
    %c0_22 = arith.constant 0 : index
    %c0_23 = arith.constant 0 : index
    %32 = vector.load %arg4[%c2_21, %c0_22, %c0_23] : memref<3x160x256xbf16, #tpu.memory_space<vmem>>, vector<1x160x256xbf16>
    %33 = vector.shape_cast %32 : vector<1x160x256xbf16> to vector<160x256xbf16>
    %cst_24 = arith.constant dense<0.000000e+00> : vector<256x256xf32>
    %34 = tpu.matmul %31, %33, %cst_24 {dimension_numbers = #tpu.dot_dimension_numbers<[1], [0], [0], [1], [0, 0, 1, 1], [], []>} : vector<256x160xbf16>, vector<160x256xbf16>, vector<256x256xf32> -> vector<256x256xf32>
    %35 = arith.addf %30, %34 : vector<256x256xf32>
    %c0_25 = arith.constant 0 : index
    %c0_26 = arith.constant 0 : index
    %36 = vector.load %arg5[%c0_25, %c0_26] : memref<1x256xf32, #tpu.memory_space<vmem>>, vector<1x256xf32>
    %37 = vector.broadcast %36 : vector<1x256xf32> to vector<256x256xf32>
    %38 = arith.addf %35, %37 : vector<256x256xf32>
    %cst_27 = arith.constant 0.000000e+00 : f32
    %39 = vector.broadcast %cst_27 : f32 to vector<256x256xf32>
    %40 = arith.maximumf %38, %39 : vector<256x256xf32>
    %41 = arith.truncf %40 : vector<256x256xf32> to vector<256x256xbf16>
    %42 = vector.shape_cast %41 : vector<256x256xbf16> to vector<8x32x256xbf16>
    %43 = vector.extract_strided_slice %42 {offsets = [0, 0, 0], sizes = [8, 16, 256], strides = [1, 1, 1]} : vector<8x32x256xbf16> to vector<8x16x256xbf16>
    %44 = vector.extract_strided_slice %42 {offsets = [0, 16, 0], sizes = [8, 16, 256], strides = [1, 1, 1]} : vector<8x32x256xbf16> to vector<8x16x256xbf16>
    %45 = arith.maximumf %43, %44 : vector<8x16x256xbf16>
    %46 = vector.shape_cast %45 : vector<8x16x256xbf16> to vector<128x256xbf16>
    %c0_28 = arith.constant 0 : index
    %c0_29 = arith.constant 0 : index
    %47 = vector.load %arg8[%c0_28, %c0_29] : memref<256x128xbf16, #tpu.memory_space<vmem>>, vector<256x128xbf16>
    %cst_30 = arith.constant dense<0.000000e+00> : vector<128x128xf32>
    %48 = tpu.matmul %46, %47, %cst_30 {dimension_numbers = #tpu.dot_dimension_numbers<[1], [0], [0], [1], [0, 0, 1, 1], [], []>} : vector<128x256xbf16>, vector<256x128xbf16>, vector<128x128xf32> -> vector<128x128xf32>
    %c0_31 = arith.constant 0 : index
    %c0_32 = arith.constant 0 : index
    %49 = vector.load %arg9[%c0_31, %c0_32] : memref<256x128xbf16, #tpu.memory_space<vmem>>, vector<256x128xbf16>
    %cst_33 = arith.constant dense<0.000000e+00> : vector<128x128xf32>
    %50 = tpu.matmul %46, %49, %cst_33 {dimension_numbers = #tpu.dot_dimension_numbers<[1], [0], [0], [1], [0, 0, 1, 1], [], []>} : vector<128x256xbf16>, vector<256x128xbf16>, vector<128x128xf32> -> vector<128x128xf32>
    %51 = arith.maximumf %48, %50 : vector<128x128xf32>
    %52 = arith.truncf %51 : vector<128x128xf32> to vector<128x128xbf16>
    %53 = vector.extract_strided_slice %52 {offsets = [0, 0], sizes = [96, 128], strides = [1, 1]} : vector<128x128xbf16> to vector<96x128xbf16>
    %c0_34 = arith.constant 0 : index
    %c0_35 = arith.constant 0 : index
    %c0_36 = arith.constant 0 : index
    %54 = vector.load %arg6[%c0_34, %c0_35, %c0_36] : memref<3x128x128xbf16, #tpu.memory_space<vmem>>, vector<1x128x128xbf16>
    %55 = vector.shape_cast %54 : vector<1x128x128xbf16> to vector<128x128xbf16>
    %cst_37 = arith.constant dense<0.000000e+00> : vector<96x128xf32>
    %56 = tpu.matmul %53, %55, %cst_37 {dimension_numbers = #tpu.dot_dimension_numbers<[1], [0], [0], [1], [0, 0, 1, 1], [], []>} : vector<96x128xbf16>, vector<128x128xbf16>, vector<96x128xf32> -> vector<96x128xf32>
    %57 = vector.extract_strided_slice %52 {offsets = [16, 0], sizes = [96, 128], strides = [1, 1]} : vector<128x128xbf16> to vector<96x128xbf16>
    %c1_38 = arith.constant 1 : index
    %c0_39 = arith.constant 0 : index
    %c0_40 = arith.constant 0 : index
    %58 = vector.load %arg6[%c1_38, %c0_39, %c0_40] : memref<3x128x128xbf16, #tpu.memory_space<vmem>>, vector<1x128x128xbf16>
    %59 = vector.shape_cast %58 : vector<1x128x128xbf16> to vector<128x128xbf16>
    %cst_41 = arith.constant dense<0.000000e+00> : vector<96x128xf32>
    %60 = tpu.matmul %57, %59, %cst_41 {dimension_numbers = #tpu.dot_dimension_numbers<[1], [0], [0], [1], [0, 0, 1, 1], [], []>} : vector<96x128xbf16>, vector<128x128xbf16>, vector<96x128xf32> -> vector<96x128xf32>
    %61 = arith.addf %56, %60 : vector<96x128xf32>
    %62 = vector.extract_strided_slice %52 {offsets = [32, 0], sizes = [96, 128], strides = [1, 1]} : vector<128x128xbf16> to vector<96x128xbf16>
    %c2_42 = arith.constant 2 : index
    %c0_43 = arith.constant 0 : index
    %c0_44 = arith.constant 0 : index
    %63 = vector.load %arg6[%c2_42, %c0_43, %c0_44] : memref<3x128x128xbf16, #tpu.memory_space<vmem>>, vector<1x128x128xbf16>
    %64 = vector.shape_cast %63 : vector<1x128x128xbf16> to vector<128x128xbf16>
    %cst_45 = arith.constant dense<0.000000e+00> : vector<96x128xf32>
    %65 = tpu.matmul %62, %64, %cst_45 {dimension_numbers = #tpu.dot_dimension_numbers<[1], [0], [0], [1], [0, 0, 1, 1], [], []>} : vector<96x128xbf16>, vector<128x128xbf16>, vector<96x128xf32> -> vector<96x128xf32>
    %66 = arith.addf %61, %65 : vector<96x128xf32>
    %c0_46 = arith.constant 0 : index
    %c0_47 = arith.constant 0 : index
    %67 = vector.load %arg7[%c0_46, %c0_47] : memref<1x128xf32, #tpu.memory_space<vmem>>, vector<1x128xf32>
    %68 = vector.broadcast %67 : vector<1x128xf32> to vector<96x128xf32>
    %69 = arith.addf %66, %68 : vector<96x128xf32>
    %cst_48 = arith.constant 0.000000e+00 : f32
    %70 = vector.broadcast %cst_48 : f32 to vector<96x128xf32>
    %71 = arith.maximumf %69, %70 : vector<96x128xf32>
    %72 = arith.truncf %71 : vector<96x128xf32> to vector<96x128xbf16>
    %73 = vector.shape_cast %72 : vector<96x128xbf16> to vector<3x32x128xbf16>
    %74 = vector.extract_strided_slice %73 {offsets = [0, 0, 0], sizes = [3, 16, 128], strides = [1, 1, 1]} : vector<3x32x128xbf16> to vector<3x16x128xbf16>
    %75 = vector.extract_strided_slice %73 {offsets = [0, 16, 0], sizes = [3, 16, 128], strides = [1, 1, 1]} : vector<3x32x128xbf16> to vector<3x16x128xbf16>
    %76 = arith.maximumf %74, %75 : vector<3x16x128xbf16>
    %77 = vector.shape_cast %76 : vector<3x16x128xbf16> to vector<48x128xbf16>
    %c0_49 = arith.constant 0 : index
    %c0_50 = arith.constant 0 : index
    %78 = vector.load %arg10[%c0_49, %c0_50] : memref<128x64xbf16, #tpu.memory_space<vmem>>, vector<128x64xbf16>
    %cst_51 = arith.constant dense<0.000000e+00> : vector<48x64xf32>
    %79 = tpu.matmul %77, %78, %cst_51 {dimension_numbers = #tpu.dot_dimension_numbers<[1], [0], [0], [1], [0, 0, 1, 1], [], []>} : vector<48x128xbf16>, vector<128x64xbf16>, vector<48x64xf32> -> vector<48x64xf32>
    %c0_52 = arith.constant 0 : index
    %c0_53 = arith.constant 0 : index
    %80 = vector.load %arg11[%c0_52, %c0_53] : memref<128x64xbf16, #tpu.memory_space<vmem>>, vector<128x64xbf16>
    %cst_54 = arith.constant dense<0.000000e+00> : vector<48x64xf32>
    %81 = tpu.matmul %77, %80, %cst_54 {dimension_numbers = #tpu.dot_dimension_numbers<[1], [0], [0], [1], [0, 0, 1, 1], [], []>} : vector<48x128xbf16>, vector<128x64xbf16>, vector<48x64xf32> -> vector<48x64xf32>
    %82 = arith.maximumf %79, %81 : vector<48x64xf32>
    %83 = arith.truncf %82 : vector<48x64xf32> to vector<48x64xbf16>
    %84 = vector.extract_strided_slice %83 {offsets = [0, 0], sizes = [16, 64], strides = [1, 1]} : vector<48x64xbf16> to vector<16x64xbf16>
    %c0_55 = arith.constant 0 : index
    %c0_56 = arith.constant 0 : index
    %85 = vector.load %arg12[%c0_55, %c0_56] : memref<192x1024xbf16, #tpu.memory_space<vmem>>, vector<64x1024xbf16>
    %cst_57 = arith.constant dense<0.000000e+00> : vector<16x1024xf32>
    %86 = tpu.matmul %84, %85, %cst_57 {dimension_numbers = #tpu.dot_dimension_numbers<[1], [0], [0], [1], [0, 0, 1, 1], [], []>} : vector<16x64xbf16>, vector<64x1024xbf16>, vector<16x1024xf32> -> vector<16x1024xf32>
    %87 = vector.extract_strided_slice %83 {offsets = [16, 0], sizes = [16, 64], strides = [1, 1]} : vector<48x64xbf16> to vector<16x64xbf16>
    %c64 = arith.constant 64 : index
    %c0_58 = arith.constant 0 : index
    %88 = vector.load %arg12[%c64, %c0_58] : memref<192x1024xbf16, #tpu.memory_space<vmem>>, vector<64x1024xbf16>
    %cst_59 = arith.constant dense<0.000000e+00> : vector<16x1024xf32>
    %89 = tpu.matmul %87, %88, %cst_59 {dimension_numbers = #tpu.dot_dimension_numbers<[1], [0], [0], [1], [0, 0, 1, 1], [], []>} : vector<16x64xbf16>, vector<64x1024xbf16>, vector<16x1024xf32> -> vector<16x1024xf32>
    %90 = arith.addf %86, %89 : vector<16x1024xf32>
    %91 = vector.extract_strided_slice %83 {offsets = [32, 0], sizes = [16, 64], strides = [1, 1]} : vector<48x64xbf16> to vector<16x64xbf16>
    %c128 = arith.constant 128 : index
    %c0_60 = arith.constant 0 : index
    %92 = vector.load %arg12[%c128, %c0_60] : memref<192x1024xbf16, #tpu.memory_space<vmem>>, vector<64x1024xbf16>
    %cst_61 = arith.constant dense<0.000000e+00> : vector<16x1024xf32>
    %93 = tpu.matmul %91, %92, %cst_61 {dimension_numbers = #tpu.dot_dimension_numbers<[1], [0], [0], [1], [0, 0, 1, 1], [], []>} : vector<16x64xbf16>, vector<64x1024xbf16>, vector<16x1024xf32> -> vector<16x1024xf32>
    %94 = arith.addf %90, %93 : vector<16x1024xf32>
    %c0_62 = arith.constant 0 : index
    %c0_63 = arith.constant 0 : index
    %95 = vector.load %arg13[%c0_62, %c0_63] : memref<1x1024xf32, #tpu.memory_space<vmem>>, vector<1x1024xf32>
    %96 = vector.broadcast %95 : vector<1x1024xf32> to vector<16x1024xf32>
    %97 = arith.addf %94, %96 : vector<16x1024xf32>
    %cst_64 = arith.constant 0.000000e+00 : f32
    %98 = vector.broadcast %cst_64 : f32 to vector<16x1024xf32>
    %99 = arith.maximumf %97, %98 : vector<16x1024xf32>
    %100 = arith.truncf %99 : vector<16x1024xf32> to vector<16x1024xbf16>
    %c0_65 = arith.constant 0 : index
    %c0_66 = arith.constant 0 : index
    %101 = vector.load %arg14[%c0_65, %c0_66] : memref<1024x512xbf16, #tpu.memory_space<vmem>>, vector<1024x512xbf16>
    %cst_67 = arith.constant dense<0.000000e+00> : vector<16x512xf32>
    %102 = tpu.matmul %100, %101, %cst_67 {dimension_numbers = #tpu.dot_dimension_numbers<[1], [0], [0], [1], [0, 0, 1, 1], [], []>} : vector<16x1024xbf16>, vector<1024x512xbf16>, vector<16x512xf32> -> vector<16x512xf32>
    %c0_68 = arith.constant 0 : index
    %c0_69 = arith.constant 0 : index
    %103 = vector.load %arg15[%c0_68, %c0_69] : memref<1x512xf32, #tpu.memory_space<vmem>>, vector<1x512xf32>
    %104 = vector.broadcast %103 : vector<1x512xf32> to vector<16x512xf32>
    %105 = arith.addf %102, %104 : vector<16x512xf32>
    %cst_70 = arith.constant 0.000000e+00 : f32
    %106 = vector.broadcast %cst_70 : f32 to vector<16x512xf32>
    %107 = arith.maximumf %105, %106 : vector<16x512xf32>
    %108 = arith.truncf %107 : vector<16x512xf32> to vector<16x512xbf16>
    %c0_71 = arith.constant 0 : index
    %c0_72 = arith.constant 0 : index
    %109 = vector.load %arg16[%c0_71, %c0_72] : memref<512x384xbf16, #tpu.memory_space<vmem>>, vector<512x384xbf16>
    %cst_73 = arith.constant dense<0.000000e+00> : vector<16x384xf32>
    %110 = tpu.matmul %108, %109, %cst_73 {dimension_numbers = #tpu.dot_dimension_numbers<[1], [0], [0], [1], [0, 0, 1, 1], [], []>} : vector<16x512xbf16>, vector<512x384xbf16>, vector<16x384xf32> -> vector<16x384xf32>
    %c0_74 = arith.constant 0 : index
    %c0_75 = arith.constant 0 : index
    %111 = vector.load %arg17[%c0_74, %c0_75] : memref<1x384xf32, #tpu.memory_space<vmem>>, vector<1x384xf32>
    %112 = vector.broadcast %111 : vector<1x384xf32> to vector<16x384xf32>
    %113 = arith.addf %110, %112 : vector<16x384xf32>
    %cst_76 = arith.constant 0.000000e+00 : f32
    %114 = vector.broadcast %cst_76 : f32 to vector<16x384xf32>
    %115 = arith.maximumf %113, %114 : vector<16x384xf32>
    %116 = arith.truncf %115 : vector<16x384xf32> to vector<16x384xbf16>
    %c0_77 = arith.constant 0 : index
    %c0_78 = arith.constant 0 : index
    %117 = vector.load %arg18[%c0_77, %c0_78] : memref<384x128xbf16, #tpu.memory_space<vmem>>, vector<384x128xbf16>
    %cst_79 = arith.constant dense<0.000000e+00> : vector<16x128xf32>
    %118 = tpu.matmul %116, %117, %cst_79 {dimension_numbers = #tpu.dot_dimension_numbers<[1], [0], [0], [1], [0, 0, 1, 1], [], []>} : vector<16x384xbf16>, vector<384x128xbf16>, vector<16x128xf32> -> vector<16x128xf32>
    %c0_80 = arith.constant 0 : index
    %c0_81 = arith.constant 0 : index
    %119 = vector.load %arg19[%c0_80, %c0_81] : memref<1x128xf32, #tpu.memory_space<vmem>>, vector<1x128xf32>
    %120 = vector.broadcast %119 : vector<1x128xf32> to vector<16x128xf32>
    %121 = arith.addf %118, %120 : vector<16x128xf32>
    %cst_82 = arith.constant 0.000000e+00 : f32
    %122 = vector.broadcast %cst_82 : f32 to vector<16x128xf32>
    %123 = arith.maximumf %121, %122 : vector<16x128xf32>
    %124 = arith.truncf %123 : vector<16x128xf32> to vector<16x128xbf16>
    %c0_83 = arith.constant 0 : index
    %c0_84 = arith.constant 0 : index
    %125 = vector.load %arg20[%c0_83, %c0_84] : memref<128x128xbf16, #tpu.memory_space<vmem>>, vector<128x128xbf16>
    %cst_85 = arith.constant dense<0.000000e+00> : vector<16x128xf32>
    %126 = tpu.matmul %124, %125, %cst_85 {dimension_numbers = #tpu.dot_dimension_numbers<[1], [0], [0], [1], [0, 0, 1, 1], [], []>} : vector<16x128xbf16>, vector<128x128xbf16>, vector<16x128xf32> -> vector<16x128xf32>
    %c0_86 = arith.constant 0 : index
    %c0_87 = arith.constant 0 : index
    %127 = vector.load %arg21[%c0_86, %c0_87] : memref<1x128xf32, #tpu.memory_space<vmem>>, vector<1x128xf32>
    %128 = vector.broadcast %127 : vector<1x128xf32> to vector<16x128xf32>
    %129 = arith.addf %126, %128 : vector<16x128xf32>
    %cst_88 = arith.constant 0.000000e+00 : f32
    %130 = vector.broadcast %cst_88 : f32 to vector<16x128xf32>
    %131 = arith.maximumf %129, %130 : vector<16x128xf32>
    %132 = arith.truncf %131 : vector<16x128xf32> to vector<16x128xbf16>
    %c0_89 = arith.constant 0 : index
    %c0_90 = arith.constant 0 : index
    %133 = vector.load %arg22[%c0_89, %c0_90] : memref<128x128xbf16, #tpu.memory_space<vmem>>, vector<128x128xbf16>
    %cst_91 = arith.constant dense<0.000000e+00> : vector<16x128xf32>
    %134 = tpu.matmul %132, %133, %cst_91 {dimension_numbers = #tpu.dot_dimension_numbers<[1], [0], [0], [1], [0, 0, 1, 1], [], []>} : vector<16x128xbf16>, vector<128x128xbf16>, vector<16x128xf32> -> vector<16x128xf32>
    %c0_92 = arith.constant 0 : index
    %c0_93 = arith.constant 0 : index
    %135 = vector.load %arg23[%c0_92, %c0_93] : memref<1x128xf32, #tpu.memory_space<vmem>>, vector<1x128xf32>
    %136 = vector.broadcast %135 : vector<1x128xf32> to vector<16x128xf32>
    %137 = arith.addf %134, %136 : vector<16x128xf32>
    %cst_94 = arith.constant 0.000000e+00 : f32
    %138 = vector.broadcast %cst_94 : f32 to vector<16x128xf32>
    %139 = arith.maximumf %137, %138 : vector<16x128xf32>
    %140 = tpu.iota {dimensions = array<i32: 1>} : vector<16x128xi32>
    %c3_i32 = arith.constant 3 : i32
    %141 = vector.broadcast %c3_i32 : i32 to vector<16x128xi32>
    %142 = arith.cmpi slt, %140, %141 : vector<16x128xi32>
    %cst_95 = arith.constant -1.000000e+30 : f32
    %143 = vector.broadcast %cst_95 : f32 to vector<16x128xf32>
    %144 = arith.select %142, %139, %143 : vector<16x128xi1>, vector<16x128xf32>
    %cst_96 = arith.constant dense<0xFF800000> : vector<16xf32>
    %145 = vector.multi_reduction <maximumf>, %144, %cst_96 [1] : vector<16x128xf32> to vector<16xf32>
    %146 = vector.shape_cast %145 : vector<16xf32> to vector<16x1xf32>
    %147 = vector.broadcast %146 : vector<16x1xf32> to vector<16x128xf32>
    %148 = arith.subf %144, %147 : vector<16x128xf32>
    %149 = math.exp %148 : vector<16x128xf32>
    %cst_97 = arith.constant dense<0.000000e+00> : vector<16xf32>
    %150 = vector.multi_reduction <add>, %149, %cst_97 [1] : vector<16x128xf32> to vector<16xf32>
    %151 = vector.shape_cast %150 : vector<16xf32> to vector<16x1xf32>
    %152 = vector.broadcast %151 : vector<16x1xf32> to vector<16x128xf32>
    %153 = arith.divf %149, %152 : vector<16x128xf32>
    %c0_98 = arith.constant 0 : index
    %c0_99 = arith.constant 0 : index
    %154 = vector.load %arg24[%c0_98, %c0_99] : memref<16x128xf32, #tpu.memory_space<vmem>>, vector<16x128xf32>
    tpu.vector_store %arg24[%c0_98, %c0_99], %153 {strides = array<i32>} : memref<16x128xf32, #tpu.memory_space<vmem>>, vector<16x128xf32>,
    return
  }
  func.func @transform_0(%arg0: i32) -> (i32, i32) {
    %c0_i32 = arith.constant 0 : i32
    %c0_i32_0 = arith.constant 0 : i32
    return %arg0, %c0_i32 : i32, i32
  }
  func.func @transform_1(%arg0: i32) -> (i32, i32, i32) {
    %c0_i32 = arith.constant 0 : i32
    %c0_i32_0 = arith.constant 0 : i32
    %c0_i32_1 = arith.constant 0 : i32
    %c0_i32_2 = arith.constant 0 : i32
    return %c0_i32, %c0_i32_0, %c0_i32_1 : i32, i32, i32
  }
  func.func @transform_2(%arg0: i32) -> (i32, i32) {
    %c0_i32 = arith.constant 0 : i32
    %c0_i32_0 = arith.constant 0 : i32
    %c0_i32_1 = arith.constant 0 : i32
    return %c0_i32, %c0_i32_0 : i32, i32
  }
  func.func @transform_3(%arg0: i32) -> (i32, i32, i32) {
    %c0_i32 = arith.constant 0 : i32
    %c0_i32_0 = arith.constant 0 : i32
    %c0_i32_1 = arith.constant 0 : i32
    %c0_i32_2 = arith.constant 0 : i32
    return %c0_i32, %c0_i32_0, %c0_i32_1 : i32, i32, i32
  }
  func.func @transform_4(%arg0: i32) -> (i32, i32) {
    %c0_i32 = arith.constant 0 : i32
    %c0_i32_0 = arith.constant 0 : i32
    %c0_i32_1 = arith.constant 0 : i32
    return %c0_i32, %c0_i32_0 : i32, i32
  }
  func.func @transform_5(%arg0: i32) -> (i32, i32, i32) {
    %c0_i32 = arith.constant 0 : i32
    %c0_i32_0 = arith.constant 0 : i32
    %c0_i32_1 = arith.constant 0 : i32
    %c0_i32_2 = arith.constant 0 : i32
    return %c0_i32, %c0_i32_0, %c0_i32_1 : i32, i32, i32
  }
  func.func @transform_6(%arg0: i32) -> (i32, i32) {
    %c0_i32 = arith.constant 0 : i32
    %c0_i32_0 = arith.constant 0 : i32
    %c0_i32_1 = arith.constant 0 : i32
    return %c0_i32, %c0_i32_0 : i32, i32
  }
  func.func @transform_7(%arg0: i32) -> (i32, i32) {
    %c0_i32 = arith.constant 0 : i32
    %c0_i32_0 = arith.constant 0 : i32
    %c0_i32_1 = arith.constant 0 : i32
    return %c0_i32, %c0_i32_0 : i32, i32
  }
  func.func @transform_8(%arg0: i32) -> (i32, i32) {
    %c0_i32 = arith.constant 0 : i32
    %c0_i32_0 = arith.constant 0 : i32
    %c0_i32_1 = arith.constant 0 : i32
    return %c0_i32, %c0_i32_0 : i32, i32
  }
  func.func @transform_9(%arg0: i32) -> (i32, i32) {
    %c0_i32 = arith.constant 0 : i32
    %c0_i32_0 = arith.constant 0 : i32
    %c0_i32_1 = arith.constant 0 : i32
    return %c0_i32, %c0_i32_0 : i32, i32
  }
  func.func @transform_10(%arg0: i32) -> (i32, i32) {
    %c0_i32 = arith.constant 0 : i32
    %c0_i32_0 = arith.constant 0 : i32
    %c0_i32_1 = arith.constant 0 : i32
    return %c0_i32, %c0_i32_0 : i32, i32
  }
  func.func @transform_11(%arg0: i32) -> (i32, i32) {
    %c0_i32 = arith.constant 0 : i32
    %c0_i32_0 = arith.constant 0 : i32
    %c0_i32_1 = arith.constant 0 : i32
    return %c0_i32, %c0_i32_0 : i32, i32
  }
  func.func @transform_12(%arg0: i32) -> (i32, i32) {
    %c0_i32 = arith.constant 0 : i32
    %c0_i32_0 = arith.constant 0 : i32
    %c0_i32_1 = arith.constant 0 : i32
    return %c0_i32, %c0_i32_0 : i32, i32
  }
  func.func @transform_13(%arg0: i32) -> (i32, i32) {
    %c0_i32 = arith.constant 0 : i32
    %c0_i32_0 = arith.constant 0 : i32
    %c0_i32_1 = arith.constant 0 : i32
    return %c0_i32, %c0_i32_0 : i32, i32
  }
  func.func @transform_14(%arg0: i32) -> (i32, i32) {
    %c0_i32 = arith.constant 0 : i32
    %c0_i32_0 = arith.constant 0 : i32
    %c0_i32_1 = arith.constant 0 : i32
    return %c0_i32, %c0_i32_0 : i32, i32
  }
  func.func @transform_15(%arg0: i32) -> (i32, i32) {
    %c0_i32 = arith.constant 0 : i32
    %c0_i32_0 = arith.constant 0 : i32
    %c0_i32_1 = arith.constant 0 : i32
    return %c0_i32, %c0_i32_0 : i32, i32
  }
  func.func @transform_16(%arg0: i32) -> (i32, i32) {
    %c0_i32 = arith.constant 0 : i32
    %c0_i32_0 = arith.constant 0 : i32
    %c0_i32_1 = arith.constant 0 : i32
    return %c0_i32, %c0_i32_0 : i32, i32
  }
  func.func @transform_17(%arg0: i32) -> (i32, i32) {
    %c0_i32 = arith.constant 0 : i32
    %c0_i32_0 = arith.constant 0 : i32
    %c0_i32_1 = arith.constant 0 : i32
    return %c0_i32, %c0_i32_0 : i32, i32
  }
  func.func @transform_18(%arg0: i32) -> (i32, i32) {
    %c0_i32 = arith.constant 0 : i32
    %c0_i32_0 = arith.constant 0 : i32
    %c0_i32_1 = arith.constant 0 : i32
    return %c0_i32, %c0_i32_0 : i32, i32
  }
  func.func @transform_19(%arg0: i32) -> (i32, i32) {
    %c0_i32 = arith.constant 0 : i32
    %c0_i32_0 = arith.constant 0 : i32
    %c0_i32_1 = arith.constant 0 : i32
    return %c0_i32, %c0_i32_0 : i32, i32
  }
  func.func @transform_20(%arg0: i32) -> (i32, i32) {
    %c0_i32 = arith.constant 0 : i32
    %c0_i32_0 = arith.constant 0 : i32
    %c0_i32_1 = arith.constant 0 : i32
    return %c0_i32, %c0_i32_0 : i32, i32
  }
  func.func @transform_21(%arg0: i32) -> (i32, i32) {
    %c0_i32 = arith.constant 0 : i32
    %c0_i32_0 = arith.constant 0 : i32
    %c0_i32_1 = arith.constant 0 : i32
    return %c0_i32, %c0_i32_0 : i32, i32
  }
  func.func @transform_22(%arg0: i32) -> (i32, i32) {
    %c0_i32 = arith.constant 0 : i32
    %c0_i32_0 = arith.constant 0 : i32
    %c0_i32_1 = arith.constant 0 : i32
    return %c0_i32, %c0_i32_0 : i32, i32
  }
  func.func @transform_23(%arg0: i32) -> (i32, i32) {
    %c0_i32 = arith.constant 0 : i32
    %c0_i32_0 = arith.constant 0 : i32
    return %arg0, %c0_i32 : i32, i32
  }
}

</mosaic_0001>

<bundles_post_ra>
// kernel: tpu_custom_call.1
= control target key start
LH: loop header
LB: loop body
LE: loop exit
PB: predicated region body
PF: predicated region fallthrough
CT: control target
= control target key end

     0   :  { %s14006_s0 = inlined_call_operand.vmem [shape: f32[640,12], index: 0, kind: input, shape index: {}]   ;;  %s14007_s1 = inlined_call_operand.hbm [shape: bf16[3,12,160], index: 1, kind: input, shape index: {}]   ;;  %s14008_s2 = inlined_call_operand.hbm [shape: f32[1,160], index: 2, kind: input, shape index: {}]   ;;  %s14009_s3 = inlined_call_operand.hbm [shape: bf16[3,160,256], index: 3, kind: input, shape index: {}]   ;;  %s14010_s4 = inlined_call_operand.hbm [shape: f32[1,256], index: 4, kind: input, shape index: {}]   ;;  %s14011_s5 = inlined_call_operand.hbm [shape: bf16[3,128,128], index: 5, kind: input, shape index: {}]   ;;  %s14012_s6 = inlined_call_operand.hbm [shape: f32[1,128], index: 6, kind: input, shape index: {}]   ;;  %s14013_s7 = inlined_call_operand.hbm [shape: bf16[256,128], index: 7, kind: input, shape index: {}]   ;;  %s14014_s8 = inlined_call_operand.hbm [shape: bf16[256,128], index: 8, kind: input, shape index: {}]   ;;  %s14015_s9 = inlined_call_operand.vmem [shape: bf16[128,64], index: 9, kind: input, shape index: {}]   ;;  %s14016_s10 = inlined_call_operand.vmem [shape: bf16[128,64], index: 10, kind: input, shape index: {}]   ;;  %s14017_s11 = inlined_call_operand.vmem [shape: bf16[192,1024], index: 11, kind: input, shape index: {}]   ;;  %s14018_s12 = inlined_call_operand.vmem [shape: f32[1,1024], index: 12, kind: input, shape index: {}]   ;;  %s14019_s13 = inlined_call_operand.hbm [shape: bf16[1024,512], index: 13, kind: input, shape index: {}]   ;;  %s14020_s14 = inlined_call_operand.hbm [shape: f32[1,512], index: 14, kind: input, shape index: {}]   ;;  %s14021_s15 = inlined_call_operand.hbm [shape: bf16[512,384], index: 15, kind: input, shape index: {}]   ;;  %s14022_s16 = inlined_call_operand.hbm [shape: f32[1,384], index: 16, kind: input, shape index: {}]   ;;  %s14023_s17 = inlined_call_operand.vmem [shape: bf16[384,128], index: 17, kind: input, shape index: {}]   ;;  %s14024_s18 = inlined_call_operand.vmem [shape: f32[1,128], index: 18, kind: input, shape index: {}]   ;;  %s14025_s19 = inlined_call_operand.hbm [shape: bf16[128,128], index: 19, kind: input, shape index: {}]   ;;  %s14026_s20 = inlined_call_operand.vmem [shape: f32[1,128], index: 20, kind: input, shape index: {}]   ;;  %s14027_s21 = inlined_call_operand.hbm [shape: bf16[128,128], index: 21, kind: input, shape index: {}]   ;;  %s14028_s22 = inlined_call_operand.vmem [shape: f32[1,128], index: 22, kind: input, shape index: {}]   ;;  %s14029_s23 = inlined_call_operand.hbm [shape: f32[32,128], index: 23, kind: output, shape index: {}]  }
   0x1   :  { %14059 = sst [smem:[#allocation43_spill]] %s14006_s0 }
   0x2   :  { %14060 = sst [smem:[#allocation44_spill]] %s14007_s1 }
   0x3   :  { %14061 = sst [smem:[#allocation45_spill]] %s14008_s2 }
   0x4   :  { %14062 = sst [smem:[#allocation46_spill]] %s14009_s3 }
   0x5   :  { %14063 = sst [smem:[#allocation47_spill]] %s14010_s4 }
   0x6   :  { %14064 = sst [smem:[#allocation48_spill]] %s14011_s5 }
   0x7   :  { %14065 = sst [smem:[#allocation49_spill]] %s14012_s6 }
   0x8   :  { %14066 = sst [smem:[#allocation50_spill]] %s14013_s7 }
   0x9   :  { %14067 = sst [smem:[#allocation51_spill]] %s14014_s8 }
   0xa   :  { %14068 = sst [smem:[#allocation52_spill]] %s14020_s14 }
   0xb   :  { %14069 = sst [smem:[#allocation53_spill]] %s14022_s16 }
   0xc   :  { %14070 = sst [smem:[#allocation54_spill]] %s14023_s17 }
   0xd   :  { %14071 = sst [smem:[#allocation55_spill]] %s14024_s18 }
   0xe   :  { %14072 = sst [smem:[#allocation56_spill]] %s14026_s20 }
   0xf   :  { %14073 = sst [smem:[#allocation57_spill]] %s14028_s22 }
  0x10   :  { %14074 = sst [smem:[#allocation58_spill]] %s14029_s23 }
  0x11   :  { %28 = vsyncpa [#allocation3], 0 }
  0x12   :  { %29 = vsyncpa [#allocation6], 0 }
  0x13   :  { %30 = vsyncpa [#allocation9], 0 }
  0x14   :  { %31 = vsyncpa [#allocation12], 0 }
  0x15   :  { %32 = vsyncpa [#allocation15], 0 }
  0x16   :  { %33 = vsyncpa [#allocation18], 0 }
  0x17   :  { %34 = vsyncpa [#allocation21], 0 }
  0x18   :  { %35 = vsyncpa [#allocation24], 0 }
  0x19   :  { %36 = vsyncpa [#allocation4], 0 }
  0x1a   :  { %38 = vsyncpa [#allocation4 + $0x1], 0  ;;  %s12342_s4 = smov 0   ;;  %s12344_s30 = smov 0  }
  0x1b   :  { %s12346_s24 = smov 0   ;;  %s12348_s25 = smov 0  }
  0x1c LB: > { %14075 = sst [smem:[#allocation35_spill]] %s12180_s4  ;;  %s12363_s5 = sadd.s32 4294967295, %s12192_s25   ;;  %s12192_s25 = sphi %s12348_s25, %s14132_s25   ;;  %s12188_s24 = sphi %s12346_s24, %s14135_s24   ;;  %s12184_s30 = sphi %s12344_s30, %s14134_s30   ;;  %s12180_s4 = sphi %s12342_s4, %s14133_s4  }
  0x1d   : > { %14076 = sst [smem:[#allocation36_spill]] %s12184_s30  ;;  %s9142_s1 = sadd.s32 4294967294, %s12192_s25  }
  0x1e   : > { %14077 = sst [smem:[#allocation37_spill]] %s12188_s24  ;;  %s12367_s26 = sadd.s32 1, %s12192_s25  }
  0x1f   : > { %14078 = sst [smem:[#allocation38_spill]] %s12192_s25  ;;  %s539_s2 = sadd.s32 1, %s12188_s24 }
  0x20   : > { %14079 = sst [smem:[#allocation39_spill]] %s12367_s26  ;;  %s536_s6 = ssub.s32 %s12192_s25, %s12367_s26 }
  0x21   : > { %p549_p0 = scmp.ne.s32.totalorder %s12188_s24, %s12184_s30  ;;  %p537_p1 = scmp.eq.s32.totalorder %s536_s6, 0 }
  0x22   : > { %p550_p2 = scmp.eq.s32.totalorder %s12363_s5, 1  ;;  %p555_p3 = scmp.ne.s32.totalorder %s12184_s30, %s12180_s4 }
  0x23   : > { %p556_p4 = scmp.eq.s32.totalorder %s9142_s1, 1  ;;  %p9143_p7 = scmp.ge.s32.totalorder %s12192_s25, 1 }
  0x24   : > { %s12378_s27 = scalar_select %p537_p1, %s12188_s24, %s539_s2  }
  0x25   : > { %p12380_p5 = por %p550_p2, %p549_p0  ;;  %p12384_p6 = por %p556_p4, %p555_p3 }
  0x26   : > { %14080 = sst [smem:[#allocation40_spill]] %s12378_s27  ;;  %p563_p8 = scmp.lt.s32.totalorder %s12192_s25, 3 }
  0x27   : > { %s14081_s7 = scalar_select %p12380_p5, 1, 0 }
  0x28   : > { %s14083_s28 = scalar_select %p12384_p6, 1, 0 }
  0x29   : > { %14082 = sst [smem:[#allocation41_spill]] %s14081_s7  ;;  %p14046_p9 = scmp.eq.s32.totalorder %s12363_s5, 0 }
  0x2a   : > { %14084 = sst [smem:[#allocation42_spill]] %s14083_s28  ;;  %p12391_p10 = pnand %p9143_p7, %p563_p8 }
  0x2b   : > { %s12194_s3 = smov [#allocation5]   ;;  %s12195_s1 = smov [#allocation8]  }
  0x2c   : > { %s14085_s29 = scalar_select %p12391_p10, 1, 0 }
  0x2d   : > { %s589_s0 = sshll.u32 %s12194_s3, 4  ;;  %p10840_p11 = pneg %p12391_p10  ;;  %s590_s0 = int_to_ptr.vmem [resolvable:$true] %s589_s0 }
  0x2e   : > { %s613_s2 = sshll.u32 %s12195_s1, 4  ;;  %s12196_s27 = smov [#allocation11]   ;;  %s12403_s2 = int_to_ptr.vmem [resolvable:$true] %s613_s2 }
  0x2f   : > { %p12399_p12 = pnand %p14046_p9, %p10840_p11  ;;  %s637_s24 = sshll.u32 %s12196_s27, 4  ;;  %s12405_s24 = int_to_ptr.vmem [resolvable:$true] %s637_s24 }
  0x30   : > { %s14087_s3 = sld [smem:[#allocation45_spill]] }
  0x31   : > { %p12415_p0 = pneg %p12399_p12 }
  0x36   : > { %s11706_s4 = scalar_lea.hbm %s14087_s3, 32 }
  0x37   : > { %p11707_p13 = scmp.ne.s32.totalorder %s14087_s3, %s11706_s4  ;;  %p11713_p3 = scmp.lt.u32.totalorder %s11706_s4, %s14087_s3 }
  0x39   : > { %p11709_p1 = pnand %p12415_p0, %p11707_p13 }
  0x3b   : > { %p11710_p2 = pneg %p11709_p1 }
  0x3d   : > { %p11715_p4 = pnand %p11713_p3, %p11710_p2 }
  0x3f   : > { %11718 = shalt.err (!%p11715_p4)
}
  0x40   : > { %s11719_s26 = scalar_lea.vmem %s590_s0, 32  ;;  %p11727_p9 = scmp.lt.s32.totalorder %s590_s0, %s590_s0 }
  0x41   : > { %p11720_p7 = scmp.ne.s32.totalorder %s590_s0, %s11719_s26  ;;  %p11728_p6 = scmp.lt.s32.totalorder %s11719_s26, %s11719_s26 }
  0x43   : > { %p11722_p8 = pnand %p11720_p7, %p12415_p0  ;;  %p11729_p5 = por %p11728_p6, %p11727_p9 }
  0x45   : > { %p11723_p11 = pneg %p11722_p8 }
  0x47   : > { %p11730_p10 = pnand %p11729_p5, %p11723_p11 }
  0x49   : > { %11733 = shalt.err (!%p11730_p10)
}
  0x4a   : > { %10846 = dma.hbm_to_vmem [thread:$0]  (!%p12399_p12), %s14087_s3, 32, %s590_s0, [#allocation6]  }
  0x4b   : > { %s14089_s28 = sld [smem:[#allocation47_spill]] }
  0x51   : > { %s11734_s27 = scalar_lea.hbm %s14089_s28, 32 }
  0x52   : > { %p11735_p13 = scmp.ne.s32.totalorder %s14089_s28, %s11734_s27  ;;  %p11741_p5 = scmp.lt.u32.totalorder %s11734_s27, %s14089_s28 }
  0x54   : > { %p11737_p1 = pnand %p11735_p13, %p12415_p0 }
  0x56   : > { %p11738_p6 = pneg %p11737_p1 }
  0x58   : > { %p11743_p9 = pnand %p11741_p5, %p11738_p6 }
  0x5a   : > { %11746 = shalt.err (!%p11743_p9)
}
  0x5b   : > { %s11747_s0 = scalar_lea.vmem %s12403_s2, 32  ;;  %p11755_p4 = scmp.lt.s32.totalorder %s12403_s2, %s12403_s2 }
  0x5c   : > { %p11748_p10 = scmp.ne.s32.totalorder %s12403_s2, %s11747_s0  ;;  %p11756_p7 = scmp.lt.s32.totalorder %s11747_s0, %s11747_s0 }
  0x5e   : > { %p11750_p2 = pnand %p11748_p10, %p12415_p0  ;;  %p11757_p8 = por %p11756_p7, %p11755_p4 }
  0x60   : > { %p11751_p3 = pneg %p11750_p2 }
  0x62   : > { %p11758_p11 = pnand %p11757_p8, %p11751_p3 }
  0x64   : > { %11761 = shalt.err (!%p11758_p11)
}
  0x65   : > { %10852 = dma.hbm_to_vmem [thread:$0]  (!%p12399_p12), %s14089_s28, 32, %s12403_s2, [#allocation9]  }
  0x66   : > { %s14090_s25 = sld [smem:[#allocation49_spill]] }
  0x6c   : > { %s14091_s7 = smov %s14090_s25  ;;  %s11762_s4 = scalar_lea.hbm %s14090_s25, 16 }
  0x6d   : > { %p11763_p13 = scmp.ne.s32.totalorder %s14091_s7, %s11762_s4  ;;  %p11769_p5 = scmp.lt.u32.totalorder %s11762_s4, %s14091_s7 }
  0x6f   : > { %p11765_p1 = pnand %p11763_p13, %p12415_p0 }
  0x71   : > { %p11766_p6 = pneg %p11765_p1 }
  0x73   : > { %p11771_p9 = pnand %p11769_p5, %p11766_p6 }
  0x75   : > { %11774 = shalt.err (!%p11771_p9)
}
  0x76   : > { %s11775_s2 = scalar_lea.vmem %s12405_s24, 16  ;;  %s11782_s20 = scalar_lea.vmem %s12405_s24, 32 }
  0x77   : > { %p11776_p10 = scmp.ne.s32.totalorder %s12405_s24, %s11775_s2  ;;  %p11783_p4 = scmp.lt.s32.totalorder %s12405_s24, %s12405_s24 }
  0x78   : > { %p11784_p7 = scmp.lt.s32.totalorder %s11782_s20, %s11775_s2 }
  0x79   : > { %p11778_p2 = pnand %p11776_p10, %p12415_p0 }
  0x7a   : > { %p11785_p8 = por %p11784_p7, %p11783_p4 }
  0x7b   : > { %p11779_p3 = pneg %p11778_p2 }
  0x7d   : > { %p11786_p11 = pnand %p11785_p8, %p11779_p3 }
  0x7f   : > { %11789 = shalt.err (!%p11786_p11)
}
  0x80   : > { %10858 = dma.hbm_to_vmem [thread:$0]  (!%p12399_p12), %s14091_s7, 16, %s12405_s24, [#allocation12]  }
  0x81   : > { %s12197_s30 = smov [#allocation14]   ;;  %s12198_s25 = smov [#allocation17]  }
  0x82   : > { %s660_s23 = sshll.u32 %s12197_s30, 4  ;;  %s699_s4 = sshll.u32 %s12198_s25, 4  ;;  %s661_s23 = int_to_ptr.vmem [resolvable:$true] %s660_s23  ;;  %s700_s4 = int_to_ptr.vmem [resolvable:$true] %s699_s4 }
  0x83   : > { %s14092_s8 = sld [smem:[#allocation51_spill]] }
  0x89   : > { %s11790_s0 = scalar_lea.hbm %s14092_s8, 2048 }
  0x8a   : > { %p11791_p13 = scmp.ne.s32.totalorder %s14092_s8, %s11790_s0  ;;  %p11797_p5 = scmp.lt.u32.totalorder %s11790_s0, %s14092_s8 }
  0x8c   : > { %p11793_p1 = pnand %p11791_p13, %p12415_p0 }
  0x8e   : > { %p11794_p6 = pneg %p11793_p1 }
  0x90   : > { %p11799_p9 = pnand %p11797_p5, %p11794_p6 }
  0x92   : > { %11802 = shalt.err (!%p11799_p9)
}
  0x93   : > { %s11803_s24 = scalar_lea.vmem %s661_s23, 2048  ;;  %p11811_p4 = scmp.lt.s32.totalorder %s661_s23, %s661_s23 }
  0x94   : > { %p11804_p10 = scmp.ne.s32.totalorder %s661_s23, %s11803_s24  ;;  %p11812_p7 = scmp.lt.s32.totalorder %s11803_s24, %s11803_s24 }
  0x96   : > { %p11806_p2 = pnand %p11804_p10, %p12415_p0  ;;  %p11813_p8 = por %p11812_p7, %p11811_p4 }
  0x98   : > { %p11807_p3 = pneg %p11806_p2 }
  0x9a   : > { %p11814_p11 = pnand %p11813_p8, %p11807_p3 }
  0x9c   : > { %11817 = shalt.err (!%p11814_p11)
}
  0x9d   : > { %s14052_s22 = smov 64   ;;  %s14054_s30 = smov 4  }
  0x9e   : > { %10864 = dma.hbm_to_vmem [thread:$0]  (!%p12399_p12), %s14092_s8, 2048, %s661_s23, [#allocation15], %s14052_s22, %s14052_s22, %s14054_s30  }
  0x9f   : > { %s14093_s14 = sld [smem:[#allocation52_spill]] }
  0xa5   : > { %s11818_s0 = scalar_lea.hbm %s14093_s14, 64 }
  0xa6   : > { %p11819_p13 = scmp.ne.s32.totalorder %s14093_s14, %s11818_s0  ;;  %p11825_p5 = scmp.lt.u32.totalorder %s11818_s0, %s14093_s14 }
  0xa8   : > { %p11821_p1 = pnand %p11819_p13, %p12415_p0 }
  0xaa   : > { %p11822_p6 = pneg %p11821_p1 }
  0xac   : > { %p11827_p9 = pnand %p11825_p5, %p11822_p6 }
  0xae   : > { %11830 = shalt.err (!%p11827_p9)
}
  0xaf   : > { %s11831_s28 = scalar_lea.vmem %s700_s4, 64  ;;  %p11839_p4 = scmp.lt.s32.totalorder %s700_s4, %s700_s4 }
  0xb0   : > { %p11832_p10 = scmp.ne.s32.totalorder %s700_s4, %s11831_s28  ;;  %p11840_p7 = scmp.lt.s32.totalorder %s11831_s28, %s11831_s28 }
  0xb2   : > { %p11834_p2 = pnand %p11832_p10, %p12415_p0  ;;  %p11841_p8 = por %p11840_p7, %p11839_p4 }
  0xb4   : > { %p11835_p3 = pneg %p11834_p2 }
  0xb6   : > { %p11842_p11 = pnand %p11841_p8, %p11835_p3 }
  0xb8   : > { %11845 = shalt.err (!%p11842_p11)
}
  0xb9   : > { %10870 = dma.hbm_to_vmem [thread:$0]  (!%p12399_p12), %s14093_s14, 64, %s700_s4, [#allocation18]  }
  0xba   : > { %s12201_s27 = smov [#allocation20]   ;;  %s12202_s0 = smov [#allocation2]  }
  0xbb   : > { %s723_s26 = sshll.u32 %s12201_s27, 4  ;;  %s575_s2 = sshll.u32 %s12202_s0, 4  ;;  %s724_s26 = int_to_ptr.vmem [resolvable:$true] %s723_s26  ;;  %s576_s2 = int_to_ptr.vmem [resolvable:$true] %s575_s2 }
  0xbc   : > { %s14094_s16 = sld [smem:[#allocation53_spill]] }
  0xc2   : > { %s11846_s24 = scalar_lea.hbm %s14094_s16, 48 }
  0xc3   : > { %p11847_p13 = scmp.ne.s32.totalorder %s14094_s16, %s11846_s24  ;;  %p11853_p5 = scmp.lt.u32.totalorder %s11846_s24, %s14094_s16 }
  0xc5   : > { %p11849_p1 = pnand %p11847_p13, %p12415_p0 }
  0xc7   : > { %p11850_p6 = pneg %p11849_p1 }
  0xc9   : > { %p11855_p9 = pnand %p11853_p5, %p11850_p6 }
  0xcb   : > { %11858 = shalt.err (!%p11855_p9)
}
  0xcc   : > { %s11859_s4 = scalar_lea.vmem %s724_s26, 48  ;;  %s11866_s25 = scalar_lea.vmem %s724_s26, 64 }
  0xcd   : > { %p11860_p10 = scmp.ne.s32.totalorder %s724_s26, %s11859_s4  ;;  %p11867_p4 = scmp.lt.s32.totalorder %s724_s26, %s724_s26 }
  0xce   : > { %p11868_p7 = scmp.lt.s32.totalorder %s11866_s25, %s11859_s4 }
  0xcf   : > { %p11862_p2 = pnand %p11860_p10, %p12415_p0 }
  0xd0   : > { %p11869_p8 = por %p11868_p7, %p11867_p4 }
  0xd1   : > { %p11863_p3 = pneg %p11862_p2 }
  0xd3   : > { %p11870_p11 = pnand %p11869_p8, %p11863_p3 }
  0xd5   : > { %11873 = shalt.err (!%p11870_p11)
}
  0xd6   : > { %10876 = dma.hbm_to_vmem [thread:$0]  (!%p12399_p12), %s14094_s16, 48, %s724_s26, [#allocation21]  }
  0xd7   : > { %s14095_s20 = sld [smem:[#allocation44_spill]] }
  0xdd   : > { %s11874_s3 = scalar_lea.hbm %s14095_s20, 768 }
  0xde   : > { %p11875_p13 = scmp.ne.s32.totalorder %s14095_s20, %s11874_s3  ;;  %p11881_p5 = scmp.lt.u32.totalorder %s11874_s3, %s14095_s20 }
  0xe0   : > { %p11877_p1 = pnand %p11875_p13, %p12415_p0 }
  0xe2   : > { %p11878_p6 = pneg %p11877_p1 }
  0xe4   : > { %p11883_p9 = pnand %p11881_p5, %p11878_p6 }
  0xe6   : > { %11886 = shalt.err (!%p11883_p9)
}
  0xe7   : > { %s11887_s25 = scalar_lea.vmem %s576_s2, 768  ;;  %p11895_p4 = scmp.lt.s32.totalorder %s576_s2, %s576_s2 }
  0xe8   : > { %p11888_p10 = scmp.ne.s32.totalorder %s576_s2, %s11887_s25  ;;  %p11896_p7 = scmp.lt.s32.totalorder %s11887_s25, %s11887_s25 }
  0xea   : > { %p11890_p2 = pnand %p11888_p10, %p12415_p0  ;;  %p11897_p8 = por %p11896_p7, %p11895_p4 }
  0xec   : > { %p11891_p3 = pneg %p11890_p2 }
  0xee   : > { %p11898_p11 = pnand %p11897_p8, %p11891_p3 }
  0xf0   : > { %11901 = shalt.err (!%p11898_p11)
}
  0xf1   : > { %s12203_s26 = smov 128   ;;  %s12204_s22 = smov 8  }
  0xf2   : > { %10843 = dma.hbm_to_vmem [thread:$0]  (!%p12399_p12), %s14095_s20, 768, %s576_s2, [#allocation3], %s12203_s26, %s12203_s26, %s12204_s22  }
  0xf3   : > { %s12205_s0 = smov [#allocation7]   ;;  %s12206_s24 = smov [#allocation10]  }
  0xf4   : > { %s599_s3 = sshll.u32 %s12205_s0, 4  ;;  %s623_s28 = sshll.u32 %s12206_s24, 4  ;;  %s600_s3 = int_to_ptr.vmem [resolvable:$true] %s599_s3  ;;  %s624_s28 = int_to_ptr.vmem [resolvable:$true] %s623_s28 }
  0xf5   : > { %s14096_s25 = sld [smem:[#allocation46_spill]] }
  0xfb   : > { %s14097_s7 = smov %s14096_s25  ;;  %s11902_s8 = scalar_lea.hbm %s14096_s25, 7680 }
  0xfc   : > { %p11903_p13 = scmp.ne.s32.totalorder %s14097_s7, %s11902_s8  ;;  %p11909_p5 = scmp.lt.u32.totalorder %s11902_s8, %s14097_s7 }
  0xfe   : > { %p11905_p1 = pnand %p11903_p13, %p12415_p0 }
 0x100   : > { %p11906_p6 = pneg %p11905_p1 }
 0x102   : > { %p11911_p9 = pnand %p11909_p5, %p11906_p6 }
 0x104   : > { %11914 = shalt.err (!%p11911_p9)
}
 0x105   : > { %s11915_s2 = scalar_lea.vmem %s600_s3, 7680  ;;  %p11923_p4 = scmp.lt.s32.totalorder %s600_s3, %s600_s3 }
 0x106   : > { %p11916_p10 = scmp.ne.s32.totalorder %s600_s3, %s11915_s2  ;;  %p11924_p7 = scmp.lt.s32.totalorder %s11915_s2, %s11915_s2 }
 0x108   : > { %p11918_p2 = pnand %p11916_p10, %p12415_p0  ;;  %p11925_p8 = por %p11924_p7, %p11923_p4 }
 0x10a   : > { %p11919_p3 = pneg %p11918_p2 }
 0x10c   : > { %p11926_p11 = pnand %p11925_p8, %p11919_p3 }
 0x10e   : > { %11929 = shalt.err (!%p11926_p11)
}
 0x10f   : > { %10849 = dma.hbm_to_vmem [thread:$0]  (!%p12399_p12), %s14097_s7, 7680, %s600_s3, [#allocation6], %s12203_s26, %s12203_s26, %s12204_s22  }
 0x110   : > { %s14098_s18 = sld [smem:[#allocation48_spill]] }
 0x116   : > { %s11930_s27 = scalar_lea.hbm %s14098_s18, 3072 }
 0x117   : > { %p11931_p13 = scmp.ne.s32.totalorder %s14098_s18, %s11930_s27  ;;  %p11937_p5 = scmp.lt.u32.totalorder %s11930_s27, %s14098_s18 }
 0x119   : > { %p11933_p1 = pnand %p11931_p13, %p12415_p0 }
 0x11b   : > { %p11934_p6 = pneg %p11933_p1 }
 0x11d   : > { %p11939_p9 = pnand %p11937_p5, %p11934_p6 }
 0x11f   : > { %11942 = shalt.err (!%p11939_p9)
}
 0x120   : > { %s11943_s4 = scalar_lea.vmem %s624_s28, 3072  ;;  %p11951_p4 = scmp.lt.s32.totalorder %s624_s28, %s624_s28 }
 0x121   : > { %p11944_p10 = scmp.ne.s32.totalorder %s624_s28, %s11943_s4  ;;  %p11952_p7 = scmp.lt.s32.totalorder %s11943_s4, %s11943_s4 }
 0x123   : > { %p11946_p2 = pnand %p11944_p10, %p12415_p0  ;;  %p11953_p8 = por %p11952_p7, %p11951_p4 }
 0x125   : > { %p11947_p3 = pneg %p11946_p2 }
 0x127   : > { %p11954_p11 = pnand %p11953_p8, %p11947_p3 }
 0x129   : > { %11957 = shalt.err (!%p11954_p11)
}
 0x12a   : > { %s14099_s26 = smov 4   ;;  %s14100_s22 = smov 64  }
 0x12b   : > { %10855 = dma.hbm_to_vmem [thread:$0]  (!%p12399_p12), %s14098_s18, 3072, %s624_s28, [#allocation9], %s14100_s22, %s14100_s22, %s14099_s26  }
 0x12c   : > { %s12207_s2 = smov [#allocation13]   ;;  %s12208_s16 = smov [#allocation16]  }
 0x12d   : > { %s647_s14 = sshll.u32 %s12207_s2, 4  ;;  %s685_s8 = sshll.u32 %s12208_s16, 4  ;;  %s648_s14 = int_to_ptr.vmem [resolvable:$true] %s647_s14  ;;  %s686_s8 = int_to_ptr.vmem [resolvable:$true] %s685_s8 }
 0x12e   : > { %s14101_s30 = sld [smem:[#allocation50_spill]] }
 0x134   : > { %s14102_s0 = smov %s14101_s30  ;;  %s11958_s24 = scalar_lea.hbm %s14101_s30, 2048 }
 0x135   : > { %p11959_p13 = scmp.ne.s32.totalorder %s14102_s0, %s11958_s24  ;;  %p11965_p5 = scmp.lt.u32.totalorder %s11958_s24, %s14102_s0 }
 0x137   : > { %p11961_p1 = pnand %p11959_p13, %p12415_p0 }
 0x139   : > { %p11962_p6 = pneg %p11961_p1 }
 0x13b   : > { %p11967_p9 = pnand %p11965_p5, %p11962_p6 }
 0x13d   : > { %11970 = shalt.err (!%p11967_p9)
}
 0x13e   : > { %s11971_s28 = scalar_lea.vmem %s648_s14, 2048  ;;  %p11979_p4 = scmp.lt.s32.totalorder %s648_s14, %s648_s14 }
 0x13f   : > { %p11972_p10 = scmp.ne.s32.totalorder %s648_s14, %s11971_s28  ;;  %p11980_p7 = scmp.lt.s32.totalorder %s11971_s28, %s11971_s28 }
 0x141   : > { %p11974_p2 = pnand %p11972_p10, %p12415_p0  ;;  %p11981_p8 = por %p11980_p7, %p11979_p4 }
 0x143   : > { %p11975_p3 = pneg %p11974_p2 }
 0x145   : > { %p11982_p11 = pnand %p11981_p8, %p11975_p3 }
 0x147   : > { %11985 = shalt.err (!%p11982_p11)
}
 0x148   : > { %10861 = dma.hbm_to_vmem [thread:$0]  (!%p12399_p12), %s14102_s0, 2048, %s648_s14, [#allocation12], %s14100_s22, %s14100_s22, %s14099_s26  }
 0x149   : > { %s11986_s17 = scalar_lea.hbm %s14019_s13, 32768 }
 0x14a   : > { %p11987_p13 = scmp.ne.s32.totalorder %s14019_s13, %s11986_s17  ;;  %p11993_p5 = scmp.lt.u32.totalorder %s11986_s17, %s14019_s13 }
 0x14c   : > { %p11989_p1 = pnand %p11987_p13, %p12415_p0 }
 0x14e   : > { %p11990_p6 = pneg %p11989_p1 }
 0x150   : > { %p11995_p9 = pnand %p11993_p5, %p11990_p6 }
 0x152   : > { %11998 = shalt.err (!%p11995_p9)
}
 0x153   : > { %s11999_s4 = scalar_lea.vmem %s686_s8, 32768  ;;  %p12007_p4 = scmp.lt.s32.totalorder %s686_s8, %s686_s8 }
 0x154   : > { %p12000_p10 = scmp.ne.s32.totalorder %s686_s8, %s11999_s4  ;;  %p12008_p7 = scmp.lt.s32.totalorder %s11999_s4, %s11999_s4 }
 0x156   : > { %p12002_p2 = pnand %p12000_p10, %p12415_p0  ;;  %p12009_p8 = por %p12008_p7, %p12007_p4 }
 0x158   : > { %p12003_p3 = pneg %p12002_p2 }
 0x15a   : > { %p12010_p11 = pnand %p12009_p8, %p12003_p3 }
 0x15c   : > { %12013 = shalt.err (!%p12010_p11)
}
 0x15d   : > { %s12209_s14 = smov 256   ;;  %s12210_s3 = smov 16  }
 0x15e   : > { %10867 = dma.hbm_to_vmem [thread:$0]  (!%p12399_p12), %s14019_s13, 32768, %s686_s8, [#allocation15], %s12209_s14, %s12209_s14, %s12210_s3  }
 0x15f   : > { %s12211_s25 = smov [#allocation19]   ;;  %s12014_s27 = scalar_lea.hbm %s14021_s15, 12288 }
 0x160   : > { %s709_s2 = sshll.u32 %s12211_s25, 4  ;;  %p12015_p13 = scmp.ne.s32.totalorder %s14021_s15, %s12014_s27  ;;  %s710_s2 = int_to_ptr.vmem [resolvable:$true] %s709_s2 }
 0x161   : > { %p12021_p5 = scmp.lt.u32.totalorder %s12014_s27, %s14021_s15 }
 0x162   : > { %p12017_p1 = pnand %p12015_p13, %p12415_p0 }
 0x164   : > { %p12018_p6 = pneg %p12017_p1 }
 0x166   : > { %p12023_p9 = pnand %p12021_p5, %p12018_p6 }
 0x168   : > { %12026 = shalt.err (!%p12023_p9)
}
 0x169   : > { %s12027_s8 = scalar_lea.vmem %s710_s2, 12288  ;;  %p12035_p4 = scmp.lt.s32.totalorder %s710_s2, %s710_s2 }
 0x16a   : > { %p12028_p10 = scmp.ne.s32.totalorder %s710_s2, %s12027_s8  ;;  %p12036_p7 = scmp.lt.s32.totalorder %s12027_s8, %s12027_s8 }
 0x16c   : > { %p12030_p2 = pnand %p12028_p10, %p12415_p0  ;;  %p12037_p8 = por %p12036_p7, %p12035_p4 }
 0x16e   : > { %p12031_p3 = pneg %p12030_p2 }
 0x170   : > { %p12038_p11 = pnand %p12037_p8, %p12031_p3 }
 0x172   : > { %12041 = shalt.err (!%p12038_p11)
}
 0x173   : > { %s12212_s14 = smov 192   ;;  %s12213_s3 = smov 12  }
 0x174   : > { %10873 = dma.hbm_to_vmem [thread:$0]  (!%p12399_p12), %s14021_s15, 12288, %s710_s2, [#allocation18], %s12212_s14, %s12212_s14, %s12213_s3  }
 0x175   : > { %s12214_s25 = smov [#allocation22]   ;;  %s12215_s17 = smov [#allocation23]  }
 0x176   : > { %s739_s16 = sshll.u32 %s12214_s25, 4  ;;  %s755_s27 = sshll.u32 %s12215_s17, 4  ;;  %s740_s16 = int_to_ptr.vmem [resolvable:$true] %s739_s16  ;;  %s12649_s27 = int_to_ptr.vmem [resolvable:$true] %s755_s27 }
 0x177   : > { %s12042_s23 = scalar_lea.hbm %s14025_s19, 1024 }
 0x178   : > { %p12043_p13 = scmp.ne.s32.totalorder %s14025_s19, %s12042_s23  ;;  %p12049_p5 = scmp.lt.u32.totalorder %s12042_s23, %s14025_s19 }
 0x17a   : > { %p12045_p1 = pnand %p12043_p13, %p12415_p0 }
 0x17c   : > { %p12046_p6 = pneg %p12045_p1 }
 0x17e   : > { %p12051_p9 = pnand %p12049_p5, %p12046_p6 }
 0x180   : > { %12054 = shalt.err (!%p12051_p9)
}
 0x181   : > { %s12055_s14 = scalar_lea.vmem %s740_s16, 1024  ;;  %p12063_p4 = scmp.lt.s32.totalorder %s740_s16, %s740_s16 }
 0x182   : > { %p12056_p10 = scmp.ne.s32.totalorder %s740_s16, %s12055_s14  ;;  %p12064_p7 = scmp.lt.s32.totalorder %s12055_s14, %s12055_s14 }
 0x184   : > { %p12058_p2 = pnand %p12056_p10, %p12415_p0  ;;  %p12065_p8 = por %p12064_p7, %p12063_p4 }
 0x186   : > { %p12059_p3 = pneg %p12058_p2 }
 0x188   : > { %p12066_p11 = pnand %p12065_p8, %p12059_p3 }
 0x18a   : > { %12069 = shalt.err (!%p12066_p11)
}
 0x18b   : > { %10879 = dma.hbm_to_vmem [thread:$0]  (!%p12399_p12), %s14025_s19, 1024, %s740_s16, [#allocation21], %s14100_s22, %s14100_s22, %s14099_s26  }
 0x18c   : > { %s12070_s30 = scalar_lea.hbm %s14027_s21, 1024 }
 0x18d   : > { %p12071_p13 = scmp.ne.s32.totalorder %s14027_s21, %s12070_s30  ;;  %p12077_p5 = scmp.lt.u32.totalorder %s12070_s30, %s14027_s21 }
 0x18f   : > { %p12073_p1 = pnand %p12071_p13, %p12415_p0 }
 0x191   : > { %p12074_p6 = pneg %p12073_p1 }
 0x193   : > { %p12079_p9 = pnand %p12077_p5, %p12074_p6 }
 0x195   : > { %12082 = shalt.err (!%p12079_p9)
}
 0x196   : > { %s12083_s16 = scalar_lea.vmem %s12649_s27, 1024  ;;  %p12091_p4 = scmp.lt.s32.totalorder %s12649_s27, %s12649_s27 }
 0x197   : > { %p12084_p10 = scmp.ne.s32.totalorder %s12649_s27, %s12083_s16  ;;  %p12092_p7 = scmp.lt.s32.totalorder %s12083_s16, %s12083_s16 }
 0x199   : > { %p12086_p2 = pnand %p12084_p10, %p12415_p0  ;;  %p12093_p8 = por %p12092_p7, %p12091_p4 }
 0x19b   : > { %p12087_p3 = pneg %p12086_p2 }
 0x19d   : > { %p12094_p11 = pnand %p12093_p8, %p12087_p3 }
 0x19f   : > { %12097 = shalt.err (!%p12094_p11)
}
 0x1a0   : > { %10882 = dma.hbm_to_vmem [thread:$0]  (!%p12399_p12), %s14027_s21, 1024, %s12649_s27, [#allocation24], %s14100_s22, %s14100_s22, %s14099_s26  }
 0x1a1   : > { %p14103_p13 = scmp.ne.s32.totalorder %s14085_s29, 0 }
 0x1a2   : > { %p14104_p0 = scmp.eq.s32.totalorder (!%p14103_p13), %s12363_s5, 0 }
 0x1a3   : > { %783 = sbr.rel (%p14103_p13) target bundleno = 4314 (0x10da), region = 112 }
 0x1aa   : > { %12143 = dma.done.wait (%p14104_p0), [#allocation3], 768   ;;  %p14105_p1 = pmov %p14104_p0 }
 0x1ab   : > { %p14106_p6 = pmov %p14104_p0 }
 0x1ac   : > { %12145 = vsyncadd (%p14105_p1), [#allocation3], 4294966528 }
 0x1ad   : > { %12147 = dma.done.wait (%p14106_p6), [#allocation6], 7712   ;;  %p14107_p5 = pmov %p14104_p0 }
 0x1ae   : > { %p14108_p9 = pmov %p14104_p0 }
 0x1af   : > { %12149 = vsyncadd (%p14107_p5), [#allocation6], 4294959584 }
 0x1b0   : > { %12151 = dma.done.wait (%p14108_p9), [#allocation9], 3104   ;;  %p14109_p12 = pmov %p14104_p0 }
 0x1b1   : > { %p14110_p10 = pmov %p14104_p0 }
 0x1b2   : > { %12153 = vsyncadd (%p14109_p12), [#allocation9], 4294964192 }
 0x1b3   : > { %12155 = dma.done.wait (%p14110_p10), [#allocation12], 2064   ;;  %p14111_p2 = pmov %p14104_p0 }
 0x1b4   : > { %p14112_p3 = pmov %p14104_p0 }
 0x1b5   : > { %12157 = vsyncadd (%p14111_p2), [#allocation12], 4294965232 }
 0x1b6   : > { %12159 = dma.done.wait (%p14112_p3), [#allocation15], 34816   ;;  %p14113_p4 = pmov %p14104_p0 }
 0x1b7   : > { %p14114_p7 = pmov %p14104_p0 }
 0x1b8   : > { %12161 = vsyncadd (%p14113_p4), [#allocation15], 4294932480 }
 0x1b9   : > { %12163 = dma.done.wait (%p14114_p7), [#allocation18], 12352   ;;  %p14115_p8 = pmov %p14104_p0 }
 0x1ba   : > { %p14116_p11 = pmov %p14104_p0 }
 0x1bb   : > { %12165 = vsyncadd (%p14115_p8), [#allocation18], 4294954944 }
 0x1bc   : > { %12167 = dma.done.wait (%p14116_p11), [#allocation21], 1072   ;;  %p14117_p13 = pmov %p14104_p0 }
 0x1be   : > { %12169 = vsyncadd (%p14117_p13), [#allocation21], 4294966224 }
 0x1bf   : > { %12171 = dma.done.wait (%p14104_p0), [#allocation24], 1024   ;;  %p14118_p1 = pmov %p14104_p0 }
 0x1c0   : > { %s899_s29 = smul.u32 40, %s12363_s5  ;;  %v12216_v0 = vmov 0   ;;  %vm1035_vm0 = vcmask 1045504   ;;  %v10975_v1 = vld [vmem:[#allocation2 + $0x14] ss:$8 sps:$4 sm:$0x3f]  }
 0x1c1   : > { %12173 = vsyncadd (%p14118_p1), [#allocation24], 4294966272  ;;  %1074 = vmatprep.mubr.bf16.mxu0 %v12216_v0  ;;  %s14119_s22 = sld [smem:[#allocation43_spill]]  ;;  %v10977_v2 = vld [vmem:[#allocation2 + $0x10] ss:$8 sps:$4 sm:$0x3f]   ;;  %9178 = vmatprep.subr.msk.bf16.mxu0 %vm1035_vm0, %v10975_v1 }
 0x1c2   : > { %p900_p6 = scmp.lt.s32.totalorder %s899_s29, 79  ;;  %v10978_v5 = vld [vmem:[#allocation2 + $0x4] ss:$8 sps:$4 sm:$0x3f]   ;;  %v1037_v6 = vsel %vm1035_vm0, %v10977_v2, 0  ;;  %vm980_vm1 = vcmask 97280  }
 0x1c3   : > { %v10980_v8 = vld [vmem:[#allocation2] ss:$8 sps:$4 sm:$0x3f]   ;;  %1043 = vmatpush1.bf16.msra.mxu0 %v1037_v6  ;;  %v10981_v18 = vld [vmem:[#allocation2 + $0x24] ss:$8 sps:$4 sm:$0x3f]  }
 0x1c4   : > { %s14137_s29 = smov (!%p900_p6, %s899_s29), 79  ;;  %9199 = vmatprep.subr.msk.bf16.mxu0 %vm1035_vm0, %v10978_v5  ;;  %v1267_v9 = vsel %vm1035_vm0, %v10980_v8, 0  ;;  %v10983_v1 = vld [vmem:[#allocation2 + $0x20] ss:$8 sps:$4 sm:$0x3f]   ;;  %vm2123_vm2 = vcmask 261120  }
 0x1c5   : > { %s9175_s6 = sshll.u32 %s14137_s29, 3  ;;  %v10986_v5 = vld [vmem:[#allocation7 + $0xa0] ss:$8 sps:$4 sm:$0xff]   ;;  %v10987_v6 = vld [vmem:[#allocation7 + $0xb4] ss:$8 sps:$4 sm:$0xff]   ;;  %vm12218_vm3 = vmmov 0  }
 0x1c6   : > { %v10990_v8 = vld [vmem:[#allocation7 + $0xc4] ss:$8 sps:$4 sm:$0xff]   ;;  %vm4668_vm4 = vcmask 523264   ;;  %s14120_s14 = sld [smem:[#allocation54_spill]]  ;;  %s14121_s29 = sld [smem:[#allocation55_spill]] }
 0x1c7   : > { %s12737_s27 = scalar_lea.vmem %s14119_s22, %s9175_s6  ;;  %s14122_s26 = sld [smem:[#allocation56_spill]] }
 0x1c8   : > { %v909_v3 = vld [vmem:[%s12737_s27 + $0x10] sm:$0xff]  ;;  %v910_v4 = vld [vmem:[%s12737_s27 + $0x18] sm:$0xff]  ;;  %v911_v10 = vld [vmem:[%s12737_s27 + $0x20] sm:$0xff]  ;;  %s14123_s3 = sld [smem:[#allocation57_spill]]  ;;  %s14124_s7 = sld [smem:[#allocation36_spill]] }
 0x1c9   : > { %v12743_v7 = vpack.c.bf16 %v910_v4, %v909_v3  ;;  %v912_v11 = vld [vmem:[%s12737_s27 + $0x28] sm:$0xff]  ;;  %v913_v13 = vld [vmem:[%s12737_s27 + $0x30] sm:$0xff]  ;;  %v914_v14 = vld [vmem:[%s12737_s27 + $0x38] sm:$0xff]  ;;  %v1500_v3 = vsel %vm1035_vm0, %v10983_v1, 0  ;;  %s14125_s17 = sld [smem:[#allocation41_spill]]  ;;  %s9928_s24 = sshll.u32 %s12363_s5, 8 }
 0x1ca   : > { %v12752_v12 = vpack.c.bf16 %v912_v11, %v911_v10  ;;  %v12759_v15 = vpack.c.bf16 %v914_v14, %v913_v13  ;;  %v915_v16 = vld [vmem:[%s12737_s27 + $0x40] sm:$0xff]  ;;  %v916_v17 = vld [vmem:[%s12737_s27 + $0x48] sm:$0xff]  ;;  %v917_v20 = vld [vmem:[%s12737_s27 + $0x50] sm:$0xff]  ;;  %s14126_s28 = sld [smem:[#allocation58_spill]]  ;;  %s12219_s5 = smov [#allocation25]  }
 0x1cb   : > { %9179 = vmatmul.mubr.msk.bf16.vlgmr.msra.gmra.mrb[0].mxu0 %vm980_vm1, %v12743_v7  ;;  %v12767_v19 = vpack.c.bf16 %v916_v17, %v915_v16  ;;  %v918_v21 = vld [vmem:[%s12737_s27 + $0x58] sm:$0xff]  ;;  %v919_v23 = vld [vmem:[%s12737_s27 + $0x60] sm:$0xff]  ;;  %v920_v24 = vld [vmem:[%s12737_s27 + $0x68] sm:$0xff]  ;;  %s12102_s1 = sshll.u32 %s12219_s5, 4  ;;  %s12103_s1 = int_to_ptr.vmem [resolvable:$false] %s12102_s1 }
 0x1cc   : > { %1273 = vmatpush1.bf16.msra.mxu0 %v1267_v9  ;;  %1084 = vmatprep.mubr.bf16.mxu0 %v12216_v0  ;;  %v12774_v22 = vpack.c.bf16 %v918_v21, %v917_v20  ;;  %v12781_v25 = vpack.c.bf16 %v920_v24, %v919_v23  ;;  %v921_v26 = vld [vmem:[%s12737_s27 + $0x70] sm:$0xff]  ;;  %v922_v27 = vld [vmem:[%s12737_s27 + $0x78] sm:$0xff]  ;;  %v923_v29 = vld [vmem:[%s12737_s27 + $0x80] sm:$0xff] }
 0x1cd   : > { %9220 = vmatprep.subr.msk.bf16.mxu0 %vm1035_vm0, %v10981_v18  ;;  %v12788_v28 = vpack.c.bf16 %v922_v27, %v921_v26  ;;  %v924_v30 = vld [vmem:[%s12737_s27 + $0x88] sm:$0xff]  ;;  %v925_v32 = vld [vmem:[%s12737_s27 + $0x90] sm:$0xff]  ;;  %v926_v33 = vld [vmem:[%s12737_s27 + $0x98] sm:$0xff] }
 0x1ce   : > { %v12795_v31 = vpack.c.bf16 %v924_v30, %v923_v29  ;;  %v12802_v34 = vpack.c.bf16 %v926_v33, %v925_v32  ;;  %v927_v35 = vld [vmem:[%s12737_s27 + $0xa0] sm:$0xff]  ;;  %v928_v36 = vld [vmem:[%s12737_s27 + $0xa8] sm:$0xff]  ;;  %v929_v38 = vld [vmem:[%s12737_s27 + $0xb0] sm:$0xff]  ;;  %s896_s25 = sand.u32 1, %s14124_s7  }
 0x1cf   : > { %v12809_v37 = vpack.c.bf16 %v928_v36, %v927_v35  ;;  %v930_v39 = vld [vmem:[%s12737_s27 + $0xb8] sm:$0xff]  ;;  %v931_v41 = vld [vmem:[%s12737_s27 + $0xc0] sm:$0xff]  ;;  %v932_v42 = vld [vmem:[%s12737_s27 + $0xc8] sm:$0xff]  ;;  %s9174_s30 = sshll.u32 %s896_s25, 4  ;;  %p14127_p9 = scmp.ne.s32.totalorder %s14125_s17, 0 }
 0x1d0   : > { %v12816_v40 = vpack.c.bf16 %v930_v39, %v929_v38  ;;  %v12823_v43 = vpack.c.bf16 %v932_v42, %v931_v41  ;;  %v933_v44 = vld [vmem:[%s12737_s27 + $0xd0] sm:$0xff]  ;;  %v934_v45 = vld [vmem:[%s12737_s27 + $0xd8] sm:$0xff]  ;;  %v935_v47 = vld [vmem:[%s12737_s27 + $0xe0] sm:$0xff]  ;;  %s898_s23 = scalar_lea.vmem [#allocation25], %s9174_s30  ;;  %s13961_s2 = scalar_lea.hbm %s14126_s28, %s9928_s24 }
 0x1d1   : > { %v12830_v46 = vpack.c.bf16 %v934_v45, %v933_v44  ;;  %v936_v48 = vld [vmem:[%s12737_s27 + $0xe8] sm:$0xff]  ;;  %v937_v50 = vld [vmem:[%s12737_s27 + $0xf0] sm:$0xff]  ;;  %v938_v51 = vld [vmem:[%s12737_s27 + $0xf8] sm:$0xff]  ;;  %s8944_s4 = sshll.u32 %s898_s23, 4  ;;  %s13963_s4 = int_to_ptr.vmem [resolvable:$true] %s8944_s4 }
 0x1d2   : > { %v12837_v49 = vpack.c.bf16 %v936_v48, %v935_v47  ;;  %v12844_v52 = vpack.c.bf16 %v938_v51, %v937_v50  ;;  %v939_v53 = vld [vmem:[%s12737_s27 + $0x100] sm:$0xff]  ;;  %v940_v54 = vld [vmem:[%s12737_s27 + $0x108] sm:$0xff]  ;;  %v941_v56 = vld [vmem:[%s12737_s27 + $0x110] sm:$0xff]  ;;  %s12098_s6 = scalar_lea.vmem %s13963_s4, 256  ;;  %p12105_p2 = scmp.lt.s32.totalorder %s13963_s4, %s12103_s1 }
 0x1d3   : > { %9180 = vmatmul.mubr.msk.bf16.gmra.mrb[4].mxu0 %vm980_vm1, %v12752_v12  ;;  %v12851_v55 = vpack.c.bf16 %v940_v54, %v939_v53  ;;  %v942_v57 = vld [vmem:[%s12737_s27 + $0x118] sm:$0xff]  ;;  %v943_v59 = vld [vmem:[%s12737_s27 + $0x120] sm:$0xff]  ;;  %v944_v60 = vld [vmem:[%s12737_s27 + $0x128] sm:$0xff]  ;;  %p12099_p5 = scmp.ne.s32.totalorder %s13963_s4, %s12098_s6 }
 0x1d4   : > { %1094 = vmatprep.mubr.bf16.mxu0 %v12216_v0  ;;  %v12858_v58 = vpack.c.bf16 %v942_v57, %v941_v56  ;;  %v12865_v61 = vpack.c.bf16 %v944_v60, %v943_v59  ;;  %v907_v62 = vld [vmem:[%s12737_s27] sm:$0xff]  ;;  %v908_v63 = vld [vmem:[%s12737_s27 + $0x8] sm:$0xff]  ;;  %v10992_v9 = vld [vmem:[#allocation7 + $0xc0] ss:$8 sps:$4 sm:$0xff]  }
 0x1d5   : > { %v947_v2 = vpack.c.bf16 %v908_v63, %v907_v62  ;;  %v10984_v4 = vld [vmem:[#allocation7 + $0xa4] ss:$8 sps:$4 sm:$0xff]   ;;  %v10993_v10 = vld [vmem:[#allocation7 + $0xd4] ss:$8 sps:$4 sm:$0xff]   ;;  %v10995_v11 = vld [vmem:[#allocation7 + $0xd0] ss:$8 sps:$4 sm:$0xff]   ;;  %p12100_p12 = pnand %p12099_p5, %p14127_p9 }
 0x1d6   : > { %2172 = vmatprep.subr.bf16.mxu1 %v10984_v4  ;;  %v10998_v13 = vld [vmem:[#allocation7 + $0xe0] ss:$8 sps:$4 sm:$0xff]   ;;  %v10999_v14 = vld [vmem:[#allocation7 + $0xf4] ss:$8 sps:$4 sm:$0xff]   ;;  %v11002_v16 = vld [vmem:[#allocation7 + $0x104] ss:$8 sps:$4 sm:$0xff]  }
 0x1d7   : > { %2173 = vmatpush1.bf16.msra.mxu1 %v10986_v5  ;;  %v11004_v17 = vld [vmem:[#allocation7 + $0x100] ss:$8 sps:$4 sm:$0xff]   ;;  %v11005_v18 = vld [vmem:[#allocation7 + $0x114] ss:$8 sps:$4 sm:$0xff]   ;;  %v11008_v20 = vld [vmem:[#allocation7 + $0x124] ss:$8 sps:$4 sm:$0xff]   ;;  %p12101_p10 = pneg %p12100_p12 }
 0x1d8   : > { %2174 = vmatprep.subr.bf16.mxu1 %v10987_v6  ;;  %v11010_v21 = vld [vmem:[#allocation7 + $0x120] ss:$8 sps:$4 sm:$0xff]   ;;  %v11013_v23 = vld [vmem:[#allocation7 + $0x130] ss:$8 sps:$4 sm:$0xff]   ;;  %v11016_v24 = vld [vmem:[#allocation7 + $0x4] ss:$8 sps:$4 sm:$0xff]  }
 0x1d9   : > { %v946_v26 = vld [vmem:[%s12737_s27 + $0x138] sm:$0xff]  ;;  %v11019_v4 = vld [vmem:[#allocation7 + $0x14] ss:$8 sps:$4 sm:$0xff]  }
 0x1da   : > { %v11014_v1 = vld [vmem:[#allocation7] ss:$8 sps:$4 sm:$0xff]  }
 0x1db   : > { %9181 = vmatmul.mubr.msk.bf16.gmra.mrb[8].mxu0 %vm980_vm1, %v12759_v15 }
 0x1dc   : > { %1104 = vmatprep.mubr.bf16.mxu0 %v12216_v0 }
 0x1e3   : > { %9182 = vmatmul.mubr.msk.bf16.gmra.mrb[12].mxu0 %vm980_vm1, %v12767_v19 }
 0x1e4   : > { %1114 = vmatprep.mubr.bf16.mxu0 %v12216_v0 }
 0x1eb   : > { %9183 = vmatmul.mubr.msk.bf16.gmra.mrb[16].mxu0 %vm980_vm1, %v12774_v22 }
 0x1ec   : > { %1124 = vmatprep.mubr.bf16.mxu0 %v12216_v0 }
 0x1f3   : > { %9184 = vmatmul.mubr.msk.bf16.gmra.mrb[20].mxu0 %vm980_vm1, %v12781_v25 }
 0x1f4   : > { %1134 = vmatprep.mubr.bf16.mxu0 %v12216_v0 }
 0x1fb   : > { %9185 = vmatmul.mubr.msk.bf16.gmra.mrb[24].mxu0 %vm980_vm1, %v12788_v28 }
 0x1fc   : > { %1144 = vmatprep.mubr.bf16.mxu0 %v12216_v0 }
 0x203   : > { %9186 = vmatmul.mubr.msk.bf16.gmra.mrb[28].mxu0 %vm980_vm1, %v12795_v31 }
 0x204   : > { %1154 = vmatprep.mubr.bf16.mxu0 %v12216_v0 }
 0x20b   : > { %9187 = vmatmul.mubr.msk.bf16.gmra.mrb[32].mxu0 %vm980_vm1, %v12802_v34 }
 0x20c   : > { %1164 = vmatprep.mubr.bf16.mxu0 %v12216_v0 }
 0x213   : > { %9188 = vmatmul.mubr.msk.bf16.gmra.mrb[36].mxu0 %vm980_vm1, %v12809_v37 }
 0x214   : > { %1174 = vmatprep.mubr.bf16.mxu0 %v12216_v0 }
 0x21b   : > { %9189 = vmatmul.mubr.msk.bf16.gmra.mrb[40].mxu0 %vm980_vm1, %v12816_v40 }
 0x21c   : > { %1184 = vmatprep.mubr.bf16.mxu0 %v12216_v0 }
 0x223   : > { %9190 = vmatmul.mubr.msk.bf16.gmra.mrb[44].mxu0 %vm980_vm1, %v12823_v43 }
 0x224   : > { %1194 = vmatprep.mubr.bf16.mxu0 %v12216_v0 }
 0x22b   : > { %9191 = vmatmul.mubr.msk.bf16.gmra.mrb[48].mxu0 %vm980_vm1, %v12830_v46 }
 0x22c   : > { %1204 = vmatprep.mubr.bf16.mxu0 %v12216_v0 }
 0x233   : > { %9192 = vmatmul.mubr.msk.bf16.gmra.mrb[52].mxu0 %vm980_vm1, %v12837_v49 }
 0x234   : > { %1214 = vmatprep.mubr.bf16.mxu0 %v12216_v0 }
 0x23b   : > { %9193 = vmatmul.mubr.msk.bf16.gmra.mrb[56].mxu0 %vm980_vm1, %v12844_v52 }
 0x23c   : > { %1224 = vmatprep.mubr.bf16.mxu0 %v12216_v0 }
 0x243   : > { %9194 = vmatmul.mubr.msk.bf16.gmra.mrb[60].mxu0 %vm980_vm1, %v12851_v55 }
 0x244   : > { %1234 = vmatprep.mubr.bf16.mxu0 %v12216_v0 }
 0x24b   : > { %9195 = vmatmul.mubr.msk.bf16.gmra.mrb[64].mxu0 %vm980_vm1, %v12858_v58 }
 0x24c   : > { %1244 = vmatprep.mubr.bf16.mxu0 %v12216_v0 }
 0x253   : > { %9196 = vmatmul.mubr.msk.bf16.gmra.mrb[68].mxu0 %vm980_vm1, %v12865_v61 }
 0x254   : > { %1304 = vmatprep.mubr.bf16.mxu0 %v12216_v0 }
 0x25b   : > { %9200 = vmatmul.mubr.msk.bf16.vlgmr.msra.gmra.mrb[0].mxu0 %vm980_vm1, %v947_v2 }
 0x25c   : > { %1506 = vmatpush1.bf16.msra.mxu0 %v1500_v3  ;;  %1314 = vmatprep.mubr.bf16.mxu0 %v12216_v0 }
 0x263   : > { %9201 = vmatmul.mubr.msk.bf16.gmra.mrb[4].mxu0 %vm980_vm1, %v12743_v7  ;;  %v10989_v7 = vld [vmem:[#allocation7 + $0xb0] ss:$8 sps:$4 sm:$0xff]  }
 0x264   : > { %1324 = vmatprep.mubr.bf16.mxu0 %v12216_v0  ;;  %2175 = vmatpush1.bf16.msra.mxu1 %v10989_v7 }
 0x265   : > { %2176 = vmatprep.subr.bf16.mxu1 %v10990_v8 }
 0x268   : > { %2177 = vmatpush1.bf16.msra.mxu1 %v10992_v9 }
 0x269   : > { %2178 = vmatprep.subr.bf16.mxu1 %v10993_v10  ;;  %v11017_v10 = vld [vmem:[#allocation7 + $0x10] ss:$8 sps:$4 sm:$0xff]  }
 0x26b   : > { %9202 = vmatmul.mubr.msk.bf16.gmra.mrb[8].mxu0 %vm980_vm1, %v12752_v12 }
 0x26c   : > { %1334 = vmatprep.mubr.bf16.mxu0 %v12216_v0  ;;  %2179 = vmatpush1.bf16.msra.mxu1 %v10995_v11 }
 0x273   : > { %9203 = vmatmul.mubr.msk.bf16.gmra.mrb[12].mxu0 %vm980_vm1, %v12759_v15 }
 0x274   : > { %1344 = vmatprep.mubr.bf16.mxu0 %v12216_v0 }
 0x27b   : > { %9204 = vmatmul.mubr.msk.bf16.gmra.mrb[16].mxu0 %vm980_vm1, %v12767_v19 }
 0x27c   : > { %1354 = vmatprep.mubr.bf16.mxu0 %v12216_v0 }
 0x283   : > { %9205 = vmatmul.mubr.msk.bf16.gmra.mrb[20].mxu0 %vm980_vm1, %v12774_v22 }
 0x284   : > { %1364 = vmatprep.mubr.bf16.mxu0 %v12216_v0 }
 0x28b   : > { %9206 = vmatmul.mubr.msk.bf16.gmra.mrb[24].mxu0 %vm980_vm1, %v12781_v25 }
 0x28c   : > { %1374 = vmatprep.mubr.bf16.mxu0 %v12216_v0 }
 0x293   : > { %9207 = vmatmul.mubr.msk.bf16.gmra.mrb[28].mxu0 %vm980_vm1, %v12788_v28 }
 0x294   : > { %1384 = vmatprep.mubr.bf16.mxu0 %v12216_v0 }
 0x29b   : > { %9208 = vmatmul.mubr.msk.bf16.gmra.mrb[32].mxu0 %vm980_vm1, %v12795_v31 }
 0x29c   : > { %1394 = vmatprep.mubr.bf16.mxu0 %v12216_v0 }
 0x2a3   : > { %9209 = vmatmul.mubr.msk.bf16.gmra.mrb[36].mxu0 %vm980_vm1, %v12802_v34 }
 0x2a4   : > { %1404 = vmatprep.mubr.bf16.mxu0 %v12216_v0 }
 0x2ab   : > { %9210 = vmatmul.mubr.msk.bf16.gmra.mrb[40].mxu0 %vm980_vm1, %v12809_v37 }
 0x2ac   : > { %1414 = vmatprep.mubr.bf16.mxu0 %v12216_v0 }
 0x2b3   : > { %9211 = vmatmul.mubr.msk.bf16.gmra.mrb[44].mxu0 %vm980_vm1, %v12816_v40 }
 0x2b4   : > { %1424 = vmatprep.mubr.bf16.mxu0 %v12216_v0 }
 0x2bb   : > { %9212 = vmatmul.mubr.msk.bf16.gmra.mrb[48].mxu0 %vm980_vm1, %v12823_v43 }
 0x2bc   : > { %1434 = vmatprep.mubr.bf16.mxu0 %v12216_v0 }
 0x2c3   : > { %9213 = vmatmul.mubr.msk.bf16.gmra.mrb[52].mxu0 %vm980_vm1, %v12830_v46 }
 0x2c4   : > { %1444 = vmatprep.mubr.bf16.mxu0 %v12216_v0 }
 0x2cb   : > { %9214 = vmatmul.mubr.msk.bf16.gmra.mrb[56].mxu0 %vm980_vm1, %v12837_v49 }
 0x2cc   : > { %1454 = vmatprep.mubr.bf16.mxu0 %v12216_v0 }
 0x2d3   : > { %9215 = vmatmul.mubr.msk.bf16.gmra.mrb[60].mxu0 %vm980_vm1, %v12844_v52 }
 0x2d4   : > { %1464 = vmatprep.mubr.bf16.mxu0 %v12216_v0 }
 0x2db   : > { %9216 = vmatmul.mubr.msk.bf16.gmra.mrb[64].mxu0 %vm980_vm1, %v12851_v55 }
 0x2dc   : > { %1474 = vmatprep.mubr.bf16.mxu0 %v12216_v0 }
 0x2e3   : > { %9217 = vmatmul.mubr.msk.bf16.gmra.mrb[68].mxu0 %vm980_vm1, %v12858_v58 }
 0x2e4   : > { %1537 = vmatprep.mubr.bf16.mxu0 %v12216_v0 }
 0x2eb   : > { %9221 = vmatmul.mubr.msk.bf16.vlgmr.msra.gmra.mrb[0].mxu0 %vm980_vm1, %v12752_v12  ;;  %v10996_v12 = vld [vmem:[#allocation7 + $0xe4] ss:$8 sps:$4 sm:$0xff]  }
 0x2ec   : > { %1547 = vmatprep.mubr.bf16.mxu0 %v12216_v0  ;;  %2180 = vmatprep.subr.bf16.mxu1 %v10996_v12 }
 0x2ed   : > { %2181 = vmatpush1.bf16.msra.mxu1 %v10998_v13  ;;  %v11022_v13 = vld [vmem:[#allocation7 + $0x24] ss:$8 sps:$4 sm:$0xff]  }
 0x2ee   : > { %2182 = vmatprep.subr.bf16.mxu1 %v10999_v14 }
 0x2f3   : > { %9222 = vmatmul.mubr.msk.bf16.gmra.mrb[4].mxu0 %vm980_vm1, %v12759_v15  ;;  %v11001_v15 = vld [vmem:[#allocation7 + $0xf0] ss:$8 sps:$4 sm:$0xff]  }
 0x2f4   : > { %1557 = vmatprep.mubr.bf16.mxu0 %v12216_v0  ;;  %2183 = vmatpush1.bf16.msra.mxu1 %v11001_v15 }
 0x2f5   : > { %2184 = vmatprep.subr.bf16.mxu1 %v11002_v16 }
 0x2f8   : > { %2185 = vmatpush1.bf16.msra.mxu1 %v11004_v17 }
 0x2f9   : > { %2186 = vmatprep.subr.bf16.mxu1 %v11005_v18 }
 0x2fb   : > { %9223 = vmatmul.mubr.msk.bf16.gmra.mrb[8].mxu0 %vm980_vm1, %v12767_v19  ;;  %v11007_v19 = vld [vmem:[#allocation7 + $0x110] ss:$8 sps:$4 sm:$0xff]  }
 0x2fc   : > { %1567 = vmatprep.mubr.bf16.mxu0 %v12216_v0  ;;  %2187 = vmatpush1.bf16.msra.mxu1 %v11007_v19  ;;  %v11020_v19 = vld [vmem:[#allocation7 + $0x20] ss:$8 sps:$4 sm:$0xff]  }
 0x2fd   : > { %2188 = vmatprep.subr.bf16.mxu1 %v11008_v20 }
 0x300   : > { %2189 = vmatpush1.bf16.msra.mxu1 %v11010_v21 }
 0x303   : > { %9224 = vmatmul.mubr.msk.bf16.gmra.mrb[12].mxu0 %vm980_vm1, %v12774_v22  ;;  %v11011_v22 = vld [vmem:[#allocation7 + $0x134] ss:$8 sps:$4 sm:$0xff]  }
 0x304   : > { %1577 = vmatprep.mubr.bf16.mxu0 %v12216_v0  ;;  %2190 = vmatprep.subr.bf16.mxu1 %v11011_v22  ;;  %v11025_v22 = vld [vmem:[#allocation7 + $0x34] ss:$8 sps:$4 sm:$0xff]  }
 0x305   : > { %2191 = vmatpush1.bf16.msra.mxu1 %v11013_v23 }
 0x306   : > { %2468 = vmatprep.subr.bf16.mxu1 %v11016_v24 }
 0x30b   : > { %9225 = vmatmul.mubr.msk.bf16.gmra.mrb[16].mxu0 %vm980_vm1, %v12781_v25  ;;  %v945_v25 = vld [vmem:[%s12737_s27 + $0x130] sm:$0xff] }
 0x30c   : > { %1587 = vmatprep.mubr.bf16.mxu0 %v12216_v0  ;;  %v966_v27 = vpack.c.bf16 %v946_v26, %v945_v25 }
 0x313   : > { %9226 = vmatmul.mubr.msk.bf16.gmra.mrb[20].mxu0 %vm980_vm1, %v12788_v28  ;;  %v1792_v28 = vlaneseq }
 0x314   : > { %1597 = vmatprep.mubr.bf16.mxu0 %v12216_v0 }
 0x315   : > { %v12981_v29 = vshrl.u32 %v1792_v28, 7 }
 0x317   : > { %v12984_v30 = vsub.s32 0, %v12981_v29  ;;  %v12987_v32 = vsub.s32 1, %v12981_v29 }
 0x31b   : > { %9227 = vmatmul.mubr.msk.bf16.gmra.mrb[24].mxu0 %vm980_vm1, %v12795_v31  ;;  %v1790_v31 = vld [vmem:[#allocation5] sm:$0x3] }
 0x31c   : > { %1607 = vmatprep.mubr.bf16.mxu0 %v12216_v0  ;;  %v12990_v33 = vrot.slane %v1790_v31, %v12984_v30 }
 0x323   : > { %9228 = vmatmul.mubr.msk.bf16.gmra.mrb[28].mxu0 %vm980_vm1, %v12802_v34  ;;  %v12993_v34 = vrot.slane %v1790_v31, %v12987_v32  ;;  %v11023_v31 = vld [vmem:[#allocation7 + $0x30] ss:$8 sps:$4 sm:$0xff]  }
 0x324   : > { %1617 = vmatprep.mubr.bf16.mxu0 %v12216_v0 }
 0x32b   : > { %9229 = vmatmul.mubr.msk.bf16.gmra.mrb[32].mxu0 %vm980_vm1, %v12809_v37 }
 0x32c   : > { %1627 = vmatprep.mubr.bf16.mxu0 %v12216_v0 }
 0x333   : > { %9230 = vmatmul.mubr.msk.bf16.gmra.mrb[36].mxu0 %vm980_vm1, %v12816_v40 }
 0x334   : > { %1637 = vmatprep.mubr.bf16.mxu0 %v12216_v0 }
 0x33b   : > { %9231 = vmatmul.mubr.msk.bf16.gmra.mrb[40].mxu0 %vm980_vm1, %v12823_v43 }
 0x33c   : > { %1647 = vmatprep.mubr.bf16.mxu0 %v12216_v0 }
 0x343   : > { %9232 = vmatmul.mubr.msk.bf16.gmra.mrb[44].mxu0 %vm980_vm1, %v12830_v46 }
 0x344   : > { %1657 = vmatprep.mubr.bf16.mxu0 %v12216_v0 }
 0x34b   : > { %9233 = vmatmul.mubr.msk.bf16.gmra.mrb[48].mxu0 %vm980_vm1, %v12837_v49 }
 0x34c   : > { %1667 = vmatprep.mubr.bf16.mxu0 %v12216_v0 }
 0x353   : > { %9234 = vmatmul.mubr.msk.bf16.gmra.mrb[52].mxu0 %vm980_vm1, %v12844_v52 }
 0x354   : > { %1677 = vmatprep.mubr.bf16.mxu0 %v12216_v0 }
 0x35b   : > { %9235 = vmatmul.mubr.msk.bf16.gmra.mrb[56].mxu0 %vm980_vm1, %v12851_v55 }
 0x35c   : > { %1687 = vmatprep.mubr.bf16.mxu0 %v12216_v0 }
 0x363   : > { %9236 = vmatmul.mubr.msk.bf16.gmra.mrb[60].mxu0 %vm980_vm1, %v12858_v58 }
 0x364   : > { %1697 = vmatprep.mubr.bf16.mxu0 %v12216_v0 }
 0x36b   : > { %9237 = vmatmul.mubr.msk.bf16.gmra.mrb[64].mxu0 %vm980_vm1, %v12865_v61 }
 0x36c   : > { %1707 = vmatprep.mubr.bf16.mxu0 %v12216_v0 }
 0x373   : > { %9238 = vmatmul.mubr.msk.bf16.gmra.mrb[68].mxu0 %vm980_vm1, %v966_v27 }
 0x3be   : > { %v1539_v35 = vpop.f32.mrb[0].mxu0 }
 0x3bf   : > { %v1802_v36 = vadd.f32 %v12990_v33, %v1539_v35  ;;  %v1541_v37 = vpop.f32.mrb[1].mxu0 }
 0x3c0   : > { %v1803_v38 = vadd.f32 %v12993_v34, %v1541_v37  ;;  %v1543_v39 = vpop.f32.mrb[2].mxu0  ;;  %v11028_v37 = vld [vmem:[#allocation7 + $0x44] ss:$8 sps:$4 sm:$0xff]  }
 0x3c1   : > { %v1804_v40 = vadd.f32 %v12990_v33, %v1543_v39  ;;  %v1545_v41 = vpop.f32.mrb[3].mxu0  ;;  %v1874_v43 = vmax.f32 %v1802_v36, 0.0 }
 0x3c2   : > { %v1805_v42 = vadd.f32 %v12993_v34, %v1545_v41  ;;  %v1875_v45 = vmax.f32 %v1803_v38, 0.0 }
 0x3c3   : > { %v1876_v44 = vmax.f32 %v1804_v40, 0.0 }
 0x3c4   : > { %v1877_v46 = vmax.f32 %v1805_v42, 0.0 }
 0x3c5   : > { %v12999_v47 = vpack.c.bf16 %v1876_v44, %v1874_v43  ;;  %v11026_v43 = vld [vmem:[#allocation7 + $0x40] ss:$8 sps:$4 sm:$0xff]  }
 0x3c6   : > { %v13001_v48 = vpack.c.bf16 %v1877_v46, %v1875_v45  ;;  %v1549_v49 = vpop.f32.mrb[4].mxu0  ;;  %v11031_v46 = vld [vmem:[#allocation7 + $0x54] ss:$8 sps:$4 sm:$0xff]  }
 0x3c7   : > { %v1806_v50 = vadd.f32 %v12990_v33, %v1549_v49  ;;  %v1551_v51 = vpop.f32.mrb[5].mxu0 }
 0x3c8   : > { %v1807_v52 = vadd.f32 %v12993_v34, %v1551_v51  ;;  %v1553_v53 = vpop.f32.mrb[6].mxu0 }
 0x3c9   : > { %v1808_v54 = vadd.f32 %v12990_v33, %v1553_v53  ;;  %v1555_v55 = vpop.f32.mrb[7].mxu0  ;;  %v1878_v57 = vmax.f32 %v1806_v50, 0.0 }
 0x3ca   : > { %v1809_v56 = vadd.f32 %v12993_v34, %v1555_v55  ;;  %v1879_v59 = vmax.f32 %v1807_v52, 0.0 }
 0x3cb   : > { %v1880_v58 = vmax.f32 %v1808_v54, 0.0  ;;  %v11029_v54 = vld [vmem:[#allocation7 + $0x50] ss:$8 sps:$4 sm:$0xff]  }
 0x3cc   : > { %v1881_v60 = vmax.f32 %v1809_v56, 0.0 }
 0x3cd   : > { %v13007_v61 = vpack.c.bf16 %v1880_v58, %v1878_v57  ;;  %v11034_v57 = vld [vmem:[#allocation7 + $0x64] ss:$8 sps:$4 sm:$0xff]  }
 0x3ce   : > { %v1559_v62 = vpop.f32.mrb[8].mxu0  ;;  %v13009_v63 = vpack.c.bf16 %v1881_v60, %v1879_v59 }
 0x3cf   : > { %v1810_v2 = vadd.f32 %v12990_v33, %v1559_v62  ;;  %v1561_v3 = vpop.f32.mrb[9].mxu0 }
 0x3d0   : > { %v1811_v5 = vadd.f32 %v12993_v34, %v1561_v3  ;;  %v1563_v6 = vpop.f32.mrb[10].mxu0  ;;  %9259 = vmatprep.mubr.msk.bf16.mxu1 %vm2123_vm2, %v13009_v63 }
 0x3d1   : > { %v1812_v7 = vadd.f32 %v12990_v33, %v1563_v6  ;;  %v1565_v8 = vpop.f32.mrb[11].mxu0  ;;  %2205 = vmatmul.mubr.bf16.vlgmr.msra.gmra.mrb[0].mxu1 %v13007_v61  ;;  %v1882_v11 = vmax.f32 %v1810_v2, 0.0  ;;  %v11032_v2 = vld [vmem:[#allocation7 + $0x60] ss:$8 sps:$4 sm:$0xff]  }
 0x3d2   : > { %v1813_v9 = vadd.f32 %v12993_v34, %v1565_v8  ;;  %2469 = vmatpush1.bf16.msra.mxu1 %v11014_v1  ;;  %v1883_v14 = vmax.f32 %v1811_v5, 0.0  ;;  %v11037_v5 = vld [vmem:[#allocation7 + $0x74] ss:$8 sps:$4 sm:$0xff]  }
 0x3d3   : > { %v1884_v12 = vmax.f32 %v1812_v7, 0.0  ;;  %2470 = vmatprep.subr.bf16.mxu1 %v11019_v4 }
 0x3d4   : > { %v1885_v15 = vmax.f32 %v1813_v9, 0.0 }
 0x3d5   : > { %v13018_v16 = vpack.c.bf16 %v1884_v12, %v1882_v11  ;;  %v11035_v11 = vld [vmem:[#allocation7 + $0x70] ss:$8 sps:$4 sm:$0xff]  }
 0x3d6   : > { %v13020_v17 = vpack.c.bf16 %v1885_v15, %v1883_v14  ;;  %v1569_v18 = vpop.f32.mrb[12].mxu0  ;;  %2471 = vmatpush1.bf16.msra.mxu1 %v11017_v10  ;;  %v11040_v14 = vld [vmem:[#allocation7 + $0x84] ss:$8 sps:$4 sm:$0xff]  }
 0x3d7   : > { %v1814_v20 = vadd.f32 %v12990_v33, %v1569_v18  ;;  %v1571_v21 = vpop.f32.mrb[13].mxu0  ;;  %2472 = vmatprep.subr.bf16.mxu1 %v11022_v13 }
 0x3d8   : > { %v1815_v23 = vadd.f32 %v12993_v34, %v1571_v21  ;;  %v1573_v24 = vpop.f32.mrb[14].mxu0  ;;  %9260 = vmatprep.mubr.msk.bf16.mxu1 %vm2123_vm2, %v13020_v17 }
 0x3d9   : > { %v1816_v25 = vadd.f32 %v12990_v33, %v1573_v24  ;;  %v1575_v26 = vpop.f32.mrb[15].mxu0  ;;  %2215 = vmatmul.mubr.bf16.gmra.mrb[4].mxu1 %v13018_v16  ;;  %v1886_v35 = vmax.f32 %v1814_v20, 0.0 }
 0x3da   : > { %v1817_v27 = vadd.f32 %v12993_v34, %v1575_v26  ;;  %2473 = vmatpush1.bf16.msra.mxu1 %v11020_v19  ;;  %v1887_v38 = vmax.f32 %v1815_v23, 0.0 }
 0x3db   : > { %v1888_v36 = vmax.f32 %v1816_v25, 0.0  ;;  %2474 = vmatprep.subr.bf16.mxu1 %v11025_v22  ;;  %v11038_v22 = vld [vmem:[#allocation7 + $0x80] ss:$8 sps:$4 sm:$0xff]   ;;  %v11043_v25 = vld [vmem:[#allocation7 + $0x94] ss:$8 sps:$4 sm:$0xff]  }
 0x3dc   : > { %v1889_v39 = vmax.f32 %v1817_v27, 0.0 }
 0x3dd   : > { %v13029_v40 = vpack.c.bf16 %v1888_v36, %v1886_v35 }
 0x3de   : > { %v13031_v41 = vpack.c.bf16 %v1889_v39, %v1887_v38  ;;  %v1579_v42 = vpop.f32.mrb[16].mxu0  ;;  %2475 = vmatpush1.bf16.msra.mxu1 %v11023_v31 }
 0x3df   : > { %v1818_v44 = vadd.f32 %v12990_v33, %v1579_v42  ;;  %v1581_v45 = vpop.f32.mrb[17].mxu0  ;;  %2476 = vmatprep.subr.bf16.mxu1 %v11028_v37  ;;  %v11041_v37 = vld [vmem:[#allocation7 + $0x90] ss:$8 sps:$4 sm:$0xff]   ;;  %v11046_v42 = vld [vmem:[#allocation7 + $0x144] ss:$8 sps:$4 sm:$0xff]  }
 0x3e0   : > { %v1819_v49 = vadd.f32 %v12993_v34, %v1581_v45  ;;  %v1583_v50 = vpop.f32.mrb[18].mxu0  ;;  %9261 = vmatprep.mubr.msk.bf16.mxu1 %vm2123_vm2, %v13031_v41 }
 0x3e1   : > { %v1820_v51 = vadd.f32 %v12990_v33, %v1583_v50  ;;  %v1585_v52 = vpop.f32.mrb[19].mxu0  ;;  %2225 = vmatmul.mubr.bf16.gmra.mrb[8].mxu1 %v13029_v40  ;;  %v1890_v55 = vmax.f32 %v1818_v44, 0.0 }
 0x3e2   : > { %v1821_v53 = vadd.f32 %v12993_v34, %v1585_v52  ;;  %2477 = vmatpush1.bf16.msra.mxu1 %v11026_v43  ;;  %v1891_v58 = vmax.f32 %v1819_v49, 0.0 }
 0x3e3   : > { %v1892_v56 = vmax.f32 %v1820_v51, 0.0  ;;  %2478 = vmatprep.subr.bf16.mxu1 %v11031_v46 }
 0x3e4   : > { %v1893_v59 = vmax.f32 %v1821_v53, 0.0 }
 0x3e5   : > { %v13040_v60 = vpack.c.bf16 %v1892_v56, %v1890_v55 }
 0x3e6   : > { %v13042_v62 = vpack.c.bf16 %v1893_v59, %v1891_v58  ;;  %v1589_v1 = vpop.f32.mrb[20].mxu0  ;;  %2479 = vmatpush1.bf16.msra.mxu1 %v11029_v54 }
 0x3e7   : > { %v1822_v3 = vadd.f32 %v12990_v33, %v1589_v1  ;;  %v1591_v4 = vpop.f32.mrb[21].mxu0  ;;  %2480 = vmatprep.subr.bf16.mxu1 %v11034_v57 }
 0x3e8   : > { %v1823_v6 = vadd.f32 %v12993_v34, %v1591_v4  ;;  %v1593_v7 = vpop.f32.mrb[22].mxu0  ;;  %9262 = vmatprep.mubr.msk.bf16.mxu1 %vm2123_vm2, %v13042_v62 }
 0x3e9   : > { %v1824_v8 = vadd.f32 %v12990_v33, %v1593_v7  ;;  %v1595_v9 = vpop.f32.mrb[23].mxu0  ;;  %2235 = vmatmul.mubr.bf16.gmra.mrb[12].mxu1 %v13040_v60  ;;  %v1894_v12 = vmax.f32 %v1822_v3, 0.0 }
 0x3ea   : > { %v1825_v10 = vadd.f32 %v12993_v34, %v1595_v9  ;;  %2481 = vmatpush1.bf16.msra.mxu1 %v11032_v2  ;;  %v1895_v15 = vmax.f32 %v1823_v6, 0.0 }
 0x3eb   : > { %v1896_v13 = vmax.f32 %v1824_v8, 0.0  ;;  %2482 = vmatprep.subr.bf16.mxu1 %v11037_v5 }
 0x3ec   : > { %v1897_v18 = vmax.f32 %v1825_v10, 0.0 }
 0x3ed   : > { %v13051_v19 = vpack.c.bf16 %v1896_v13, %v1894_v12 }
 0x3ee   : > { %v13053_v20 = vpack.c.bf16 %v1897_v18, %v1895_v15  ;;  %v1599_v21 = vpop.f32.mrb[24].mxu0  ;;  %2483 = vmatpush1.bf16.msra.mxu1 %v11035_v11 }
 0x3ef   : > { %v1826_v23 = vadd.f32 %v12990_v33, %v1599_v21  ;;  %v1601_v24 = vpop.f32.mrb[25].mxu0  ;;  %2484 = vmatprep.subr.bf16.mxu1 %v11040_v14 }
 0x3f0   : > { %v1827_v26 = vadd.f32 %v12993_v34, %v1601_v24  ;;  %v1603_v27 = vpop.f32.mrb[26].mxu0  ;;  %9263 = vmatprep.mubr.msk.bf16.mxu1 %vm2123_vm2, %v13053_v20 }
 0x3f1   : > { %v1828_v31 = vadd.f32 %v12990_v33, %v1603_v27  ;;  %v1605_v35 = vpop.f32.mrb[27].mxu0  ;;  %2245 = vmatmul.mubr.bf16.gmra.mrb[16].mxu1 %v13051_v19  ;;  %v1898_v38 = vmax.f32 %v1826_v23, 0.0 }
 0x3f2   : > { %v1829_v36 = vadd.f32 %v12993_v34, %v1605_v35  ;;  %2485 = vmatpush1.bf16.msra.mxu1 %v11038_v22  ;;  %v1899_v43 = vmax.f32 %v1827_v26, 0.0 }
 0x3f3   : > { %v1900_v39 = vmax.f32 %v1828_v31, 0.0  ;;  %2486 = vmatprep.subr.bf16.mxu1 %v11043_v25 }
 0x3f4   : > { %v1901_v44 = vmax.f32 %v1829_v36, 0.0 }
 0x3f5   : > { %v13062_v45 = vpack.c.bf16 %v1900_v39, %v1898_v38 }
 0x3f6   : > { %v13064_v46 = vpack.c.bf16 %v1901_v44, %v1899_v43  ;;  %v1609_v49 = vpop.f32.mrb[28].mxu0  ;;  %2487 = vmatpush1.bf16.msra.mxu1 %v11041_v37 }
 0x3f7   : > { %v1830_v50 = vadd.f32 %v12990_v33, %v1609_v49  ;;  %v1611_v51 = vpop.f32.mrb[29].mxu0  ;;  %2785 = vmatprep.subr.bf16.mxu1 %v11046_v42 }
 0x3f8   : > { %v1831_v52 = vadd.f32 %v12993_v34, %v1611_v51  ;;  %v1613_v53 = vpop.f32.mrb[30].mxu0  ;;  %9264 = vmatprep.mubr.msk.bf16.mxu1 %vm2123_vm2, %v13064_v46 }
 0x3f9   : > { %v1832_v54 = vadd.f32 %v12990_v33, %v1613_v53  ;;  %v1615_v55 = vpop.f32.mrb[31].mxu0  ;;  %2255 = vmatmul.mubr.bf16.gmra.mrb[20].mxu1 %v13062_v45  ;;  %v1902_v57 = vmax.f32 %v1830_v50, 0.0 }
 0x3fa   : > { %v1833_v56 = vadd.f32 %v12993_v34, %v1615_v55  ;;  %v1903_v59 = vmax.f32 %v1831_v52, 0.0 }
 0x3fb   : > { %v1904_v58 = vmax.f32 %v1832_v54, 0.0 }
 0x3fc   : > { %v1905_v1 = vmax.f32 %v1833_v56, 0.0 }
 0x3fd   : > { %v13073_v2 = vpack.c.bf16 %v1904_v58, %v1902_v57 }
 0x3fe   : > { %v13075_v3 = vpack.c.bf16 %v1905_v1, %v1903_v59  ;;  %v1619_v4 = vpop.f32.mrb[32].mxu0 }
 0x3ff   : > { %v1834_v5 = vadd.f32 %v12990_v33, %v1619_v4  ;;  %v1621_v6 = vpop.f32.mrb[33].mxu0 }
 0x400   : > { %v1835_v7 = vadd.f32 %v12993_v34, %v1621_v6  ;;  %v1623_v8 = vpop.f32.mrb[34].mxu0  ;;  %9265 = vmatprep.mubr.msk.bf16.mxu1 %vm2123_vm2, %v13075_v3 }
 0x401   : > { %v1836_v9 = vadd.f32 %v12990_v33, %v1623_v8  ;;  %v1625_v10 = vpop.f32.mrb[35].mxu0  ;;  %2265 = vmatmul.mubr.bf16.gmra.mrb[24].mxu1 %v13073_v2  ;;  %v1906_v12 = vmax.f32 %v1834_v5, 0.0 }
 0x402   : > { %v1837_v11 = vadd.f32 %v12993_v34, %v1625_v10  ;;  %v1907_v14 = vmax.f32 %v1835_v7, 0.0 }
 0x403   : > { %v1908_v13 = vmax.f32 %v1836_v9, 0.0 }
 0x404   : > { %v1909_v15 = vmax.f32 %v1837_v11, 0.0 }
 0x405   : > { %v13084_v18 = vpack.c.bf16 %v1908_v13, %v1906_v12 }
 0x406   : > { %v13086_v21 = vpack.c.bf16 %v1909_v15, %v1907_v14  ;;  %v1629_v22 = vpop.f32.mrb[36].mxu0 }
 0x407   : > { %v1838_v23 = vadd.f32 %v12990_v33, %v1629_v22  ;;  %v1631_v24 = vpop.f32.mrb[37].mxu0 }
 0x408   : > { %v1839_v25 = vadd.f32 %v12993_v34, %v1631_v24  ;;  %v1633_v26 = vpop.f32.mrb[38].mxu0  ;;  %9266 = vmatprep.mubr.msk.bf16.mxu1 %vm2123_vm2, %v13086_v21 }
 0x409   : > { %v1840_v27 = vadd.f32 %v12990_v33, %v1633_v26  ;;  %v1635_v31 = vpop.f32.mrb[39].mxu0  ;;  %2275 = vmatmul.mubr.bf16.gmra.mrb[28].mxu1 %v13084_v18  ;;  %v1910_v36 = vmax.f32 %v1838_v23, 0.0 }
 0x40a   : > { %v1841_v35 = vadd.f32 %v12993_v34, %v1635_v31  ;;  %v1911_v38 = vmax.f32 %v1839_v25, 0.0 }
 0x40b   : > { %v1912_v37 = vmax.f32 %v1840_v27, 0.0 }
 0x40c   : > { %v1913_v39 = vmax.f32 %v1841_v35, 0.0 }
 0x40d   : > { %v13095_v42 = vpack.c.bf16 %v1912_v37, %v1910_v36 }
 0x40e   : > { %v13097_v43 = vpack.c.bf16 %v1913_v39, %v1911_v38  ;;  %v1639_v44 = vpop.f32.mrb[40].mxu0 }
 0x40f   : > { %v1842_v49 = vadd.f32 %v12990_v33, %v1639_v44  ;;  %v1641_v50 = vpop.f32.mrb[41].mxu0 }
 0x410   : > { %v1843_v51 = vadd.f32 %v12993_v34, %v1641_v50  ;;  %v1643_v52 = vpop.f32.mrb[42].mxu0  ;;  %9267 = vmatprep.mubr.msk.bf16.mxu1 %vm2123_vm2, %v13097_v43 }
 0x411   : > { %v1844_v53 = vadd.f32 %v12990_v33, %v1643_v52  ;;  %v1645_v54 = vpop.f32.mrb[43].mxu0  ;;  %2285 = vmatmul.mubr.bf16.gmra.mrb[32].mxu1 %v13095_v42  ;;  %v1914_v56 = vmax.f32 %v1842_v49, 0.0 }
 0x412   : > { %v1845_v55 = vadd.f32 %v12993_v34, %v1645_v54  ;;  %v1915_v58 = vmax.f32 %v1843_v51, 0.0 }
 0x413   : > { %v1916_v57 = vmax.f32 %v1844_v53, 0.0 }
 0x414   : > { %v1917_v59 = vmax.f32 %v1845_v55, 0.0 }
 0x415   : > { %v13106_v1 = vpack.c.bf16 %v1916_v57, %v1914_v56 }
 0x416   : > { %v13108_v4 = vpack.c.bf16 %v1917_v59, %v1915_v58  ;;  %v1649_v5 = vpop.f32.mrb[44].mxu0 }
 0x417   : > { %v1846_v6 = vadd.f32 %v12990_v33, %v1649_v5  ;;  %v1651_v7 = vpop.f32.mrb[45].mxu0 }
 0x418   : > { %v1847_v8 = vadd.f32 %v12993_v34, %v1651_v7  ;;  %v1653_v9 = vpop.f32.mrb[46].mxu0  ;;  %9268 = vmatprep.mubr.msk.bf16.mxu1 %vm2123_vm2, %v13108_v4 }
 0x419   : > { %v1848_v10 = vadd.f32 %v12990_v33, %v1653_v9  ;;  %v1655_v11 = vpop.f32.mrb[47].mxu0  ;;  %2295 = vmatmul.mubr.bf16.gmra.mrb[36].mxu1 %v13106_v1  ;;  %v1918_v13 = vmax.f32 %v1846_v6, 0.0 }
 0x41a   : > { %v1849_v12 = vadd.f32 %v12993_v34, %v1655_v11  ;;  %v1919_v15 = vmax.f32 %v1847_v8, 0.0 }
 0x41b   : > { %v1920_v14 = vmax.f32 %v1848_v10, 0.0 }
 0x41c   : > { %v1921_v22 = vmax.f32 %v1849_v12, 0.0 }
 0x41d   : > { %v13117_v23 = vpack.c.bf16 %v1920_v14, %v1918_v13 }
 0x41e   : > { %v13119_v24 = vpack.c.bf16 %v1921_v22, %v1919_v15  ;;  %v1659_v25 = vpop.f32.mrb[48].mxu0 }
 0x41f   : > { %v1850_v26 = vadd.f32 %v12990_v33, %v1659_v25  ;;  %v1661_v27 = vpop.f32.mrb[49].mxu0 }
 0x420   : > { %v1851_v31 = vadd.f32 %v12993_v34, %v1661_v27  ;;  %v1663_v35 = vpop.f32.mrb[50].mxu0  ;;  %9269 = vmatprep.mubr.msk.bf16.mxu1 %vm2123_vm2, %v13119_v24 }
 0x421   : > { %v1852_v36 = vadd.f32 %v12990_v33, %v1663_v35  ;;  %v1665_v37 = vpop.f32.mrb[51].mxu0  ;;  %2305 = vmatmul.mubr.bf16.gmra.mrb[40].mxu1 %v13117_v23  ;;  %v1922_v39 = vmax.f32 %v1850_v26, 0.0 }
 0x422   : > { %v1853_v38 = vadd.f32 %v12993_v34, %v1665_v37  ;;  %v1923_v49 = vmax.f32 %v1851_v31, 0.0 }
 0x423   : > { %v1924_v44 = vmax.f32 %v1852_v36, 0.0 }
 0x424   : > { %v1925_v50 = vmax.f32 %v1853_v38, 0.0 }
 0x425   : > { %v13128_v51 = vpack.c.bf16 %v1924_v44, %v1922_v39 }
 0x426   : > { %v13130_v52 = vpack.c.bf16 %v1925_v50, %v1923_v49  ;;  %v1669_v53 = vpop.f32.mrb[52].mxu0 }
 0x427   : > { %v1854_v54 = vadd.f32 %v12990_v33, %v1669_v53  ;;  %v1671_v55 = vpop.f32.mrb[53].mxu0 }
 0x428   : > { %v1855_v56 = vadd.f32 %v12993_v34, %v1671_v55  ;;  %v1673_v57 = vpop.f32.mrb[54].mxu0  ;;  %9270 = vmatprep.mubr.msk.bf16.mxu1 %vm2123_vm2, %v13130_v52 }
 0x429   : > { %v1856_v58 = vadd.f32 %v12990_v33, %v1673_v57  ;;  %v1675_v59 = vpop.f32.mrb[55].mxu0  ;;  %2315 = vmatmul.mubr.bf16.gmra.mrb[44].mxu1 %v13128_v51  ;;  %v1926_v6 = vmax.f32 %v1854_v54, 0.0 }
 0x42a   : > { %v1857_v5 = vadd.f32 %v12993_v34, %v1675_v59  ;;  %v1927_v8 = vmax.f32 %v1855_v56, 0.0 }
 0x42b   : > { %v1928_v7 = vmax.f32 %v1856_v58, 0.0 }
 0x42c   : > { %v1929_v9 = vmax.f32 %v1857_v5, 0.0 }
 0x42d   : > { %v13139_v10 = vpack.c.bf16 %v1928_v7, %v1926_v6 }
 0x42e   : > { %v13141_v11 = vpack.c.bf16 %v1929_v9, %v1927_v8  ;;  %v1679_v12 = vpop.f32.mrb[56].mxu0 }
 0x42f   : > { %v1858_v13 = vadd.f32 %v12990_v33, %v1679_v12  ;;  %v1681_v14 = vpop.f32.mrb[57].mxu0 }
 0x430   : > { %v1859_v15 = vadd.f32 %v12993_v34, %v1681_v14  ;;  %v1683_v22 = vpop.f32.mrb[58].mxu0  ;;  %9271 = vmatprep.mubr.msk.bf16.mxu1 %vm2123_vm2, %v13141_v11 }
 0x431   : > { %v1860_v25 = vadd.f32 %v12990_v33, %v1683_v22  ;;  %v1685_v26 = vpop.f32.mrb[59].mxu0  ;;  %2325 = vmatmul.mubr.bf16.gmra.mrb[48].mxu1 %v13139_v10  ;;  %v1930_v31 = vmax.f32 %v1858_v13, 0.0 }
 0x432   : > { %v1861_v27 = vadd.f32 %v12993_v34, %v1685_v26  ;;  %v1931_v36 = vmax.f32 %v1859_v15, 0.0 }
 0x433   : > { %v1932_v35 = vmax.f32 %v1860_v25, 0.0 }
 0x434   : > { %v1933_v37 = vmax.f32 %v1861_v27, 0.0 }
 0x435   : > { %v13150_v38 = vpack.c.bf16 %v1932_v35, %v1930_v31 }
 0x436   : > { %v13152_v39 = vpack.c.bf16 %v1933_v37, %v1931_v36  ;;  %v1689_v44 = vpop.f32.mrb[60].mxu0 }
 0x437   : > { %v1862_v49 = vadd.f32 %v12990_v33, %v1689_v44  ;;  %v1691_v50 = vpop.f32.mrb[61].mxu0 }
 0x438   : > { %v1863_v53 = vadd.f32 %v12993_v34, %v1691_v50  ;;  %v1693_v54 = vpop.f32.mrb[62].mxu0  ;;  %9272 = vmatprep.mubr.msk.bf16.mxu1 %vm2123_vm2, %v13152_v39 }
 0x439   : > { %v1864_v55 = vadd.f32 %v12990_v33, %v1693_v54  ;;  %v1695_v56 = vpop.f32.mrb[63].mxu0  ;;  %2335 = vmatmul.mubr.bf16.gmra.mrb[52].mxu1 %v13150_v38  ;;  %v1934_v58 = vmax.f32 %v1862_v49, 0.0 }
 0x43a   : > { %v1865_v57 = vadd.f32 %v12993_v34, %v1695_v56  ;;  %v1935_v5 = vmax.f32 %v1863_v53, 0.0 }
 0x43b   : > { %v1936_v59 = vmax.f32 %v1864_v55, 0.0 }
 0x43c   : > { %v1937_v6 = vmax.f32 %v1865_v57, 0.0 }
 0x43d   : > { %v13161_v7 = vpack.c.bf16 %v1936_v59, %v1934_v58 }
 0x43e   : > { %v13163_v8 = vpack.c.bf16 %v1937_v6, %v1935_v5  ;;  %v1699_v9 = vpop.f32.mrb[64].mxu0 }
 0x43f   : > { %v1866_v12 = vadd.f32 %v12990_v33, %v1699_v9  ;;  %v1701_v13 = vpop.f32.mrb[65].mxu0 }
 0x440   : > { %v1867_v14 = vadd.f32 %v12993_v34, %v1701_v13  ;;  %v1703_v15 = vpop.f32.mrb[66].mxu0  ;;  %9273 = vmatprep.mubr.msk.bf16.mxu1 %vm2123_vm2, %v13163_v8 }
 0x441   : > { %v1868_v22 = vadd.f32 %v12990_v33, %v1703_v15  ;;  %v1705_v25 = vpop.f32.mrb[67].mxu0  ;;  %2345 = vmatmul.mubr.bf16.gmra.mrb[56].mxu1 %v13161_v7  ;;  %v1938_v27 = vmax.f32 %v1866_v12, 0.0  ;;  %v11049_v15 = vld [vmem:[#allocation7 + $0x154] ss:$8 sps:$4 sm:$0xff]  }
 0x442   : > { %v1869_v26 = vadd.f32 %v12993_v34, %v1705_v25  ;;  %v1939_v35 = vmax.f32 %v1867_v14, 0.0  ;;  %v11044_v14 = vld [vmem:[#allocation7 + $0x140] ss:$8 sps:$4 sm:$0xff]   ;;  %v11053_v25 = vld [vmem:[#allocation7 + $0x170] ss:$8 sps:$4 sm:$0xff]  }
 0x443   : > { %v1940_v31 = vmax.f32 %v1868_v22, 0.0  ;;  %v11055_v22 = vld [vmem:[#allocation7 + $0x174] ss:$8 sps:$4 sm:$0xff]  }
 0x444   : > { %v1941_v36 = vmax.f32 %v1869_v26, 0.0  ;;  %v11056_v26 = vld [vmem:[#allocation7 + $0x180] ss:$8 sps:$4 sm:$0xff]  }
 0x445   : > { %v13172_v37 = vpack.c.bf16 %v1940_v31, %v1938_v27  ;;  %v11059_v27 = vld [vmem:[#allocation7 + $0x190] ss:$8 sps:$4 sm:$0xff]   ;;  %v11062_v31 = vld [vmem:[#allocation7 + $0x1a0] ss:$8 sps:$4 sm:$0xff]  }
 0x446   : > { %v13174_v44 = vpack.c.bf16 %v1941_v36, %v1939_v35  ;;  %v1709_v49 = vpop.f32.mrb[68].mxu0  ;;  %v11067_v35 = vld [vmem:[#allocation7 + $0x1b4] ss:$8 sps:$4 sm:$0xff]   ;;  %v11065_v36 = vld [vmem:[#allocation7 + $0x1b0] ss:$8 sps:$4 sm:$0xff]  }
 0x447   : > { %v1870_v50 = vadd.f32 %v12990_v33, %v1709_v49  ;;  %v1711_v53 = vpop.f32.mrb[69].mxu0  ;;  %v11070_v49 = vld [vmem:[#allocation7 + $0x1c4] ss:$8 sps:$4 sm:$0xff]  }
 0x448   : > { %v1871_v54 = vadd.f32 %v12993_v34, %v1711_v53  ;;  %v1713_v55 = vpop.f32.mrb[70].mxu0  ;;  %9274 = vmatprep.mubr.msk.bf16.mxu1 %vm2123_vm2, %v13174_v44  ;;  %v11073_v53 = vld [vmem:[#allocation7 + $0x1d4] ss:$8 sps:$4 sm:$0xff]  }
 0x449   : > { %v1872_v56 = vadd.f32 %v12990_v33, %v1713_v55  ;;  %v1715_v57 = vpop.f32.mrb[71].mxu0  ;;  %2355 = vmatmul.mubr.bf16.gmra.mrb[60].mxu1 %v13172_v37  ;;  %v1942_v59 = vmax.f32 %v1870_v50, 0.0  ;;  %v11047_v33 = vld [vmem:[#allocation7 + $0x150] ss:$8 sps:$4 sm:$0xff]   ;;  %v11068_v50 = vld [vmem:[#allocation7 + $0x1c0] ss:$8 sps:$4 sm:$0xff]  }
 0x44a   : > { %v1873_v58 = vadd.f32 %v12993_v34, %v1715_v57  ;;  %9295 = vmatprep.mubr.msk.bf16.mxu1 %vm2123_vm2, %v13001_v48  ;;  %v1943_v6 = vmax.f32 %v1871_v54, 0.0  ;;  %v11052_v34 = vld [vmem:[#allocation7 + $0x164] ss:$8 sps:$4 sm:$0xff]   ;;  %v11050_v48 = vld [vmem:[#allocation7 + $0x160] ss:$8 sps:$4 sm:$0xff]  }
 0x44b   : > { %v1944_v5 = vmax.f32 %v1872_v56, 0.0  ;;  %v11071_v54 = vld [vmem:[#allocation7 + $0x1d0] ss:$8 sps:$4 sm:$0xff]   ;;  %v11074_v55 = vld [vmem:[#allocation14 + $0x40] sm:$0xff]  }
 0x44c   : > { %v1945_v9 = vmax.f32 %v1873_v58, 0.0  ;;  %v11075_v56 = vld [vmem:[#allocation14] sm:$0xff]   ;;  %v11078_v58 = vld [vmem:[#allocation14 + $0x48] sm:$0xff]   ;;  %9993 = vmatprep.subr.bf16.mxu0 %v11074_v55 }
 0x44d   : > { %v13185_v12 = vpack.c.bf16 %v1944_v5, %v1942_v59  ;;  %v11076_v57 = vld [vmem:[#allocation13 + $0x40] sm:$0xff]   ;;  %9994 = vmatpush3.bf16.msra.mxu0 %v11075_v56  ;;  %v11079_v59 = vld [vmem:[#allocation14 + $0x8] sm:$0xff]   ;;  %v11082_v5 = vld [vmem:[#allocation14 + $0x50] sm:$0xff]  }
 0x44e   : > { %v13187_v13 = vpack.c.bf16 %v1945_v9, %v1943_v6  ;;  %9995 = vmatprep.subr.bf16.mxu0 %v11078_v58  ;;  %v11077_v6 = vld [vmem:[#allocation13] sm:$0xff]   ;;  %v11080_v9 = vld [vmem:[#allocation13 + $0x48] sm:$0xff]  }
 0x451   : > { %2501 = vmatmul.mubr.bf16.vlgmr.msra.gmra.mrb[0].mxu1 %v12999_v47  ;;  %v11058_v47 = vld [vmem:[#allocation7 + $0x184] ss:$8 sps:$4 sm:$0xff]   ;;  %9996 = vmatpush3.bf16.msra.mxu0 %v11079_v59 }
 0x452   : > { %9296 = vmatprep.mubr.msk.bf16.mxu1 %vm2123_vm2, %v13009_v63  ;;  %2786 = vmatpush1.bf16.msra.mxu1 %v11044_v14  ;;  %v11061_v63 = vld [vmem:[#allocation7 + $0x194] ss:$8 sps:$4 sm:$0xff]  }
 0x453   : > { %2787 = vmatprep.subr.bf16.mxu1 %v11049_v15  ;;  %v11083_v14 = vld [vmem:[#allocation14 + $0x10] sm:$0xff]   ;;  %9997 = vmatprep.subr.bf16.mxu0 %v11082_v5  ;;  %v11086_v15 = vld [vmem:[#allocation14 + $0x58] sm:$0xff]  }
 0x455   : > { %9998 = vmatpush3.bf16.msra.mxu0 %v11083_v14 }
 0x456   : > { %2788 = vmatpush1.bf16.msra.mxu1 %v11047_v33  ;;  %v11084_v33 = vld [vmem:[#allocation13 + $0x50] sm:$0xff]   ;;  %9999 = vmatprep.subr.bf16.mxu0 %v11086_v15 }
 0x457   : > { %2789 = vmatprep.subr.bf16.mxu1 %v11052_v34  ;;  %v11087_v34 = vld [vmem:[#allocation14 + $0x18] sm:$0xff]  }
 0x459   : > { %2511 = vmatmul.mubr.bf16.gmra.mrb[4].mxu1 %v13007_v61  ;;  %v11064_v61 = vld [vmem:[#allocation7 + $0x1a4] ss:$8 sps:$4 sm:$0xff]   ;;  %10000 = vmatpush3.bf16.msra.mxu0 %v11087_v34 }
 0x45a   : > { %9297 = vmatprep.mubr.msk.bf16.mxu1 %vm2123_vm2, %v13020_v17  ;;  %2790 = vmatpush1.bf16.msra.mxu1 %v11050_v48  ;;  %v11090_v48 = vld [vmem:[#allocation14 + $0x60] sm:$0xff]  }
 0x45b   : > { %2791 = vmatprep.subr.bf16.mxu1 %v11055_v22  ;;  %v11085_v22 = vld [vmem:[#allocation13 + $0x10] sm:$0xff]   ;;  %10001 = vmatprep.subr.bf16.mxu0 %v11090_v48 }
 0x45e   : > { %2792 = vmatpush1.bf16.msra.mxu1 %v11053_v25  ;;  %v11088_v25 = vld [vmem:[#allocation13 + $0x58] sm:$0xff]  }
 0x45f   : > { %2793 = vmatprep.subr.bf16.mxu1 %v11058_v47  ;;  %v11091_v47 = vld [vmem:[#allocation14 + $0x20] sm:$0xff]  }
 0x460   : > { %10002 = vmatpush3.bf16.msra.mxu0 %v11091_v47 }
 0x461   : > { %2521 = vmatmul.mubr.bf16.gmra.mrb[8].mxu1 %v13018_v16 }
 0x462   : > { %9298 = vmatprep.mubr.msk.bf16.mxu1 %vm2123_vm2, %v13031_v41  ;;  %2794 = vmatpush1.bf16.msra.mxu1 %v11056_v26 }
 0x463   : > { %2795 = vmatprep.subr.bf16.mxu1 %v11061_v63 }
 0x466   : > { %2796 = vmatpush1.bf16.msra.mxu1 %v11059_v27 }
 0x467   : > { %2797 = vmatprep.subr.bf16.mxu1 %v11064_v61 }
 0x469   : > { %2531 = vmatmul.mubr.bf16.gmra.mrb[12].mxu1 %v13029_v40 }
 0x46a   : > { %9299 = vmatprep.mubr.msk.bf16.mxu1 %vm2123_vm2, %v13042_v62  ;;  %2798 = vmatpush1.bf16.msra.mxu1 %v11062_v31 }
 0x46b   : > { %2799 = vmatprep.subr.bf16.mxu1 %v11067_v35 }
 0x46e   : > { %2800 = vmatpush1.bf16.msra.mxu1 %v11065_v36 }
 0x46f   : > { %2801 = vmatprep.subr.bf16.mxu1 %v11070_v49 }
 0x471   : > { %2541 = vmatmul.mubr.bf16.gmra.mrb[16].mxu1 %v13040_v60 }
 0x472   : > { %9300 = vmatprep.mubr.msk.bf16.mxu1 %vm2123_vm2, %v13053_v20  ;;  %2802 = vmatpush1.bf16.msra.mxu1 %v11068_v50 }
 0x473   : > { %2803 = vmatprep.subr.bf16.mxu1 %v11073_v53 }
 0x476   : > { %2804 = vmatpush1.bf16.msra.mxu1 %v11071_v54 }
 0x477   : > { %9929 = vmatprep.subr.bf16.mxu1 %v11076_v57 }
 0x479   : > { %2551 = vmatmul.mubr.bf16.gmra.mrb[20].mxu1 %v13051_v19 }
 0x47a   : > { %9301 = vmatprep.mubr.msk.bf16.mxu1 %vm2123_vm2, %v13064_v46 }
 0x481   : > { %2561 = vmatmul.mubr.bf16.gmra.mrb[24].mxu1 %v13062_v45 }
 0x482   : > { %9302 = vmatprep.mubr.msk.bf16.mxu1 %vm2123_vm2, %v13075_v3 }
 0x489   : > { %2571 = vmatmul.mubr.bf16.gmra.mrb[28].mxu1 %v13073_v2 }
 0x48a   : > { %9303 = vmatprep.mubr.msk.bf16.mxu1 %vm2123_vm2, %v13086_v21 }
 0x491   : > { %2581 = vmatmul.mubr.bf16.gmra.mrb[32].mxu1 %v13084_v18 }
 0x492   : > { %9304 = vmatprep.mubr.msk.bf16.mxu1 %vm2123_vm2, %v13097_v43 }
 0x499   : > { %2591 = vmatmul.mubr.bf16.gmra.mrb[36].mxu1 %v13095_v42 }
 0x49a   : > { %9305 = vmatprep.mubr.msk.bf16.mxu1 %vm2123_vm2, %v13108_v4 }
 0x4a1   : > { %2601 = vmatmul.mubr.bf16.gmra.mrb[40].mxu1 %v13106_v1 }
 0x4a2   : > { %9306 = vmatprep.mubr.msk.bf16.mxu1 %vm2123_vm2, %v13119_v24 }
 0x4a9   : > { %2611 = vmatmul.mubr.bf16.gmra.mrb[44].mxu1 %v13117_v23 }
 0x4aa   : > { %9307 = vmatprep.mubr.msk.bf16.mxu1 %vm2123_vm2, %v13130_v52 }
 0x4b1   : > { %2621 = vmatmul.mubr.bf16.gmra.mrb[48].mxu1 %v13128_v51 }
 0x4b2   : > { %9308 = vmatprep.mubr.msk.bf16.mxu1 %vm2123_vm2, %v13141_v11 }
 0x4b9   : > { %2631 = vmatmul.mubr.bf16.gmra.mrb[52].mxu1 %v13139_v10 }
 0x4ba   : > { %9309 = vmatprep.mubr.msk.bf16.mxu1 %vm2123_vm2, %v13152_v39 }
 0x4c1   : > { %2641 = vmatmul.mubr.bf16.gmra.mrb[56].mxu1 %v13150_v38 }
 0x4c2   : > { %9310 = vmatprep.mubr.msk.bf16.mxu1 %vm2123_vm2, %v13163_v8 }
 0x4c9   : > { %2651 = vmatmul.mubr.bf16.gmra.mrb[60].mxu1 %v13161_v7 }
 0x4ca   : > { %9331 = vmatprep.mubr.msk.bf16.mxu1 %vm2123_vm2, %v13020_v17  ;;  %v11081_v17 = vld [vmem:[#allocation13 + $0x8] sm:$0xff]  }
 0x4d1   : > { %2818 = vmatmul.mubr.bf16.vlgmr.msra.gmra.mrb[0].mxu1 %v13018_v16  ;;  %v11089_v16 = vld [vmem:[#allocation13 + $0x18] sm:$0xff]  }
 0x4d2   : > { %9332 = vmatprep.mubr.msk.bf16.mxu1 %vm2123_vm2, %v13031_v41  ;;  %9930 = vmatpush3.bf16.msra.mxu1 %v11077_v6  ;;  %v11093_v41 = vld [vmem:[#allocation13 + $0x20] sm:$0xff]  }
 0x4d3   : > { %9931 = vmatprep.subr.bf16.mxu1 %v11080_v9 }
 0x4d6   : > { %9932 = vmatpush3.bf16.msra.mxu1 %v11081_v17 }
 0x4d7   : > { %9933 = vmatprep.subr.bf16.mxu1 %v11084_v33 }
 0x4d9   : > { %2828 = vmatmul.mubr.bf16.gmra.mrb[4].mxu1 %v13029_v40  ;;  %v11092_v40 = vld [vmem:[#allocation13 + $0x60] sm:$0xff]  }
 0x4da   : > { %9333 = vmatprep.mubr.msk.bf16.mxu1 %vm2123_vm2, %v13042_v62  ;;  %9934 = vmatpush3.bf16.msra.mxu1 %v11085_v22  ;;  %v11095_v62 = vld [vmem:[#allocation14 + $0x68] sm:$0xff]  }
 0x4db   : > { %9935 = vmatprep.subr.bf16.mxu1 %v11088_v25  ;;  %10003 = vmatprep.subr.bf16.mxu0 %v11095_v62 }
 0x4de   : > { %9936 = vmatpush3.bf16.msra.mxu1 %v11089_v16 }
 0x4df   : > { %9937 = vmatprep.subr.bf16.mxu1 %v11092_v40 }
 0x4e1   : > { %2838 = vmatmul.mubr.bf16.gmra.mrb[8].mxu1 %v13040_v60  ;;  %v11094_v60 = vld [vmem:[#allocation13 + $0x68] sm:$0xff]  }
 0x4e2   : > { %9334 = vmatprep.mubr.msk.bf16.mxu1 %vm2123_vm2, %v13053_v20  ;;  %9938 = vmatpush3.bf16.msra.mxu1 %v11093_v41  ;;  %v11097_v20 = vld [vmem:[#allocation14 + $0x28] sm:$0xff]  }
 0x4e3   : > { %9939 = vmatprep.subr.bf16.mxu1 %v11094_v60  ;;  %10004 = vmatpush3.bf16.msra.mxu0 %v11097_v20 }
 0x4e9   : > { %2848 = vmatmul.mubr.bf16.gmra.mrb[12].mxu1 %v13051_v19  ;;  %v11096_v19 = vld [vmem:[#allocation13 + $0x28] sm:$0xff]  }
 0x4ea   : > { %9335 = vmatprep.mubr.msk.bf16.mxu1 %vm2123_vm2, %v13064_v46  ;;  %9940 = vmatpush3.bf16.msra.mxu1 %v11096_v19  ;;  %v11099_v46 = vld [vmem:[#allocation14 + $0x70] sm:$0xff]  }
 0x4eb   : > { %10005 = vmatprep.subr.bf16.mxu0 %v11099_v46 }
 0x4f1   : > { %2858 = vmatmul.mubr.bf16.gmra.mrb[16].mxu1 %v13062_v45  ;;  %v11098_v45 = vld [vmem:[#allocation13 + $0x70] sm:$0xff]  }
 0x4f2   : > { %9336 = vmatprep.mubr.msk.bf16.mxu1 %vm2123_vm2, %v13075_v3  ;;  %v11101_v3 = vld [vmem:[#allocation14 + $0x30] sm:$0xff]   ;;  %9941 = vmatprep.subr.bf16.mxu1 %v11098_v45 }
 0x4f3   : > { %10006 = vmatpush3.bf16.msra.mxu0 %v11101_v3 }
 0x4f9   : > { %2868 = vmatmul.mubr.bf16.gmra.mrb[20].mxu1 %v13073_v2  ;;  %v11100_v2 = vld [vmem:[#allocation13 + $0x30] sm:$0xff]  }
 0x4fa   : > { %9337 = vmatprep.mubr.msk.bf16.mxu1 %vm2123_vm2, %v13086_v21  ;;  %9942 = vmatpush3.bf16.msra.mxu1 %v11100_v2  ;;  %v11103_v21 = vld [vmem:[#allocation14 + $0x78] sm:$0xff]  }
 0x4fb   : > { %10007 = vmatprep.subr.bf16.mxu0 %v11103_v21 }
 0x501   : > { %2878 = vmatmul.mubr.bf16.gmra.mrb[24].mxu1 %v13084_v18  ;;  %v11102_v18 = vld [vmem:[#allocation13 + $0x78] sm:$0xff]  }
 0x502   : > { %9338 = vmatprep.mubr.msk.bf16.mxu1 %vm2123_vm2, %v13097_v43  ;;  %v11105_v43 = vld [vmem:[#allocation14 + $0x38] sm:$0xff]   ;;  %9943 = vmatprep.subr.bf16.mxu1 %v11102_v18 }
 0x503   : > { %10008 = vmatpush3.bf16.msra.mxu0 %v11105_v43 }
 0x509   : > { %2888 = vmatmul.mubr.bf16.gmra.mrb[28].mxu1 %v13095_v42  ;;  %v11104_v42 = vld [vmem:[#allocation13 + $0x38] sm:$0xff]  }
 0x50a   : > { %9339 = vmatprep.mubr.msk.bf16.mxu1 %vm2123_vm2, %v13108_v4  ;;  %9944 = vmatpush3.bf16.msra.mxu1 %v11104_v42 }
 0x511   : > { %2898 = vmatmul.mubr.bf16.gmra.mrb[32].mxu1 %v13106_v1  ;;  %v3042_v1 = vld [vmem:[#allocation8] sm:$0x3] }
 0x512   : > { %9340 = vmatprep.mubr.msk.bf16.mxu1 %vm2123_vm2, %v13119_v24  ;;  %v13284_v4 = vrot.slane %v3042_v1, %v12984_v30 }
 0x519   : > { %2908 = vmatmul.mubr.bf16.gmra.mrb[36].mxu1 %v13117_v23  ;;  %v13287_v23 = vrot.slane %v3042_v1, %v12987_v32 }
 0x51a   : > { %9341 = vmatprep.mubr.msk.bf16.mxu1 %vm2123_vm2, %v13130_v52 }
 0x521   : > { %2918 = vmatmul.mubr.bf16.gmra.mrb[40].mxu1 %v13128_v51 }
 0x522   : > { %9342 = vmatprep.mubr.msk.bf16.mxu1 %vm2123_vm2, %v13141_v11 }
 0x529   : > { %2928 = vmatmul.mubr.bf16.gmra.mrb[44].mxu1 %v13139_v10 }
 0x52a   : > { %9343 = vmatprep.mubr.msk.bf16.mxu1 %vm2123_vm2, %v13152_v39 }
 0x531   : > { %2938 = vmatmul.mubr.bf16.gmra.mrb[48].mxu1 %v13150_v38 }
 0x532   : > { %9344 = vmatprep.mubr.msk.bf16.mxu1 %vm2123_vm2, %v13163_v8 }
 0x539   : > { %2948 = vmatmul.mubr.bf16.gmra.mrb[52].mxu1 %v13161_v7 }
 0x53a   : > { %9345 = vmatprep.mubr.msk.bf16.mxu1 %vm2123_vm2, %v13174_v44 }
 0x541   : > { %2958 = vmatmul.mubr.bf16.gmra.mrb[56].mxu1 %v13172_v37 }
 0x542   : > { %9346 = vmatprep.mubr.msk.bf16.mxu1 %vm2123_vm2, %v13187_v13 }
 0x549   : > { %2968 = vmatmul.mubr.bf16.gmra.mrb[60].mxu1 %v13185_v12 }
 0x5a4   : > { %v2819_v24 = vpop.f32.mrb[0].mxu1 }
 0x5a5   : > { %v3054_v51 = vadd.f32 %v13284_v4, %v2819_v24  ;;  %v2821_v52 = vpop.f32.mrb[1].mxu1 }
 0x5a6   : > { %v3055_v10 = vadd.f32 %v13287_v23, %v2821_v52  ;;  %v2823_v11 = vpop.f32.mrb[2].mxu1 }
 0x5a7   : > { %v3056_v38 = vadd.f32 %v13284_v4, %v2823_v11  ;;  %v2825_v39 = vpop.f32.mrb[3].mxu1  ;;  %v3118_v8 = vmax.f32 %v3054_v51, 0.0 }
 0x5a8   : > { %v3057_v7 = vadd.f32 %v13287_v23, %v2825_v39  ;;  %v3119_v44 = vmax.f32 %v3055_v10, 0.0 }
 0x5a9   : > { %v3120_v37 = vmax.f32 %v3056_v38, 0.0 }
 0x5aa   : > { %v3121_v12 = vmax.f32 %v3057_v7, 0.0 }
 0x5ab   : > { %v3182_v13 = vpack.c.bf16 %v3120_v37, %v3118_v8 }
 0x5ac   : > { %v3183_v26 = vpack.c.bf16 %v3121_v12, %v3119_v44  ;;  %v2829_v63 = vpop.f32.mrb[4].mxu1 }
 0x5ad   : > { %v3058_v27 = vadd.f32 %v13284_v4, %v2829_v63  ;;  %v2831_v61 = vpop.f32.mrb[5].mxu1 }
 0x5ae   : > { %v3059_v31 = vadd.f32 %v13287_v23, %v2831_v61  ;;  %v2833_v35 = vpop.f32.mrb[6].mxu1 }
 0x5af   : > { %v3060_v36 = vadd.f32 %v13284_v4, %v2833_v35  ;;  %v2835_v49 = vpop.f32.mrb[7].mxu1  ;;  %v3122_v53 = vmax.f32 %v3058_v27, 0.0 }
 0x5b0   : > { %v3061_v50 = vadd.f32 %v13287_v23, %v2835_v49  ;;  %v3123_v55 = vmax.f32 %v3059_v31, 0.0 }
 0x5b1   : > { %v3124_v54 = vmax.f32 %v3060_v36, 0.0 }
 0x5b2   : > { %v3125_v56 = vmax.f32 %v3061_v50, 0.0 }
 0x5b3   : > { %v3184_v57 = vpack.c.bf16 %v3124_v54, %v3122_v53 }
 0x5b4   : > { %v3185_v58 = vpack.c.bf16 %v3125_v56, %v3123_v55  ;;  %v2839_v59 = vpop.f32.mrb[8].mxu1 }
 0x5b5   : > { %v3214_v5 = vmax.bf16 %v3184_v57, %v3182_v13  ;;  %v3062_v6 = vadd.f32 %v13284_v4, %v2839_v59  ;;  %v2841_v9 = vpop.f32.mrb[9].mxu1 }
 0x5b6   : > { %v3063_v14 = vadd.f32 %v13287_v23, %v2841_v9  ;;  %v2843_v15 = vpop.f32.mrb[10].mxu1  ;;  %v3215_v17 = vmax.bf16 %v3185_v58, %v3183_v26 }
 0x5b7   : > { %v3064_v33 = vadd.f32 %v13284_v4, %v2843_v15  ;;  %v2845_v34 = vpop.f32.mrb[11].mxu1  ;;  %v3126_v22 = vmax.f32 %v3062_v6, 0.0 }
 0x5b8   : > { %v3065_v48 = vadd.f32 %v13287_v23, %v2845_v34  ;;  %3390 = vmatprep.mubr.bf16.mxu1 %v3215_v17  ;;  %3615 = vmatprep.mubr.bf16.mxu0 %v3215_v17  ;;  %v3127_v47 = vmax.f32 %v3063_v14, 0.0 }
 0x5b9   : > { %v3128_v25 = vmax.f32 %v3064_v33, 0.0  ;;  %3391 = vmatmul.mubr.bf16.vlgmr.msra.gmra.mrb[64].mxu1 %v3214_v5  ;;  %3616 = vmatmul.mubr.bf16.vlgmr.msra.gmra.mrb[72].mxu0 %v3214_v5 }
 0x5ba   : > { %v3129_v16 = vmax.f32 %v3065_v48, 0.0 }
 0x5bb   : > { %v3186_v40 = vpack.c.bf16 %v3128_v25, %v3126_v22 }
 0x5bc   : > { %v3187_v41 = vpack.c.bf16 %v3129_v16, %v3127_v47  ;;  %v2849_v60 = vpop.f32.mrb[12].mxu1 }
 0x5bd   : > { %v3066_v62 = vadd.f32 %v13284_v4, %v2849_v60  ;;  %v2851_v19 = vpop.f32.mrb[13].mxu1 }
 0x5be   : > { %v3067_v20 = vadd.f32 %v13287_v23, %v2851_v19  ;;  %v2853_v45 = vpop.f32.mrb[14].mxu1 }
 0x5bf   : > { %v3068_v46 = vadd.f32 %v13284_v4, %v2853_v45  ;;  %v2855_v2 = vpop.f32.mrb[15].mxu1  ;;  %v3130_v18 = vmax.f32 %v3066_v62, 0.0 }
 0x5c0   : > { %v3069_v3 = vadd.f32 %v13287_v23, %v2855_v2  ;;  %v3131_v42 = vmax.f32 %v3067_v20, 0.0 }
 0x5c1   : > { %v3132_v21 = vmax.f32 %v3068_v46, 0.0 }
 0x5c2   : > { %v3133_v43 = vmax.f32 %v3069_v3, 0.0 }
 0x5c3   : > { %v3188_v1 = vpack.c.bf16 %v3132_v21, %v3130_v18 }
 0x5c4   : > { %v3189_v24 = vpack.c.bf16 %v3133_v43, %v3131_v42  ;;  %v2859_v51 = vpop.f32.mrb[16].mxu1 }
 0x5c5   : > { %v3070_v52 = vadd.f32 %v13284_v4, %v2859_v51  ;;  %v2861_v10 = vpop.f32.mrb[17].mxu1  ;;  %v3216_v11 = vmax.bf16 %v3188_v1, %v3186_v40 }
 0x5c6   : > { %v3071_v38 = vadd.f32 %v13287_v23, %v2861_v10  ;;  %v2863_v39 = vpop.f32.mrb[18].mxu1  ;;  %v3217_v7 = vmax.bf16 %v3189_v24, %v3187_v41 }
 0x5c7   : > { %v3072_v8 = vadd.f32 %v13284_v4, %v2863_v39  ;;  %v2865_v37 = vpop.f32.mrb[19].mxu1  ;;  %v3134_v12 = vmax.f32 %v3070_v52, 0.0 }
 0x5c8   : > { %v3073_v44 = vadd.f32 %v13287_v23, %v2865_v37  ;;  %3398 = vmatprep.mubr.bf16.mxu1 %v3217_v7  ;;  %3623 = vmatprep.mubr.bf16.mxu0 %v3217_v7  ;;  %v3135_v26 = vmax.f32 %v3071_v38, 0.0 }
 0x5c9   : > { %v3136_v13 = vmax.f32 %v3072_v8, 0.0  ;;  %3399 = vmatmul.mubr.bf16.gmra.mrb[68].mxu1 %v3216_v11  ;;  %3624 = vmatmul.mubr.bf16.gmra.mrb[76].mxu0 %v3216_v11 }
 0x5ca   : > { %v3137_v63 = vmax.f32 %v3073_v44, 0.0 }
 0x5cb   : > { %v3190_v27 = vpack.c.bf16 %v3136_v13, %v3134_v12 }
 0x5cc   : > { %v3191_v61 = vpack.c.bf16 %v3137_v63, %v3135_v26  ;;  %v2869_v31 = vpop.f32.mrb[20].mxu1 }
 0x5cd   : > { %v3074_v35 = vadd.f32 %v13284_v4, %v2869_v31  ;;  %v2871_v36 = vpop.f32.mrb[21].mxu1 }
 0x5ce   : > { %v3075_v49 = vadd.f32 %v13287_v23, %v2871_v36  ;;  %v2873_v50 = vpop.f32.mrb[22].mxu1 }
 0x5cf   : > { %v3076_v53 = vadd.f32 %v13284_v4, %v2873_v50  ;;  %v2875_v54 = vpop.f32.mrb[23].mxu1  ;;  %v3138_v56 = vmax.f32 %v3074_v35, 0.0 }
 0x5d0   : > { %v3077_v55 = vadd.f32 %v13287_v23, %v2875_v54  ;;  %v3139_v58 = vmax.f32 %v3075_v49, 0.0 }
 0x5d1   : > { %v3140_v57 = vmax.f32 %v3076_v53, 0.0 }
 0x5d2   : > { %v3141_v59 = vmax.f32 %v3077_v55, 0.0 }
 0x5d3   : > { %v3192_v5 = vpack.c.bf16 %v3140_v57, %v3138_v56 }
 0x5d4   : > { %v3193_v6 = vpack.c.bf16 %v3141_v59, %v3139_v58  ;;  %v2879_v9 = vpop.f32.mrb[24].mxu1 }
 0x5d5   : > { %v3078_v14 = vadd.f32 %v13284_v4, %v2879_v9  ;;  %v2881_v15 = vpop.f32.mrb[25].mxu1  ;;  %v3218_v17 = vmax.bf16 %v3192_v5, %v3190_v27 }
 0x5d6   : > { %v3079_v33 = vadd.f32 %v13287_v23, %v2881_v15  ;;  %v2883_v34 = vpop.f32.mrb[26].mxu1  ;;  %v3219_v48 = vmax.bf16 %v3193_v6, %v3191_v61 }
 0x5d7   : > { %v3080_v22 = vadd.f32 %v13284_v4, %v2883_v34  ;;  %v2885_v25 = vpop.f32.mrb[27].mxu1  ;;  %v3142_v16 = vmax.f32 %v3078_v14, 0.0 }
 0x5d8   : > { %v3081_v47 = vadd.f32 %v13287_v23, %v2885_v25  ;;  %3406 = vmatprep.mubr.bf16.mxu1 %v3219_v48  ;;  %3631 = vmatprep.mubr.bf16.mxu0 %v3219_v48  ;;  %v3143_v41 = vmax.f32 %v3079_v33, 0.0 }
 0x5d9   : > { %v3144_v40 = vmax.f32 %v3080_v22, 0.0  ;;  %3407 = vmatmul.mubr.bf16.gmra.mrb[72].mxu1 %v3218_v17  ;;  %3632 = vmatmul.mubr.bf16.gmra.mrb[80].mxu0 %v3218_v17 }
 0x5da   : > { %v3145_v60 = vmax.f32 %v3081_v47, 0.0 }
 0x5db   : > { %v3194_v62 = vpack.c.bf16 %v3144_v40, %v3142_v16 }
 0x5dc   : > { %v3195_v19 = vpack.c.bf16 %v3145_v60, %v3143_v41  ;;  %v2889_v20 = vpop.f32.mrb[28].mxu1 }
 0x5dd   : > { %v3082_v45 = vadd.f32 %v13284_v4, %v2889_v20  ;;  %v2891_v46 = vpop.f32.mrb[29].mxu1 }
 0x5de   : > { %v3083_v2 = vadd.f32 %v13287_v23, %v2891_v46  ;;  %v2893_v3 = vpop.f32.mrb[30].mxu1 }
 0x5df   : > { %v3084_v18 = vadd.f32 %v13284_v4, %v2893_v3  ;;  %v2895_v21 = vpop.f32.mrb[31].mxu1  ;;  %v3146_v43 = vmax.f32 %v3082_v45, 0.0 }
 0x5e0   : > { %v3085_v42 = vadd.f32 %v13287_v23, %v2895_v21  ;;  %v3147_v24 = vmax.f32 %v3083_v2, 0.0 }
 0x5e1   : > { %v3148_v1 = vmax.f32 %v3084_v18, 0.0 }
 0x5e2   : > { %v3149_v51 = vmax.f32 %v3085_v42, 0.0 }
 0x5e3   : > { %v3196_v52 = vpack.c.bf16 %v3148_v1, %v3146_v43 }
 0x5e4   : > { %v3197_v10 = vpack.c.bf16 %v3149_v51, %v3147_v24  ;;  %v2899_v11 = vpop.f32.mrb[32].mxu1 }
 0x5e5   : > { %v3086_v38 = vadd.f32 %v13284_v4, %v2899_v11  ;;  %v2901_v39 = vpop.f32.mrb[33].mxu1  ;;  %v3220_v7 = vmax.bf16 %v3196_v52, %v3194_v62 }
 0x5e6   : > { %v3087_v8 = vadd.f32 %v13287_v23, %v2901_v39  ;;  %v2903_v37 = vpop.f32.mrb[34].mxu1  ;;  %v3221_v44 = vmax.bf16 %v3197_v10, %v3195_v19 }
 0x5e7   : > { %v3088_v12 = vadd.f32 %v13284_v4, %v2903_v37  ;;  %v2905_v13 = vpop.f32.mrb[35].mxu1  ;;  %v3150_v63 = vmax.f32 %v3086_v38, 0.0 }
 0x5e8   : > { %v3089_v26 = vadd.f32 %v13287_v23, %v2905_v13  ;;  %3414 = vmatprep.mubr.bf16.mxu1 %v3221_v44  ;;  %3639 = vmatprep.mubr.bf16.mxu0 %v3221_v44  ;;  %v3151_v61 = vmax.f32 %v3087_v8, 0.0 }
 0x5e9   : > { %v3152_v27 = vmax.f32 %v3088_v12, 0.0  ;;  %3415 = vmatmul.mubr.bf16.gmra.mrb[76].mxu1 %v3220_v7  ;;  %3640 = vmatmul.mubr.bf16.gmra.mrb[84].mxu0 %v3220_v7 }
 0x5ea   : > { %v3153_v31 = vmax.f32 %v3089_v26, 0.0 }
 0x5eb   : > { %v3198_v35 = vpack.c.bf16 %v3152_v27, %v3150_v63 }
 0x5ec   : > { %v3199_v36 = vpack.c.bf16 %v3153_v31, %v3151_v61  ;;  %v2909_v49 = vpop.f32.mrb[36].mxu1 }
 0x5ed   : > { %v3090_v50 = vadd.f32 %v13284_v4, %v2909_v49  ;;  %v2911_v53 = vpop.f32.mrb[37].mxu1 }
 0x5ee   : > { %v3091_v54 = vadd.f32 %v13287_v23, %v2911_v53  ;;  %v2913_v55 = vpop.f32.mrb[38].mxu1 }
 0x5ef   : > { %v3092_v56 = vadd.f32 %v13284_v4, %v2913_v55  ;;  %v2915_v57 = vpop.f32.mrb[39].mxu1  ;;  %v3154_v59 = vmax.f32 %v3090_v50, 0.0 }
 0x5f0   : > { %v3093_v58 = vadd.f32 %v13287_v23, %v2915_v57  ;;  %v3155_v6 = vmax.f32 %v3091_v54, 0.0 }
 0x5f1   : > { %v3156_v5 = vmax.f32 %v3092_v56, 0.0 }
 0x5f2   : > { %v3157_v9 = vmax.f32 %v3093_v58, 0.0 }
 0x5f3   : > { %v3200_v14 = vpack.c.bf16 %v3156_v5, %v3154_v59 }
 0x5f4   : > { %v3201_v15 = vpack.c.bf16 %v3157_v9, %v3155_v6  ;;  %v2919_v17 = vpop.f32.mrb[40].mxu1 }
 0x5f5   : > { %v3094_v33 = vadd.f32 %v13284_v4, %v2919_v17  ;;  %v2921_v34 = vpop.f32.mrb[41].mxu1  ;;  %v3222_v48 = vmax.bf16 %v3200_v14, %v3198_v35 }
 0x5f6   : > { %v3095_v22 = vadd.f32 %v13287_v23, %v2921_v34  ;;  %v2923_v25 = vpop.f32.mrb[42].mxu1  ;;  %v3223_v47 = vmax.bf16 %v3201_v15, %v3199_v36  ;;  %v11107_v34 = vld [vmem:[#allocation10 + $0x48] sm:$0xff]  }
 0x5f7   : > { %v3096_v16 = vadd.f32 %v13284_v4, %v2923_v25  ;;  %v2925_v40 = vpop.f32.mrb[43].mxu1  ;;  %v3158_v60 = vmax.f32 %v3094_v33, 0.0  ;;  %v11106_v33 = vld [vmem:[#allocation10 + $0x40] sm:$0xff]  }
 0x5f8   : > { %v3097_v41 = vadd.f32 %v13287_v23, %v2925_v40  ;;  %3422 = vmatprep.mubr.bf16.mxu1 %v3223_v47  ;;  %3647 = vmatprep.mubr.bf16.mxu0 %v3223_v47  ;;  %v3159_v19 = vmax.f32 %v3095_v22, 0.0 }
 0x5f9   : > { %v3160_v62 = vmax.f32 %v3096_v16, 0.0  ;;  %3423 = vmatmul.mubr.bf16.gmra.mrb[80].mxu1 %v3222_v48  ;;  %3648 = vmatmul.mubr.bf16.gmra.mrb[88].mxu0 %v3222_v48 }
 0x5fa   : > { %v3161_v20 = vmax.f32 %v3097_v41, 0.0  ;;  %10214 = vmatprep.subr.bf16.mxu1 %v11106_v33 }
 0x5fb   : > { %v3202_v45 = vpack.c.bf16 %v3160_v62, %v3158_v60  ;;  %10215 = vmatpush3.bf16.msra.mxu1 %v11106_v33 }
 0x5fc   : > { %v3203_v46 = vpack.c.bf16 %v3161_v20, %v3159_v19  ;;  %v2929_v2 = vpop.f32.mrb[44].mxu1  ;;  %10216 = vmatprep.subr.bf16.mxu1 %v11107_v34 }
 0x5fd   : > { %v3098_v3 = vadd.f32 %v13284_v4, %v2929_v2  ;;  %v2931_v18 = vpop.f32.mrb[45].mxu1 }
 0x5fe   : > { %v3099_v21 = vadd.f32 %v13287_v23, %v2931_v18  ;;  %v2933_v42 = vpop.f32.mrb[46].mxu1 }
 0x5ff   : > { %v3100_v43 = vadd.f32 %v13284_v4, %v2933_v42  ;;  %v2935_v1 = vpop.f32.mrb[47].mxu1  ;;  %v3162_v51 = vmax.f32 %v3098_v3, 0.0  ;;  %10217 = vmatpush3.bf16.msra.mxu1 %v11107_v34 }
 0x600   : > { %v3101_v24 = vadd.f32 %v13287_v23, %v2935_v1  ;;  %v3163_v10 = vmax.f32 %v3099_v21, 0.0  ;;  %v11108_v1 = vld [vmem:[#allocation10 + $0x50] sm:$0xff]  }
 0x601   : > { %v3164_v52 = vmax.f32 %v3100_v43, 0.0  ;;  %10218 = vmatprep.subr.bf16.mxu1 %v11108_v1 }
 0x602   : > { %v3165_v11 = vmax.f32 %v3101_v24, 0.0 }
 0x603   : > { %v3204_v38 = vpack.c.bf16 %v3164_v52, %v3162_v51  ;;  %10219 = vmatpush3.bf16.msra.mxu1 %v11108_v1 }
 0x604   : > { %v3205_v39 = vpack.c.bf16 %v3165_v11, %v3163_v10  ;;  %v2939_v7 = vpop.f32.mrb[48].mxu1 }
 0x605   : > { %v3102_v8 = vadd.f32 %v13284_v4, %v2939_v7  ;;  %v2941_v37 = vpop.f32.mrb[49].mxu1  ;;  %v3224_v44 = vmax.bf16 %v3204_v38, %v3202_v45  ;;  %v11109_v7 = vld [vmem:[#allocation10 + $0x58] sm:$0xff]  }
 0x606   : > { %v3103_v12 = vadd.f32 %v13287_v23, %v2941_v37  ;;  %v2943_v13 = vpop.f32.mrb[50].mxu1  ;;  %v3225_v26 = vmax.bf16 %v3205_v39, %v3203_v46  ;;  %10220 = vmatprep.subr.bf16.mxu1 %v11109_v7 }
 0x607   : > { %v3104_v63 = vadd.f32 %v13284_v4, %v2943_v13  ;;  %v2945_v27 = vpop.f32.mrb[51].mxu1  ;;  %v3166_v31 = vmax.f32 %v3102_v8, 0.0  ;;  %v11110_v13 = vld [vmem:[#allocation10 + $0x60] sm:$0xff]   ;;  %10221 = vmatpush3.bf16.msra.mxu1 %v11109_v7  ;;  %v11131_v7 = vld [vmem:[%s14015_s9 + $0x8] sm:$0xff]  }
 0x608   : > { %v3105_v61 = vadd.f32 %v13287_v23, %v2945_v27  ;;  %3430 = vmatprep.mubr.bf16.mxu1 %v3225_v26  ;;  %3655 = vmatprep.mubr.bf16.mxu0 %v3225_v26  ;;  %v3167_v36 = vmax.f32 %v3103_v12, 0.0 }
 0x609   : > { %v3168_v35 = vmax.f32 %v3104_v63, 0.0  ;;  %3431 = vmatmul.mubr.bf16.gmra.mrb[84].mxu1 %v3224_v44  ;;  %3656 = vmatmul.mubr.bf16.gmra.mrb[92].mxu0 %v3224_v44 }
 0x60a   : > { %v3169_v49 = vmax.f32 %v3105_v61, 0.0  ;;  %10222 = vmatprep.subr.bf16.mxu1 %v11110_v13 }
 0x60b   : > { %v3206_v50 = vpack.c.bf16 %v3168_v35, %v3166_v31  ;;  %v11111_v31 = vld [vmem:[#allocation10 + $0x68] sm:$0xff]   ;;  %10223 = vmatpush3.bf16.msra.mxu1 %v11110_v13  ;;  %v11114_v35 = vld [vmem:[#allocation10] sm:$0xff]   ;;  %v11116_v13 = vld [vmem:[#allocation10 + $0x10] sm:$0xff]  }
 0x60c   : > { %v3207_v53 = vpack.c.bf16 %v3169_v49, %v3167_v36  ;;  %v2949_v54 = vpop.f32.mrb[52].mxu1  ;;  %10224 = vmatprep.subr.bf16.mxu1 %v11111_v31 }
 0x60d   : > { %v3106_v55 = vadd.f32 %v13284_v4, %v2949_v54  ;;  %v2951_v56 = vpop.f32.mrb[53].mxu1 }
 0x60e   : > { %v3107_v57 = vadd.f32 %v13287_v23, %v2951_v56  ;;  %v2953_v58 = vpop.f32.mrb[54].mxu1 }
 0x60f   : > { %v3108_v59 = vadd.f32 %v13284_v4, %v2953_v58  ;;  %v2955_v5 = vpop.f32.mrb[55].mxu1  ;;  %v3170_v9 = vmax.f32 %v3106_v55, 0.0  ;;  %10225 = vmatpush3.bf16.msra.mxu1 %v11111_v31  ;;  %v11134_v31 = vld [vmem:[%s14015_s9 + $0x20] sm:$0xff]  }
 0x610   : > { %v3109_v6 = vadd.f32 %v13287_v23, %v2955_v5  ;;  %v3171_v15 = vmax.f32 %v3107_v57, 0.0 }
 0x611   : > { %v3172_v14 = vmax.f32 %v3108_v59, 0.0 }
 0x612   : > { %v3173_v17 = vmax.f32 %v3109_v6, 0.0 }
 0x613   : > { %v3208_v48 = vpack.c.bf16 %v3172_v14, %v3170_v9 }
 0x614   : > { %v3209_v22 = vpack.c.bf16 %v3173_v17, %v3171_v15  ;;  %v2959_v25 = vpop.f32.mrb[56].mxu1 }
 0x615   : > { %v3110_v47 = vadd.f32 %v13284_v4, %v2959_v25  ;;  %v2961_v16 = vpop.f32.mrb[57].mxu1  ;;  %v3226_v40 = vmax.bf16 %v3208_v48, %v3206_v50 }
 0x616   : > { %v3111_v41 = vadd.f32 %v13287_v23, %v2961_v16  ;;  %v2963_v60 = vpop.f32.mrb[58].mxu1  ;;  %v3227_v62 = vmax.bf16 %v3209_v22, %v3207_v53 }
 0x617   : > { %v3112_v19 = vadd.f32 %v13284_v4, %v2963_v60  ;;  %v2965_v20 = vpop.f32.mrb[59].mxu1  ;;  %v3174_v46 = vmax.f32 %v3110_v47, 0.0 }
 0x618   : > { %v3113_v45 = vadd.f32 %v13287_v23, %v2965_v20  ;;  %3438 = vmatprep.mubr.bf16.mxu1 %v3227_v62  ;;  %3663 = vmatprep.mubr.bf16.mxu0 %v3227_v62  ;;  %v3175_v3 = vmax.f32 %v3111_v41, 0.0 }
 0x619   : > { %v3176_v2 = vmax.f32 %v3112_v19, 0.0  ;;  %3439 = vmatmul.mubr.bf16.gmra.mrb[88].mxu1 %v3226_v40  ;;  %3664 = vmatmul.mubr.bf16.gmra.mrb[96].mxu0 %v3226_v40 }
 0x61a   : > { %v3177_v18 = vmax.f32 %v3113_v45, 0.0 }
 0x61b   : > { %v3210_v21 = vpack.c.bf16 %v3176_v2, %v3174_v46 }
 0x61c   : > { %v3211_v42 = vpack.c.bf16 %v3177_v18, %v3175_v3  ;;  %v2969_v43 = vpop.f32.mrb[60].mxu1 }
 0x61d   : > { %v3114_v24 = vadd.f32 %v13284_v4, %v2969_v43  ;;  %v2971_v51 = vpop.f32.mrb[61].mxu1 }
 0x61e   : > { %v3115_v52 = vadd.f32 %v13287_v23, %v2971_v51  ;;  %v2973_v10 = vpop.f32.mrb[62].mxu1 }
 0x61f   : > { %v3116_v11 = vadd.f32 %v13284_v4, %v2973_v10  ;;  %v2975_v38 = vpop.f32.mrb[63].mxu1  ;;  %v3178_v8 = vmax.f32 %v3114_v24, 0.0  ;;  %v11112_v4 = vld [vmem:[#allocation10 + $0x70] sm:$0xff]   ;;  %v12217_v10 = vmov 0.0  }
 0x620   : > { %v3117_v39 = vadd.f32 %v13287_v23, %v2975_v38  ;;  %v3179_v44 = vmax.f32 %v3115_v52, 0.0  ;;  %10226 = vmatprep.subr.bf16.mxu1 %v11112_v4  ;;  %v11113_v23 = vld [vmem:[#allocation10 + $0x78] sm:$0xff]   ;;  %v11130_v24 = vld [vmem:[%s14015_s9] sm:$0xff]   ;;  %10298 = vmatprep.subr.bf16.mxu0 %v12217_v10 }
 0x621   : > { %v3180_v37 = vmax.f32 %v3116_v11, 0.0  ;;  %10227 = vmatpush3.bf16.msra.mxu1 %v11112_v4  ;;  %10299 = vmatpush3.bf16.msra.mxu0 %v11130_v24 }
 0x622   : > { %v3181_v12 = vmax.f32 %v3117_v39, 0.0  ;;  %10228 = vmatprep.subr.bf16.mxu1 %v11113_v23  ;;  %10300 = vmatprep.subr.bf16.mxu0 %v12217_v10 }
 0x623   : > { %v3212_v26 = vpack.c.bf16 %v3180_v37, %v3178_v8 }
 0x624   : > { %v3213_v63 = vpack.c.bf16 %v3181_v12, %v3179_v44  ;;  %v11115_v44 = vld [vmem:[#allocation10 + $0x8] sm:$0xff]   ;;  %v11132_v12 = vld [vmem:[%s14015_s9 + $0x10] sm:$0xff]  }
 0x625   : > { %v3228_v27 = vmax.bf16 %v3212_v26, %v3210_v21  ;;  %10229 = vmatpush3.bf16.msra.mxu1 %v11113_v23  ;;  %10301 = vmatpush3.bf16.msra.mxu0 %v11131_v7  ;;  %v11133_v26 = vld [vmem:[%s14015_s9 + $0x18] sm:$0xff]  }
 0x626   : > { %v3229_v61 = vmax.bf16 %v3213_v63, %v3211_v42  ;;  %10242 = vmatprep.subr.bf16.mxu1 %v11114_v35  ;;  %10302 = vmatprep.subr.bf16.mxu0 %v12217_v10 }
 0x628   : > { %3446 = vmatprep.mubr.bf16.mxu1 %v3229_v61  ;;  %3671 = vmatprep.mubr.bf16.mxu0 %v3229_v61  ;;  %v11117_v61 = vld [vmem:[#allocation10 + $0x18] sm:$0xff]  }
 0x629   : > { %3447 = vmatmul.mubr.bf16.gmra.mrb[92].mxu1 %v3228_v27  ;;  %3672 = vmatmul.mubr.bf16.gmra.mrb[100].mxu0 %v3228_v27 }
 0x62a   : > { %10303 = vmatpush3.bf16.msra.mxu0 %v11132_v12  ;;  %10314 = vmatprep.mubr.msk.bf16.mxu0 %vm12218_vm3, %v12217_v10 }
 0x62b   : > { %10304 = vmatprep.subr.bf16.mxu0 %v12217_v10 }
 0x62e   : > { %10305 = vmatpush3.bf16.msra.mxu0 %v11133_v26 }
 0x62f   : > { %10306 = vmatprep.subr.bf16.mxu0 %v12217_v10 }
 0x632   : > { %10307 = vmatpush3.bf16.msra.mxu0 %v11134_v31 }
 0x633   : > { %10308 = vmatprep.subr.bf16.mxu0 %v12217_v10 }
 0x68c   : > { %v9945_v36 = vpop.f32.mrb[64].mxu1  ;;  %v10009_v49 = vpop.f32.mrb[72].mxu0 }
 0x68d   : > { %v9946_v50 = vpop.f32.mrb[65].mxu1  ;;  %v10010_v53 = vpop.f32.mrb[73].mxu0 }
 0x68e   : > { %v9947_v54 = vadd.f32 %v9946_v50, %v9945_v36  ;;  %v10011_v55 = vadd.f32 %v10010_v53, %v10009_v49  ;;  %v9948_v56 = vpop.f32.mrb[66].mxu1  ;;  %v10012_v57 = vpop.f32.mrb[74].mxu0 }
 0x68f   : > { %v9949_v58 = vpop.f32.mrb[67].mxu1  ;;  %v10013_v59 = vpop.f32.mrb[75].mxu0 }
 0x690   : > { %v3680_v5 = vmax.f32 %v9947_v54, %v10011_v55  ;;  %v9950_v6 = vadd.f32 %v9949_v58, %v9948_v56  ;;  %v10014_v9 = vadd.f32 %v10013_v59, %v10012_v57  ;;  %v11118_v58 = vld [vmem:[#allocation10 + $0x20] sm:$0xff]   ;;  %v11135_v59 = vld [vmem:[%s14015_s9 + $0x28] sm:$0xff]  }
 0x691   : > { %10309 = vmatpush3.bf16.msra.mxu0 %v11135_v59  ;;  %v11123_v59 = vld [vmem:[#allocation10 + $0x88] sm:$0xff]  }
 0x692   : > { %v3681_v14 = vmax.f32 %v9950_v6, %v10014_v9  ;;  %v11119_v9 = vld [vmem:[#allocation10 + $0x28] sm:$0xff]   ;;  %10310 = vmatprep.subr.bf16.mxu0 %v12217_v10 }
 0x694   : > { %v13353_v15 = vpack.c.bf16 %v3681_v14, %v3680_v5  ;;  %v11136_v14 = vld [vmem:[%s14015_s9 + $0x30] sm:$0xff]  }
 0x695   : > { %10311 = vmatpush3.bf16.msra.mxu0 %v11136_v14 }
 0x696   : > { %10312 = vmatprep.subr.bf16.mxu0 %v12217_v10 }
 0x69c   : > { %v9951_v17 = vpop.f32.mrb[68].mxu1  ;;  %v10015_v33 = vpop.f32.mrb[76].mxu0 }
 0x69d   : > { %v9952_v34 = vpop.f32.mrb[69].mxu1  ;;  %v10016_v48 = vpop.f32.mrb[77].mxu0 }
 0x69e   : > { %v9953_v22 = vadd.f32 %v9952_v34, %v9951_v17  ;;  %v10017_v25 = vadd.f32 %v10016_v48, %v10015_v33  ;;  %v9954_v47 = vpop.f32.mrb[70].mxu1  ;;  %v10018_v16 = vpop.f32.mrb[78].mxu0  ;;  %v11120_v17 = vld [vmem:[#allocation10 + $0x30] sm:$0xff]   ;;  %v11121_v48 = vld [vmem:[#allocation10 + $0x38] sm:$0xff]  }
 0x69f   : > { %v9955_v40 = vpop.f32.mrb[71].mxu1  ;;  %v10019_v41 = vpop.f32.mrb[79].mxu0 }
 0x6a0   : > { %v3682_v60 = vmax.f32 %v9953_v22, %v10017_v25  ;;  %v9956_v62 = vadd.f32 %v9955_v40, %v9954_v47  ;;  %v10020_v19 = vadd.f32 %v10019_v41, %v10018_v16 }
 0x6a2   : > { %v3683_v20 = vmax.f32 %v9956_v62, %v10020_v19 }
 0x6a4   : > { %v13355_v45 = vpack.c.bf16 %v3683_v20, %v3682_v60 }
 0x6a6   : > { %10230 = vmatprep.mubr.bf16.mxu1 %v13355_v45 }
 0x6ac   : > { %v9957_v46 = vpop.f32.mrb[72].mxu1  ;;  %v10021_v2 = vpop.f32.mrb[80].mxu0 }
 0x6ad   : > { %v9958_v3 = vpop.f32.mrb[73].mxu1  ;;  %v10022_v18 = vpop.f32.mrb[81].mxu0 }
 0x6ae   : > { %v9959_v21 = vadd.f32 %v9958_v3, %v9957_v46  ;;  %v10023_v42 = vadd.f32 %v10022_v18, %v10021_v2  ;;  %v9960_v43 = vpop.f32.mrb[74].mxu1  ;;  %v10024_v1 = vpop.f32.mrb[82].mxu0  ;;  %v11122_v2 = vld [vmem:[#allocation10 + $0x80] sm:$0xff]  }
 0x6af   : > { %v9961_v51 = vpop.f32.mrb[75].mxu1  ;;  %v10025_v52 = vpop.f32.mrb[83].mxu0 }
 0x6b0   : > { %v3684_v11 = vmax.f32 %v9959_v21, %v10023_v42  ;;  %v9962_v38 = vadd.f32 %v9961_v51, %v9960_v43  ;;  %v10026_v39 = vadd.f32 %v10025_v52, %v10024_v1 }
 0x6b2   : > { %v3685_v8 = vmax.f32 %v9962_v38, %v10026_v39 }
 0x6b4   : > { %v13366_v37 = vpack.c.bf16 %v3685_v8, %v3684_v11 }
 0x6b6   : > { %10231 = vmatmul.mubr.bf16.vlgmr.msra.gmra.mrb[96].mxu1 %v13366_v37 }
 0x6b7   : > { %10243 = vmatpush3.bf16.msra.mxu1 %v11114_v35 }
 0x6b8   : > { %10244 = vmatprep.subr.bf16.mxu1 %v11115_v44 }
 0x6bb   : > { %10245 = vmatpush3.bf16.msra.mxu1 %v11115_v44 }
 0x6bc   : > { %v9963_v63 = vpop.f32.mrb[76].mxu1  ;;  %v10027_v27 = vpop.f32.mrb[84].mxu0  ;;  %10246 = vmatprep.subr.bf16.mxu1 %v11116_v13 }
 0x6bd   : > { %v9964_v4 = vpop.f32.mrb[77].mxu1  ;;  %v10028_v23 = vpop.f32.mrb[85].mxu0 }
 0x6be   : > { %v9965_v35 = vadd.f32 %v9964_v4, %v9963_v63  ;;  %v10029_v36 = vadd.f32 %v10028_v23, %v10027_v27  ;;  %v9966_v49 = vpop.f32.mrb[78].mxu1  ;;  %v10030_v50 = vpop.f32.mrb[86].mxu0 }
 0x6bf   : > { %v9967_v53 = vpop.f32.mrb[79].mxu1  ;;  %v10031_v54 = vpop.f32.mrb[87].mxu0  ;;  %10247 = vmatpush3.bf16.msra.mxu1 %v11116_v13 }
 0x6c0   : > { %v3686_v55 = vmax.f32 %v9965_v35, %v10029_v36  ;;  %v9968_v56 = vadd.f32 %v9967_v53, %v9966_v49  ;;  %v10032_v57 = vadd.f32 %v10031_v54, %v10030_v50  ;;  %10248 = vmatprep.subr.bf16.mxu1 %v11117_v61 }
 0x6c2   : > { %v3687_v5 = vmax.f32 %v9968_v56, %v10032_v57 }
 0x6c3   : > { %10249 = vmatpush3.bf16.msra.mxu1 %v11117_v61 }
 0x6c4   : > { %v13385_v6 = vpack.c.bf16 %v3687_v5, %v3686_v55  ;;  %10250 = vmatprep.subr.bf16.mxu1 %v11118_v58 }
 0x6c6   : > { %10234 = vmatprep.mubr.bf16.mxu1 %v13385_v6 }
 0x6c7   : > { %10251 = vmatpush3.bf16.msra.mxu1 %v11118_v58 }
 0x6c8   : > { %10252 = vmatprep.subr.bf16.mxu1 %v11119_v9 }
 0x6cb   : > { %10253 = vmatpush3.bf16.msra.mxu1 %v11119_v9 }
 0x6cc   : > { %v9969_v33 = vpop.f32.mrb[80].mxu1  ;;  %v10033_v34 = vpop.f32.mrb[88].mxu0  ;;  %10254 = vmatprep.subr.bf16.mxu1 %v11120_v17 }
 0x6cd   : > { %v9970_v22 = vpop.f32.mrb[81].mxu1  ;;  %v10034_v25 = vpop.f32.mrb[89].mxu0 }
 0x6ce   : > { %v9971_v47 = vadd.f32 %v9970_v22, %v9969_v33  ;;  %v10035_v16 = vadd.f32 %v10034_v25, %v10033_v34  ;;  %v9972_v40 = vpop.f32.mrb[82].mxu1  ;;  %v10036_v41 = vpop.f32.mrb[90].mxu0 }
 0x6cf   : > { %v9973_v60 = vpop.f32.mrb[83].mxu1  ;;  %v10037_v62 = vpop.f32.mrb[91].mxu0  ;;  %10255 = vmatpush3.bf16.msra.mxu1 %v11120_v17 }
 0x6d0   : > { %v3688_v19 = vmax.f32 %v9971_v47, %v10035_v16  ;;  %v9974_v20 = vadd.f32 %v9973_v60, %v9972_v40  ;;  %v10038_v46 = vadd.f32 %v10037_v62, %v10036_v41  ;;  %10256 = vmatprep.subr.bf16.mxu1 %v11121_v48  ;;  %v11125_v41 = vld [vmem:[#allocation10 + $0x98] sm:$0xff]   ;;  %v11127_v62 = vld [vmem:[#allocation10 + $0xa8] sm:$0xff]  }
 0x6d2   : > { %v3689_v3 = vmax.f32 %v9974_v20, %v10038_v46  ;;  %v11129_v20 = vld [vmem:[#allocation10 + $0xb8] sm:$0xff]  }
 0x6d3   : > { %10257 = vmatpush3.bf16.msra.mxu1 %v11121_v48 }
 0x6d4   : > { %v13393_v18 = vpack.c.bf16 %v3689_v3, %v3688_v19  ;;  %10270 = vmatprep.subr.bf16.mxu1 %v11122_v2  ;;  %v11128_v19 = vld [vmem:[#allocation10 + $0xb0] sm:$0xff]  }
 0x6d6   : > { %10235 = vmatmul.mubr.bf16.gmra.mrb[100].mxu1 %v13393_v18 }
 0x6dc   : > { %v9975_v21 = vpop.f32.mrb[84].mxu1  ;;  %v10039_v42 = vpop.f32.mrb[92].mxu0 }
 0x6dd   : > { %v9976_v43 = vpop.f32.mrb[85].mxu1  ;;  %v10040_v1 = vpop.f32.mrb[93].mxu0 }
 0x6de   : > { %v9977_v24 = vadd.f32 %v9976_v43, %v9975_v21  ;;  %v10041_v51 = vadd.f32 %v10040_v1, %v10039_v42  ;;  %v9978_v52 = vpop.f32.mrb[86].mxu1  ;;  %v10042_v11 = vpop.f32.mrb[94].mxu0 }
 0x6df   : > { %v9979_v38 = vpop.f32.mrb[87].mxu1  ;;  %v10043_v39 = vpop.f32.mrb[95].mxu0 }
 0x6e0   : > { %v3690_v7 = vmax.f32 %v9977_v24, %v10041_v51  ;;  %v9980_v8 = vadd.f32 %v9979_v38, %v9978_v52  ;;  %v10044_v44 = vadd.f32 %v10043_v39, %v10042_v11 }
 0x6e2   : > { %v3691_v12 = vmax.f32 %v9980_v8, %v10044_v44 }
 0x6e4   : > { %v13396_v13 = vpack.c.bf16 %v3691_v12, %v3690_v7  ;;  %v11138_v12 = vld [vmem:[%s14016_s10] sm:$0xff]  }
 0x6e6   : > { %10238 = vmatprep.mubr.bf16.mxu1 %v13396_v13 }
 0x6ec   : > { %v9981_v26 = vpop.f32.mrb[88].mxu1  ;;  %v10045_v63 = vpop.f32.mrb[96].mxu0 }
 0x6ed   : > { %v9982_v27 = vpop.f32.mrb[89].mxu1  ;;  %v10046_v61 = vpop.f32.mrb[97].mxu0 }
 0x6ee   : > { %v9983_v31 = vadd.f32 %v9982_v27, %v9981_v26  ;;  %v10047_v4 = vadd.f32 %v10046_v61, %v10045_v63  ;;  %v9984_v23 = vpop.f32.mrb[90].mxu1  ;;  %v10048_v35 = vpop.f32.mrb[98].mxu0 }
 0x6ef   : > { %v9985_v36 = vpop.f32.mrb[91].mxu1  ;;  %v10049_v49 = vpop.f32.mrb[99].mxu0 }
 0x6f0   : > { %v3692_v50 = vmax.f32 %v9983_v31, %v10047_v4  ;;  %v9986_v53 = vadd.f32 %v9985_v36, %v9984_v23  ;;  %v10050_v54 = vadd.f32 %v10049_v49, %v10048_v35  ;;  %v11139_v35 = vld [vmem:[%s14016_s10 + $0x8] sm:$0xff]  }
 0x6f2   : > { %v3693_v55 = vmax.f32 %v9986_v53, %v10050_v54 }
 0x6f4   : > { %v3702_v56 = vpack.c.bf16 %v3693_v55, %v3692_v50 }
 0x6f6   : > { %10239 = vmatmul.mubr.bf16.gmra.mrb[104].mxu1 %v3702_v56 }
 0x6f7   : > { %10258 = vmatprep.mubr.bf16.mxu1 %v13353_v15  ;;  %v11124_v15 = vld [vmem:[#allocation10 + $0x90] sm:$0xff]  }
 0x6fc   : > { %v9987_v57 = vpop.f32.mrb[92].mxu1  ;;  %v10051_v58 = vpop.f32.mrb[100].mxu0 }
 0x6fd   : > { %v9988_v5 = vpop.f32.mrb[93].mxu1  ;;  %v10052_v9 = vpop.f32.mrb[101].mxu0 }
 0x6fe   : > { %v9989_v14 = vadd.f32 %v9988_v5, %v9987_v57  ;;  %v10053_v17 = vadd.f32 %v10052_v9, %v10051_v58  ;;  %v9990_v33 = vpop.f32.mrb[94].mxu1  ;;  %v10054_v34 = vpop.f32.mrb[102].mxu0  ;;  %10259 = vmatmul.mubr.bf16.vlgmr.msra.gmra.mrb[96].mxu1 %v13355_v45  ;;  %v11126_v45 = vld [vmem:[#allocation10 + $0xa0] sm:$0xff]  }
 0x6ff   : > { %10271 = vmatpush3.bf16.msra.mxu1 %v11122_v2  ;;  %v9991_v48 = vpop.f32.mrb[95].mxu1  ;;  %v10055_v22 = vpop.f32.mrb[103].mxu0  ;;  %10262 = vmatprep.mubr.bf16.mxu1 %v13366_v37  ;;  %v11140_v57 = vld [vmem:[%s14016_s10 + $0x10] sm:$0xff]  }
 0x700   : > { %v3694_v25 = vmax.f32 %v9989_v14, %v10053_v17  ;;  %v9992_v47 = vadd.f32 %v9991_v48, %v9990_v33  ;;  %v10056_v16 = vadd.f32 %v10055_v22, %v10054_v34  ;;  %10272 = vmatprep.subr.bf16.mxu1 %v11123_v59  ;;  %v11141_v48 = vld [vmem:[%s14016_s10 + $0x18] sm:$0xff]  }
 0x702   : > { %v3695_v40 = vmax.f32 %v9992_v47, %v10056_v16 }
 0x703   : > { %10273 = vmatpush3.bf16.msra.mxu1 %v11123_v59 }
 0x704   : > { %10274 = vmatprep.subr.bf16.mxu1 %v11124_v15  ;;  %v3703_v60 = vpack.c.bf16 %v3695_v40, %v3694_v25 }
 0x706   : > { %10263 = vmatmul.mubr.bf16.gmra.mrb[100].mxu1 %v13385_v6 }
 0x707   : > { %10275 = vmatpush3.bf16.msra.mxu1 %v11124_v15  ;;  %10266 = vmatprep.mubr.bf16.mxu1 %v13393_v18  ;;  %v11142_v15 = vld [vmem:[%s14016_s10 + $0x20] sm:$0xff]  }
 0x708   : > { %10276 = vmatprep.subr.bf16.mxu1 %v11125_v41 }
 0x70b   : > { %10277 = vmatpush3.bf16.msra.mxu1 %v11125_v41  ;;  %v11143_v41 = vld [vmem:[%s14016_s10 + $0x28] sm:$0xff]  }
 0x70c   : > { %10278 = vmatprep.subr.bf16.mxu1 %v11126_v45 }
 0x70e   : > { %10267 = vmatmul.mubr.bf16.gmra.mrb[104].mxu1 %v13396_v13 }
 0x70f   : > { %10279 = vmatpush3.bf16.msra.mxu1 %v11126_v45  ;;  %10286 = vmatprep.mubr.bf16.mxu1 %v13366_v37  ;;  %v11137_v37 = vld [vmem:[%s14015_s9 + $0x38] sm:$0xff]  }
 0x710   : > { %10280 = vmatprep.subr.bf16.mxu1 %v11127_v62  ;;  %10313 = vmatpush3.bf16.msra.mxu0 %v11137_v37  ;;  %v11145_v45 = vld [vmem:[%s14016_s10 + $0x38] sm:$0xff]  }
 0x711   : > { %10326 = vmatprep.subr.bf16.mxu0 %v12217_v10 }
 0x713   : > { %10281 = vmatpush3.bf16.msra.mxu1 %v11127_v62  ;;  %v4476_v62 = vld [vmem:[%s14017_s11 + $0x100] sm:$0xff] }
 0x714   : > { %10282 = vmatprep.subr.bf16.mxu1 %v11128_v19 }
 0x717   : > { %10283 = vmatpush3.bf16.msra.mxu1 %v11128_v19  ;;  %v4480_v19 = vld [vmem:[%s14017_s11 + $0x120] sm:$0xff] }
 0x718   : > { %10284 = vmatprep.subr.bf16.mxu1 %v11129_v20  ;;  %v9420_v37 = vcombine.low %v4476_v62, %v4480_v19 }
 0x71b   : > { %10285 = vmatpush3.bf16.msra.mxu1 %v11129_v20  ;;  %v4484_v20 = vld [vmem:[%s14017_s11 + $0x140] sm:$0xff] }
 0x71e   : > { %10287 = vmatmul.mubr.bf16.vlgmr.msra.gmra.mrb[96].mxu1 %v13385_v6  ;;  %v9403_v6 = vld [vmem:[#allocation11] ss:$0 sm:$0xff] }
 0x71f   : > { %10290 = vmatprep.mubr.bf16.mxu1 %v13393_v18 }
 0x726   : > { %10291 = vmatmul.mubr.bf16.gmra.mrb[100].mxu1 %v13396_v13 }
 0x727   : > { %10294 = vmatprep.mubr.bf16.mxu1 %v3702_v56 }
 0x72e   : > { %10295 = vmatmul.mubr.bf16.gmra.mrb[104].mxu1 %v3703_v60  ;;  %v11144_v60 = vld [vmem:[%s14016_s10 + $0x30] sm:$0xff]  }
 0x72f   : > { %4790 = vmatprep.mubr.bf16.mxu1 %v12216_v0 }
 0x7f1   : > { %v10288_v46 = vpop.f32.mrb[96].mxu1 }
 0x7f2   : > { %v4162_v2 = vadd.f32 %v10288_v46, %v9403_v6  ;;  %v4094_v3 = vpop.f32.mrb[97].mxu1  ;;  %v4488_v46 = vld [vmem:[%s14017_s11 + $0x160] sm:$0xff] }
 0x7f3   : > { %v4160_v18 = vadd.f32 %v9403_v6, %v4094_v3  ;;  %v10289_v21 = vpop.f32.mrb[98].mxu1  ;;  %v4482_v3 = vld [vmem:[%s14017_s11 + $0x130] sm:$0xff] }
 0x7f4   : > { %v4163_v42 = vadd.f32 %v10289_v21, %v9403_v6  ;;  %v4097_v43 = vpop.f32.mrb[99].mxu1  ;;  %v4174_v24 = vmax.f32 %v4162_v2, 0.0  ;;  %v4478_v2 = vld [vmem:[%s14017_s11 + $0x110] sm:$0xff] }
 0x7f5   : > { %v4161_v1 = vadd.f32 %v9403_v6, %v4097_v43  ;;  %v4172_v52 = vmax.f32 %v4160_v18, 0.0  ;;  %v9429_v18 = vcombine.high %v4484_v20, %v4488_v46  ;;  %v9424_v21 = vcombine.low %v4478_v2, %v4482_v3 }
 0x7f6   : > { %v4175_v51 = vmax.f32 %v4163_v42, 0.0  ;;  %v9425_v42 = vcombine.high %v4478_v2, %v4482_v3  ;;  %v9428_v43 = vcombine.low %v4484_v20, %v4488_v46  ;;  %v4489_v2 = vld [vmem:[%s14017_s11 + $0x168] sm:$0xff]  ;;  %v4454_v3 = vld [vmem:[%s14017_s11 + $0x50] sm:$0xff] }
 0x7f7   : > { %v4173_v11 = vmax.f32 %v4161_v1, 0.0  ;;  %v4486_v1 = vld [vmem:[%s14017_s11 + $0x150] sm:$0xff] }
 0x7f8   : > { %v4185_v38 = vpack.c.bf16 %v4175_v51, %v4174_v24  ;;  %4758 = vmatprep.subr.bf16.mxu1 %v9425_v42  ;;  %v4490_v24 = vld [vmem:[%s14017_s11 + $0x170] sm:$0xff] }
 0x7f9   : > { %v4184_v39 = vpack.c.bf16 %v4173_v11, %v4172_v52  ;;  %v10292_v7 = vpop.f32.mrb[100].mxu1  ;;  %4759 = vmatpush1.bf16.msra.mxu1 %v9424_v21  ;;  %v9433_v51 = vcombine.high %v4486_v1, %v4490_v24  ;;  %v9432_v52 = vcombine.low %v4486_v1, %v4490_v24  ;;  %v4492_v11 = vld [vmem:[%s14017_s11 + $0x180] sm:$0xff] }
 0x7fa   : > { %v4166_v8 = vadd.f32 %v10292_v7, %v9403_v6  ;;  %v4110_v44 = vpop.f32.mrb[101].mxu1 }
 0x7fb   : > { %v4190_v13 = vmax.bf16 %v4185_v38, %v4184_v39  ;;  %v4164_v26 = vadd.f32 %v9403_v6, %v4110_v44  ;;  %v10293_v63 = vpop.f32.mrb[102].mxu1  ;;  %4760 = vmatprep.subr.bf16.mxu1 %v9433_v51  ;;  %v4496_v38 = vld [vmem:[%s14017_s11 + $0x1a0] sm:$0xff]  ;;  %v4494_v39 = vld [vmem:[%s14017_s11 + $0x190] sm:$0xff]  ;;  %v4493_v51 = vld [vmem:[%s14017_s11 + $0x188] sm:$0xff] }
 0x7fc   : > { %v4167_v27 = vadd.f32 %v10293_v63, %v9403_v6  ;;  %v4113_v61 = vpop.f32.mrb[103].mxu1  ;;  %v4178_v4 = vmax.f32 %v4166_v8, 0.0  ;;  %v9437_v7 = vcombine.high %v4492_v11, %v4496_v38  ;;  %v4498_v8 = vld [vmem:[%s14017_s11 + $0x1b0] sm:$0xff]  ;;  %v9436_v44 = vcombine.low %v4492_v11, %v4496_v38  ;;  %v4504_v63 = vld [vmem:[%s14017_s11 + $0x1e0] sm:$0xff] }
 0x7fd   : > { %v4165_v31 = vadd.f32 %v9403_v6, %v4113_v61  ;;  %10315 = vmatmul.mubr.bf16.vlgmr.msra.gmra.mrb[104].mxu0 %v4190_v13  ;;  %v4176_v36 = vmax.f32 %v4164_v26, 0.0  ;;  %4761 = vmatpush1.bf16.msra.mxu1 %v9432_v52  ;;  %v4500_v26 = vld [vmem:[%s14017_s11 + $0x1c0] sm:$0xff]  ;;  %v4497_v52 = vld [vmem:[%s14017_s11 + $0x1a8] sm:$0xff]  ;;  %v4462_v11 = vld [vmem:[%s14017_s11 + $0x90] sm:$0xff] }
 0x7fe   : > { %v4179_v23 = vmax.f32 %v4167_v27, 0.0  ;;  %10327 = vmatpush3.bf16.msra.mxu0 %v11138_v12  ;;  %10318 = vmatprep.mubr.msk.bf16.mxu0 %vm12218_vm3, %v12217_v10  ;;  %v9440_v12 = vcombine.low %v4494_v39, %v4498_v8  ;;  %v4502_v27 = vld [vmem:[%s14017_s11 + $0x1d0] sm:$0xff]  ;;  %v9445_v61 = vcombine.high %v4500_v26, %v4504_v63 }
 0x7ff   : > { %v4177_v49 = vmax.f32 %v4165_v31, 0.0  ;;  %10328 = vmatprep.subr.bf16.mxu0 %v12217_v10  ;;  %v4506_v31 = vld [vmem:[%s14017_s11 + $0x1f0] sm:$0xff] }
 0x800   : > { %v4187_v50 = vpack.c.bf16 %v4179_v23, %v4178_v4  ;;  %v9444_v4 = vcombine.low %v4500_v26, %v4504_v63  ;;  %v9448_v23 = vcombine.low %v4502_v27, %v4506_v31  ;;  %v4466_v38 = vld [vmem:[%s14017_s11 + $0xb0] sm:$0xff]  ;;  %v4501_v63 = vld [vmem:[%s14017_s11 + $0x1c8] sm:$0xff] }
 0x801   : > { %v4186_v53 = vpack.c.bf16 %v4177_v49, %v4176_v36  ;;  %v10296_v54 = vpop.f32.mrb[104].mxu1  ;;  %v4477_v36 = vld [vmem:[%s14017_s11 + $0x108] sm:$0xff]  ;;  %v9477_v26 = vcombine.high %v4462_v11, %v4466_v38 }
 0x802   : > { %v4170_v55 = vadd.f32 %v10296_v54, %v9403_v6  ;;  %10329 = vmatpush3.bf16.msra.mxu0 %v11139_v35  ;;  %v4126_v56 = vpop.f32.mrb[105].mxu1  ;;  %v9449_v35 = vcombine.high %v4502_v27, %v4506_v31  ;;  %v4481_v49 = vld [vmem:[%s14017_s11 + $0x128] sm:$0xff]  ;;  %v4450_v54 = vld [vmem:[%s14017_s11 + $0x30] sm:$0xff] }
 0x803   : > { %v4168_v58 = vadd.f32 %v9403_v6, %v4126_v56  ;;  %v10297_v59 = vpop.f32.mrb[106].mxu1  ;;  %10330 = vmatprep.subr.bf16.mxu0 %v12217_v10  ;;  %v4191_v5 = vmax.bf16 %v4187_v50, %v4186_v53  ;;  %v4446_v50 = vld [vmem:[%s14017_s11 + $0x10] sm:$0xff]  ;;  %v9423_v53 = vcombine.high %v4477_v36, %v4481_v49 }
 0x804   : > { %v4171_v9 = vadd.f32 %v10297_v59, %v9403_v6  ;;  %v4129_v14 = vpop.f32.mrb[107].mxu1  ;;  %v4182_v33 = vmax.f32 %v4170_v55, 0.0  ;;  %v9422_v55 = vcombine.low %v4477_v36, %v4481_v49  ;;  %v9460_v56 = vcombine.low %v4446_v50, %v4450_v54  ;;  %v4470_v31 = vld [vmem:[%s14017_s11 + $0xd0] sm:$0xff] }
 0x805   : > { %v4169_v17 = vadd.f32 %v9403_v6, %v4129_v14  ;;  %10319 = vmatmul.mubr.bf16.gmra.mrb[108].mxu0 %v4191_v5  ;;  %v4180_v22 = vmax.f32 %v4168_v58, 0.0  ;;  %v9421_v6 = vcombine.high %v4476_v62, %v4480_v19  ;;  %v9438_v36 = vcombine.low %v4493_v51, %v4497_v52 }
 0x806   : > { %v4183_v34 = vmax.f32 %v4171_v9, 0.0  ;;  %10331 = vmatpush3.bf16.msra.mxu0 %v11140_v57  ;;  %10322 = vmatprep.mubr.msk.bf16.mxu0 %vm12218_vm3, %v12217_v10  ;;  %v9461_v57 = vcombine.high %v4446_v50, %v4450_v54  ;;  %v9476_v49 = vcombine.low %v4462_v11, %v4466_v38 }
 0x807   : > { %v4181_v25 = vmax.f32 %v4169_v17, 0.0  ;;  %10332 = vmatprep.subr.bf16.mxu0 %v12217_v10 }
 0x808   : > { %v4189_v47 = vpack.c.bf16 %v4183_v34, %v4182_v33 }
 0x809   : > { %v4188_v16 = vpack.c.bf16 %v4181_v25, %v4180_v22 }
 0x80a   : > { %10333 = vmatpush3.bf16.msra.mxu0 %v11141_v48 }
 0x80b   : > { %10334 = vmatprep.subr.bf16.mxu0 %v12217_v10  ;;  %v4192_v40 = vmax.bf16 %v4189_v47, %v4188_v16 }
 0x80d   : > { %10323 = vmatmul.mubr.bf16.gmra.mrb[112].mxu0 %v4192_v40 }
 0x80e   : > { %10335 = vmatpush3.bf16.msra.mxu0 %v11142_v15  ;;  %10342 = vmatprep.mubr.msk.bf16.mxu0 %vm12218_vm3, %v12217_v10 }
 0x80f   : > { %10336 = vmatprep.subr.bf16.mxu0 %v12217_v10 }
 0x812   : > { %10337 = vmatpush3.bf16.msra.mxu0 %v11143_v41 }
 0x813   : > { %10338 = vmatprep.subr.bf16.mxu0 %v12217_v10 }
 0x816   : > { %10339 = vmatpush3.bf16.msra.mxu0 %v11144_v60 }
 0x817   : > { %10340 = vmatprep.subr.bf16.mxu0 %v12217_v10 }
 0x81a   : > { %10341 = vmatpush3.bf16.msra.mxu0 %v11145_v45 }
 0x81b   : > { %4672 = vmatprep.subr.bf16.mxu0 %v9421_v6  ;;  %v4485_v6 = vld [vmem:[%s14017_s11 + $0x148] sm:$0xff] }
 0x81c   : > { %v9431_v1 = vcombine.high %v4485_v6, %v4489_v2 }
 0x81d   : > { %10343 = vmatmul.mubr.bf16.vlgmr.msra.gmra.mrb[116].mxu0 %v4190_v13  ;;  %v9441_v13 = vcombine.high %v4494_v39, %v4498_v8 }
 0x81e   : > { %10346 = vmatprep.mubr.msk.bf16.mxu0 %vm12218_vm3, %v12217_v10  ;;  %4673 = vmatpush1.bf16.msra.mxu0 %v9420_v37 }
 0x81f   : > { %4674 = vmatprep.subr.bf16.mxu0 %v9429_v18  ;;  %4762 = vmatprep.subr.bf16.mxu1 %v9441_v13  ;;  %v4458_v18 = vld [vmem:[%s14017_s11 + $0x70] sm:$0xff]  ;;  %v9439_v13 = vcombine.high %v4493_v51, %v4497_v52  ;;  %v4448_v51 = vld [vmem:[%s14017_s11 + $0x20] sm:$0xff] }
 0x820   : > { %4763 = vmatpush1.bf16.msra.mxu1 %v9440_v12  ;;  %v9469_v24 = vcombine.high %v4454_v3, %v4458_v18  ;;  %v9468_v8 = vcombine.low %v4454_v3, %v4458_v18  ;;  %v5209_v3 = vld [vmem:[%s14017_s11 + $0x2f0] sm:$0xff] }
 0x821   : > { %4764 = vmatprep.subr.bf16.mxu1 %v9449_v35 }
 0x822   : > { %4675 = vmatpush1.bf16.msra.mxu0 %v9428_v43 }
 0x823   : > { %4676 = vmatprep.subr.bf16.mxu0 %v9437_v7  ;;  %v9430_v7 = vcombine.low %v4485_v6, %v4489_v2  ;;  %v4503_v6 = vld [vmem:[%s14017_s11 + $0x1d8] sm:$0xff]  ;;  %v5205_v2 = vld [vmem:[%s14017_s11 + $0x2d0] sm:$0xff] }
 0x824   : > { %4765 = vmatpush1.bf16.msra.mxu1 %v9448_v23  ;;  %v9520_v11 = vcombine.low %v5205_v2, %v5209_v3 }
 0x825   : > { %10347 = vmatmul.mubr.bf16.gmra.mrb[120].mxu0 %v4191_v5  ;;  %5093 = vmatprep.subr.bf16.mxu1 %v9461_v57  ;;  %v5181_v57 = vld [vmem:[%s14017_s11 + $0x210] sm:$0xff] }
 0x826   : > { %10350 = vmatprep.mubr.msk.bf16.mxu0 %vm12218_vm3, %v12217_v10  ;;  %4677 = vmatpush1.bf16.msra.mxu0 %v9436_v44 }
 0x827   : > { %4678 = vmatprep.subr.bf16.mxu0 %v9445_v61  ;;  %v4505_v61 = vld [vmem:[%s14017_s11 + $0x1e8] sm:$0xff] }
 0x82a   : > { %4679 = vmatpush1.bf16.msra.mxu0 %v9444_v4  ;;  %v4474_v4 = vld [vmem:[%s14017_s11 + $0xf0] sm:$0xff] }
 0x82b   : > { %4715 = vmatprep.subr.bf16.mxu0 %v9423_v53  ;;  %v9447_v53 = vcombine.high %v4501_v63, %v4505_v61  ;;  %v9485_v54 = vcombine.high %v4470_v31, %v4474_v4 }
 0x82d   : > { %10351 = vmatmul.mubr.bf16.gmra.mrb[124].mxu0 %v4192_v40 }
 0x82e   : > { %4704 = vmatprep.mubr.bf16.mxu0 %v12216_v0 }
 0x8d0   : > { %v4291_v58 = vpop.f32.mrb[104].mxu0 }
 0x8d1   : > { %v10316_v59 = vpop.f32.mrb[105].mxu0 }
 0x8d2   : > { %v4294_v5 = vpop.f32.mrb[106].mxu0  ;;  %v9446_v59 = vcombine.low %v4501_v63, %v4505_v61  ;;  %v4472_v61 = vld [vmem:[%s14017_s11 + $0xe0] sm:$0xff] }
 0x8d3   : > { %v10317_v9 = vpop.f32.mrb[107].mxu0 }
 0x8d8   : > { %v4299_v14 = vpop.f32.mrb[108].mxu0 }
 0x8d9   : > { %v10320_v17 = vpop.f32.mrb[109].mxu0 }
 0x8da   : > { %v4302_v33 = vpop.f32.mrb[110].mxu0  ;;  %v4487_v17 = vld [vmem:[%s14017_s11 + $0x158] sm:$0xff] }
 0x8db   : > { %v10321_v34 = vpop.f32.mrb[111].mxu0 }
 0x8dc   : > { %v5189_v34 = vld [vmem:[%s14017_s11 + $0x250] sm:$0xff] }
 0x8e0   : > { %v4307_v48 = vpop.f32.mrb[112].mxu0 }
 0x8e1   : > { %v10324_v22 = vpop.f32.mrb[113].mxu0 }
 0x8e2   : > { %v4310_v25 = vpop.f32.mrb[114].mxu0 }
 0x8e3   : > { %v10325_v47 = vpop.f32.mrb[115].mxu0 }
 0x8f0   : > { %v4412_v16 = vpop.f32.mrb[116].mxu0 }
 0x8f1   : > { %v4435_v15 = vmax.f32 %v4291_v58, %v4412_v16  ;;  %v10344_v40 = vpop.f32.mrb[117].mxu0  ;;  %v5185_v58 = vld [vmem:[%s14017_s11 + $0x230] sm:$0xff] }
 0x8f2   : > { %v4415_v41 = vpop.f32.mrb[118].mxu0  ;;  %v4499_v40 = vld [vmem:[%s14017_s11 + $0x1b8] sm:$0xff] }
 0x8f3   : > { %v4436_v60 = vmax.f32 %v4294_v5, %v4415_v41  ;;  %v10345_v45 = vpop.f32.mrb[119].mxu0  ;;  %v9484_v5 = vcombine.low %v4470_v31, %v4474_v4  ;;  %v5197_v41 = vld [vmem:[%s14017_s11 + $0x290] sm:$0xff]  ;;  %v4445_v4 = vld [vmem:[%s14017_s11 + $0x8] sm:$0xff] }
 0x8f5   : > { %v13518_v62 = vpack.c.bf16 %v4436_v60, %v4435_v15  ;;  %v4495_v15 = vld [vmem:[%s14017_s11 + $0x198] sm:$0xff]  ;;  %v5201_v60 = vld [vmem:[%s14017_s11 + $0x2b0] sm:$0xff] }
 0x8f6   : > { %v9442_v18 = vcombine.low %v4495_v15, %v4499_v40 }
 0x8f8   : > { %v4420_v19 = vpop.f32.mrb[120].mxu0 }
 0x8f9   : > { %v4437_v20 = vmax.f32 %v4299_v14, %v4420_v19  ;;  %v10348_v37 = vpop.f32.mrb[121].mxu0  ;;  %v9497_v14 = vcombine.high %v5181_v57, %v5185_v58 }
 0x8fa   : > { %v4423_v46 = vpop.f32.mrb[122].mxu0  ;;  %v9513_v37 = vcombine.high %v5197_v41, %v5201_v60 }
 0x8fb   : > { %v4438_v21 = vmax.f32 %v4302_v33, %v4423_v46  ;;  %v10349_v42 = vpop.f32.mrb[123].mxu0  ;;  %v4491_v33 = vld [vmem:[%s14017_s11 + $0x178] sm:$0xff] }
 0x8fc   : > { %v9435_v47 = vcombine.high %v4487_v17, %v4491_v33  ;;  %v9434_v45 = vcombine.low %v4487_v17, %v4491_v33  ;;  %v4507_v46 = vld [vmem:[%s14017_s11 + $0x1f8] sm:$0xff] }
 0x8fd   : > { %v13532_v43 = vpack.c.bf16 %v4438_v21, %v4437_v20  ;;  %v9443_v20 = vcombine.high %v4495_v15, %v4499_v40  ;;  %v9512_v21 = vcombine.low %v5197_v41, %v5201_v60  ;;  %v9451_v42 = vcombine.high %v4503_v6, %v4507_v46  ;;  %v4447_v33 = vld [vmem:[%s14017_s11 + $0x18] sm:$0xff] }
 0x8fe   : > { %v9450_v52 = vcombine.low %v4503_v6, %v4507_v46  ;;  %v4463_v40 = vld [vmem:[%s14017_s11 + $0x98] sm:$0xff]  ;;  %v5179_v46 = vld [vmem:[%s14017_s11 + $0x200] sm:$0xff] }
 0x8ff   : > { %9452 = vmatmul.mubr.msk.bf16.vlgmr.msra.gmra.mrb[128].mxu0 %vm4668_vm4, %v13532_v43  ;;  %9454 = vmatmul.mubr.msk.bf16.vlgmr.msra.gmra.mrb[108].mxu1 %vm4668_vm4, %v13532_v43  ;;  %v4467_v41 = vld [vmem:[%s14017_s11 + $0xb8] sm:$0xff] }
 0x900   : > { %4716 = vmatpush1.bf16.msra.mxu0 %v9422_v55  ;;  %5094 = vmatpush1.bf16.msra.mxu1 %v9460_v56  ;;  %v4428_v39 = vpop.f32.mrb[124].mxu0  ;;  %v4479_v55 = vld [vmem:[%s14017_s11 + $0x118] sm:$0xff] }
 0x901   : > { %v4439_v44 = vmax.f32 %v4307_v48, %v4428_v39  ;;  %v10352_v12 = vpop.f32.mrb[125].mxu0  ;;  %4717 = vmatprep.subr.bf16.mxu0 %v9431_v1  ;;  %5095 = vmatprep.subr.bf16.mxu1 %v9469_v24  ;;  %v4483_v56 = vld [vmem:[%s14017_s11 + $0x138] sm:$0xff]  ;;  %v5193_v48 = vld [vmem:[%s14017_s11 + $0x270] sm:$0xff]  ;;  %v9521_v1 = vcombine.high %v5205_v2, %v5209_v3  ;;  %v4444_v24 = vld [vmem:[%s14017_s11] sm:$0xff] }
 0x902   : > { %v4431_v27 = vpop.f32.mrb[126].mxu0  ;;  %4747 = vmatprep.mubr.bf16.mxu0 %v12216_v0  ;;  %5125 = vmatprep.mubr.bf16.mxu1 %v12216_v0  ;;  %v9427_v9 = vcombine.high %v4479_v55, %v4483_v56  ;;  %v9426_v22 = vcombine.low %v4479_v55, %v4483_v56  ;;  %v9505_v16 = vcombine.high %v5189_v34, %v5193_v48  ;;  %v4452_v39 = vld [vmem:[%s14017_s11 + $0x40] sm:$0xff]  ;;  %v4461_v56 = vld [vmem:[%s14017_s11 + $0x88] sm:$0xff] }
 0x903   : > { %v4440_v23 = vmax.f32 %v4310_v25, %v4431_v27  ;;  %v10353_v35 = vpop.f32.mrb[127].mxu0  ;;  %v9496_v25 = vcombine.low %v5181_v57, %v5185_v58  ;;  %v9504_v19 = vcombine.low %v5189_v34, %v5193_v48  ;;  %v9457_v38 = vcombine.high %v4444_v24, %v4448_v51  ;;  %v4460_v12 = vld [vmem:[%s14017_s11 + $0x80] sm:$0xff]  ;;  %v4465_v57 = vld [vmem:[%s14017_s11 + $0xa8] sm:$0xff]  ;;  %v4451_v34 = vld [vmem:[%s14017_s11 + $0x38] sm:$0xff] }
 0x904   : > { %4718 = vmatpush1.bf16.msra.mxu0 %v9430_v7  ;;  %5096 = vmatpush1.bf16.msra.mxu1 %v9468_v8  ;;  %v4456_v7 = vld [vmem:[%s14017_s11 + $0x60] sm:$0xff]  ;;  %v9456_v8 = vcombine.low %v4444_v24, %v4448_v51 }
 0x905   : > { %v13564_v50 = vpack.c.bf16 %v4440_v23, %v4439_v44  ;;  %4719 = vmatprep.subr.bf16.mxu0 %v9439_v13  ;;  %5097 = vmatprep.subr.bf16.mxu1 %v9477_v26  ;;  %v9465_v44 = vcombine.high %v4452_v39, %v4456_v7  ;;  %v4464_v13 = vld [vmem:[%s14017_s11 + $0xa0] sm:$0xff]  ;;  %v9464_v26 = vcombine.low %v4452_v39, %v4456_v7  ;;  %v4449_v23 = vld [vmem:[%s14017_s11 + $0x28] sm:$0xff] }
 0x906   : > { %v9473_v63 = vcombine.high %v4460_v12, %v4464_v13  ;;  %v4468_v27 = vld [vmem:[%s14017_s11 + $0xc0] sm:$0xff]  ;;  %v9472_v31 = vcombine.low %v4460_v12, %v4464_v13  ;;  %v5184_v12 = vld [vmem:[%s14017_s11 + $0x228] sm:$0xff] }
 0x907   : > { %v9480_v35 = vcombine.low %v4468_v27, %v4472_v61  ;;  %v5183_v2 = vld [vmem:[%s14017_s11 + $0x220] sm:$0xff] }
 0x908   : > { %4720 = vmatpush1.bf16.msra.mxu0 %v9438_v36  ;;  %5098 = vmatpush1.bf16.msra.mxu1 %v9476_v49  ;;  %v9459_v36 = vcombine.high %v4445_v4, %v4449_v23  ;;  %v4453_v49 = vld [vmem:[%s14017_s11 + $0x48] sm:$0xff]  ;;  %v5195_v51 = vld [vmem:[%s14017_s11 + $0x280] sm:$0xff] }
 0x909   : > { %4721 = vmatprep.subr.bf16.mxu0 %v9447_v53  ;;  %5099 = vmatprep.subr.bf16.mxu1 %v9485_v54  ;;  %v4457_v53 = vld [vmem:[%s14017_s11 + $0x68] sm:$0xff]  ;;  %v9458_v54 = vcombine.low %v4445_v4, %v4449_v23  ;;  %v5203_v39 = vld [vmem:[%s14017_s11 + $0x2c0] sm:$0xff] }
 0x90a   : > { %v9467_v55 = vcombine.high %v4453_v49, %v4457_v53  ;;  %v9466_v58 = vcombine.low %v4453_v49, %v4457_v53  ;;  %v5207_v7 = vld [vmem:[%s14017_s11 + $0x2e0] sm:$0xff]  ;;  %v5200_v4 = vld [vmem:[%s14017_s11 + $0x2a8] sm:$0xff] }
 0x90b   : > { %v9516_v13 = vcombine.low %v5203_v39, %v5207_v7  ;;  %v5208_v49 = vld [vmem:[%s14017_s11 + $0x2e8] sm:$0xff] }
 0x90c   : > { %4722 = vmatpush1.bf16.msra.mxu0 %v9446_v59  ;;  %5100 = vmatpush1.bf16.msra.mxu1 %v9484_v5  ;;  %v9475_v59 = vcombine.high %v4461_v56, %v4465_v57  ;;  %v4469_v5 = vld [vmem:[%s14017_s11 + $0xc8] sm:$0xff] }
 0x90d   : > { %4801 = vmatprep.subr.bf16.mxu0 %v9427_v9  ;;  %5460 = vmatprep.subr.bf16.mxu1 %v9497_v14  ;;  %v4473_v9 = vld [vmem:[%s14017_s11 + $0xe8] sm:$0xff]  ;;  %v9474_v14 = vcombine.low %v4461_v56, %v4465_v57  ;;  %v5186_v56 = vld [vmem:[%s14017_s11 + $0x238] sm:$0xff] }
 0x90e   : > { %v9483_v17 = vcombine.high %v4469_v5, %v4473_v9  ;;  %v9482_v48 = vcombine.low %v4469_v5, %v4473_v9  ;;  %v5194_v5 = vld [vmem:[%s14017_s11 + $0x278] sm:$0xff] }
 0x90f   : > { %9453 = vmatmul.mubr.msk.bf16.vlgmr.msra.gmra.mrb[132].mxu0 %vm4668_vm4, %v13532_v43  ;;  %9490 = vmatmul.mubr.msk.bf16.vlgmr.msra.gmra.mrb[108].mxu1 %vm4668_vm4, %v13518_v62 }
 0x910   : > { %4802 = vmatpush1.bf16.msra.mxu0 %v9426_v22  ;;  %5461 = vmatpush1.bf16.msra.mxu1 %v9496_v25  ;;  %v9463_v22 = vcombine.high %v4447_v33, %v4451_v34  ;;  %v4455_v25 = vld [vmem:[%s14017_s11 + $0x58] sm:$0xff] }
 0x911   : > { %4803 = vmatprep.subr.bf16.mxu0 %v9435_v47  ;;  %5462 = vmatprep.subr.bf16.mxu1 %v9505_v16  ;;  %v4459_v47 = vld [vmem:[%s14017_s11 + $0x78] sm:$0xff]  ;;  %v9462_v16 = vcombine.low %v4447_v33, %v4451_v34 }
 0x912   : > { %4833 = vmatprep.mubr.bf16.mxu0 %v12216_v0  ;;  %5492 = vmatprep.mubr.bf16.mxu1 %v12216_v0  ;;  %v9471_v15 = vcombine.high %v4455_v25, %v4459_v47  ;;  %v9470_v60 = vcombine.low %v4455_v25, %v4459_v47  ;;  %v5202_v33 = vld [vmem:[%s14017_s11 + $0x2b8] sm:$0xff] }
 0x913   : > { %v5210_v25 = vld [vmem:[%s14017_s11 + $0x2f8] sm:$0xff] }
 0x914   : > { %4804 = vmatpush1.bf16.msra.mxu0 %v9434_v45  ;;  %5463 = vmatpush1.bf16.msra.mxu1 %v9504_v19  ;;  %v9479_v45 = vcombine.high %v4463_v40, %v4467_v41  ;;  %v4471_v19 = vld [vmem:[%s14017_s11 + $0xd8] sm:$0xff] }
 0x915   : > { %4805 = vmatprep.subr.bf16.mxu0 %v9443_v20  ;;  %5464 = vmatprep.subr.bf16.mxu1 %v9513_v37  ;;  %v4475_v20 = vld [vmem:[%s14017_s11 + $0xf8] sm:$0xff]  ;;  %v9478_v37 = vcombine.low %v4463_v40, %v4467_v41 }
 0x916   : > { %v9487_v6 = vcombine.high %v4471_v19, %v4475_v20  ;;  %v9486_v3 = vcombine.low %v4471_v19, %v4475_v20  ;;  %v11146_v40 = vld [vmem:[#allocation16] ss:$16 sps:$4 sm:$0xff]   ;;  %v11148_v41 = vld [vmem:[#allocation16 + $0x4] ss:$16 sps:$4 sm:$0xff]   ;;  %v11157_v20 = vld [vmem:[#allocation16 + $0x2c] ss:$16 sps:$4 sm:$0xff]  }
 0x917   : > { %v11152_v19 = vld [vmem:[#allocation16 + $0x20] ss:$16 sps:$4 sm:$0xff]  }
 0x918   : > { %4806 = vmatpush1.bf16.msra.mxu0 %v9442_v18  ;;  %5465 = vmatpush1.bf16.msra.mxu1 %v9512_v21  ;;  %v9493_v18 = vcombine.high %v5179_v46, %v5183_v2  ;;  %v5187_v21 = vld [vmem:[%s14017_s11 + $0x240] sm:$0xff] }
 0x919   : > { %4807 = vmatprep.subr.bf16.mxu0 %v9451_v42  ;;  %5466 = vmatprep.subr.bf16.mxu1 %v9521_v1  ;;  %v5191_v42 = vld [vmem:[%s14017_s11 + $0x260] sm:$0xff]  ;;  %v9492_v1 = vcombine.low %v5179_v46, %v5183_v2 }
 0x91a   : > { %v9501_v24 = vcombine.high %v5187_v21, %v5191_v42  ;;  %v11158_v46 = vld [vmem:[#allocation16 + $0x40] ss:$16 sps:$4 sm:$0xff]   ;;  %v11163_v2 = vld [vmem:[#allocation16 + $0x4c] ss:$16 sps:$4 sm:$0xff]  }
 0x91c   : > { %4808 = vmatpush1.bf16.msra.mxu0 %v9450_v52  ;;  %5467 = vmatpush1.bf16.msra.mxu1 %v9520_v11  ;;  %v5199_v52 = vld [vmem:[%s14017_s11 + $0x2a0] sm:$0xff]  ;;  %v9500_v11 = vcombine.low %v5187_v21, %v5191_v42 }
 0x91d   : > { %5007 = vmatprep.subr.bf16.mxu0 %v9457_v38  ;;  %v9509_v38 = vcombine.high %v5195_v51, %v5199_v52  ;;  %7202 = vmatprep.subr.bf16.mxu1 %v11148_v41  ;;  %v11164_v21 = vld [vmem:[#allocation16 + $0x60] ss:$16 sps:$4 sm:$0xff]   ;;  %v11169_v42 = vld [vmem:[#allocation16 + $0x6c] ss:$16 sps:$4 sm:$0xff]   ;;  %v11238_v41 = vld [vmem:[#allocation16 + $0x1e4] ss:$16 sps:$4 sm:$0xff]  }
 0x91f   : > { %9455 = vmatmul.mubr.msk.bf16.vlgmr.msra.gmra.mrb[136].mxu0 %vm4668_vm4, %v13532_v43  ;;  %9526 = vmatmul.mubr.msk.bf16.vlgmr.msra.gmra.mrb[108].mxu1 %vm4668_vm4, %v13564_v50  ;;  %v9481_v43 = vcombine.high %v4468_v27, %v4472_v61  ;;  %v5192_v27 = vld [vmem:[%s14017_s11 + $0x268] sm:$0xff] }
 0x920   : > { %5008 = vmatpush1.bf16.msra.mxu0 %v9456_v8  ;;  %5039 = vmatprep.mubr.bf16.mxu0 %v12216_v0  ;;  %v9508_v8 = vcombine.low %v5195_v51, %v5199_v52  ;;  %v11175_v51 = vld [vmem:[#allocation16 + $0x8c] ss:$16 sps:$4 sm:$0xff]   ;;  %v11178_v52 = vld [vmem:[#allocation16 + $0xa4] ss:$16 sps:$4 sm:$0xff]  }
 0x921   : > { %5009 = vmatprep.subr.bf16.mxu0 %v9465_v44  ;;  %v9517_v44 = vcombine.high %v5203_v39, %v5207_v7  ;;  %7203 = vmatpush1.bf16.msra.mxu1 %v11146_v40  ;;  %v11181_v39 = vld [vmem:[#allocation16 + $0xac] ss:$16 sps:$4 sm:$0xff]   ;;  %v11184_v7 = vld [vmem:[#allocation16 + $0xc4] ss:$16 sps:$4 sm:$0xff]   ;;  %v11233_v40 = vld [vmem:[#allocation16 + $0x1c8] ss:$16 sps:$4 sm:$0xff]  }
 0x924   : > { %5010 = vmatpush1.bf16.msra.mxu0 %v9464_v26 }
 0x925   : > { %5011 = vmatprep.subr.bf16.mxu0 %v9473_v63  ;;  %v5188_v63 = vld [vmem:[%s14017_s11 + $0x248] sm:$0xff] }
 0x926   : > { %v9502_v23 = vcombine.low %v5188_v63, %v5192_v27 }
 0x928   : > { %5012 = vmatpush1.bf16.msra.mxu0 %v9472_v31  ;;  %v9503_v31 = vcombine.high %v5188_v63, %v5192_v27  ;;  %v11193_v63 = vld [vmem:[#allocation16 + $0xec] ss:$16 sps:$4 sm:$0xff]   ;;  %v11196_v27 = vld [vmem:[#allocation16 + $0x104] ss:$16 sps:$4 sm:$0xff]  }
 0x929   : > { %5013 = vmatprep.subr.bf16.mxu0 %v9481_v43  ;;  %v5196_v43 = vld [vmem:[%s14017_s11 + $0x288] sm:$0xff] }
 0x92a   : > { %v9510_v53 = vcombine.low %v5196_v43, %v5200_v4 }
 0x92c   : > { %5014 = vmatpush1.bf16.msra.mxu0 %v9480_v35  ;;  %v9511_v35 = vcombine.high %v5196_v43, %v5200_v4  ;;  %v11199_v43 = vld [vmem:[#allocation16 + $0x10c] ss:$16 sps:$4 sm:$0xff]   ;;  %v11202_v4 = vld [vmem:[#allocation16 + $0x124] ss:$16 sps:$4 sm:$0xff]  }
 0x92d   : > { %5050 = vmatprep.subr.bf16.mxu0 %v9459_v36  ;;  %v5204_v36 = vld [vmem:[%s14017_s11 + $0x2c8] sm:$0xff] }
 0x92e   : > { %v9518_v57 = vcombine.low %v5204_v36, %v5208_v49 }
 0x92f   : > { %9488 = vmatmul.mubr.msk.bf16.vlgmr.msra.gmra.mrb[128].mxu0 %vm4668_vm4, %v13518_v62 }
 0x930   : > { %5051 = vmatpush1.bf16.msra.mxu0 %v9458_v54  ;;  %5082 = vmatprep.mubr.bf16.mxu0 %v12216_v0  ;;  %v9519_v54 = vcombine.high %v5204_v36, %v5208_v49  ;;  %v11205_v36 = vld [vmem:[#allocation16 + $0x12c] ss:$16 sps:$4 sm:$0xff]   ;;  %v11208_v49 = vld [vmem:[#allocation16 + $0x144] ss:$16 sps:$4 sm:$0xff]  }
 0x931   : > { %5052 = vmatprep.subr.bf16.mxu0 %v9467_v55  ;;  %v5182_v55 = vld [vmem:[%s14017_s11 + $0x218] sm:$0xff] }
 0x932   : > { %v9498_v9 = vcombine.low %v5182_v55, %v5186_v56 }
 0x934   : > { %5053 = vmatpush1.bf16.msra.mxu0 %v9466_v58  ;;  %v9499_v58 = vcombine.high %v5182_v55, %v5186_v56  ;;  %v11211_v55 = vld [vmem:[#allocation16 + $0x14c] ss:$16 sps:$4 sm:$0xff]   ;;  %v11214_v56 = vld [vmem:[#allocation16 + $0x164] ss:$16 sps:$4 sm:$0xff]  }
 0x935   : > { %5054 = vmatprep.subr.bf16.mxu0 %v9475_v59  ;;  %v5190_v59 = vld [vmem:[%s14017_s11 + $0x258] sm:$0xff] }
 0x936   : > { %v9506_v34 = vcombine.low %v5190_v59, %v5194_v5 }
 0x938   : > { %5055 = vmatpush1.bf16.msra.mxu0 %v9474_v14  ;;  %v9507_v14 = vcombine.high %v5190_v59, %v5194_v5  ;;  %v11217_v59 = vld [vmem:[#allocation16 + $0x16c] ss:$16 sps:$4 sm:$0xff]   ;;  %v11220_v5 = vld [vmem:[#allocation16 + $0x184] ss:$16 sps:$4 sm:$0xff]  }
 0x939   : > { %5056 = vmatprep.subr.bf16.mxu0 %v9483_v17  ;;  %v5198_v17 = vld [vmem:[%s14017_s11 + $0x298] sm:$0xff] }
 0x93a   : > { %v9514_v47 = vcombine.low %v5198_v17, %v5202_v33 }
 0x93c   : > { %5057 = vmatpush1.bf16.msra.mxu0 %v9482_v48  ;;  %v9515_v48 = vcombine.high %v5198_v17, %v5202_v33  ;;  %v11223_v17 = vld [vmem:[#allocation16 + $0x18c] ss:$16 sps:$4 sm:$0xff]   ;;  %v11226_v33 = vld [vmem:[#allocation16 + $0x1a4] ss:$16 sps:$4 sm:$0xff]  }
 0x93d   : > { %5136 = vmatprep.subr.bf16.mxu0 %v9463_v22  ;;  %v5206_v22 = vld [vmem:[%s14017_s11 + $0x2d8] sm:$0xff] }
 0x93f   : > { %9489 = vmatmul.mubr.msk.bf16.vlgmr.msra.gmra.mrb[132].mxu0 %vm4668_vm4, %v13518_v62 }
 0x940   : > { %5137 = vmatpush1.bf16.msra.mxu0 %v9462_v16  ;;  %5168 = vmatprep.mubr.bf16.mxu0 %v12216_v0  ;;  %v9523_v16 = vcombine.high %v5206_v22, %v5210_v25 }
 0x941   : > { %5138 = vmatprep.subr.bf16.mxu0 %v9471_v15  ;;  %v9522_v15 = vcombine.low %v5206_v22, %v5210_v25  ;;  %v11229_v22 = vld [vmem:[#allocation16 + $0x1ac] ss:$16 sps:$4 sm:$0xff]   ;;  %v11227_v25 = vld [vmem:[#allocation16 + $0x1a8] ss:$16 sps:$4 sm:$0xff]  }
 0x944   : > { %5139 = vmatpush1.bf16.msra.mxu0 %v9470_v60  ;;  %v11154_v60 = vld [vmem:[#allocation16 + $0x24] ss:$16 sps:$4 sm:$0xff]  }
 0x945   : > { %5140 = vmatprep.subr.bf16.mxu0 %v9479_v45  ;;  %v11149_v45 = vld [vmem:[#allocation16 + $0x8] ss:$16 sps:$4 sm:$0xff]   ;;  %7204 = vmatprep.subr.bf16.mxu1 %v11154_v60  ;;  %v11236_v60 = vld [vmem:[#allocation16 + $0x1e0] ss:$16 sps:$4 sm:$0xff]  }
 0x946   : > { %7205 = vmatpush1.bf16.msra.mxu1 %v11152_v19  ;;  %v11244_v19 = vld [vmem:[#allocation16 + $0x204] ss:$16 sps:$4 sm:$0xff]  }
 0x948   : > { %5141 = vmatpush1.bf16.msra.mxu0 %v9478_v37  ;;  %v11160_v37 = vld [vmem:[#allocation16 + $0x44] ss:$16 sps:$4 sm:$0xff]  }
 0x949   : > { %5142 = vmatprep.subr.bf16.mxu0 %v9487_v6  ;;  %v11155_v6 = vld [vmem:[#allocation16 + $0x28] ss:$16 sps:$4 sm:$0xff]   ;;  %7206 = vmatprep.subr.bf16.mxu1 %v11160_v37  ;;  %v5582_v37 = vsub.s32 4, %v12981_v29 }
 0x94a   : > { %7207 = vmatpush1.bf16.msra.mxu1 %v11158_v46  ;;  %v5586_v46 = vsub.s32 5, %v12981_v29 }
 0x94c   : > { %5143 = vmatpush1.bf16.msra.mxu0 %v9486_v3  ;;  %v11166_v3 = vld [vmem:[#allocation16 + $0x64] ss:$16 sps:$4 sm:$0xff]  }
 0x94d   : > { %5374 = vmatprep.subr.bf16.mxu0 %v9493_v18  ;;  %v11161_v18 = vld [vmem:[#allocation16 + $0x48] ss:$16 sps:$4 sm:$0xff]   ;;  %7208 = vmatprep.subr.bf16.mxu1 %v11166_v3 }
 0x94e   : > { %7209 = vmatpush1.bf16.msra.mxu1 %v11164_v21 }
 0x94f   : > { %9491 = vmatmul.mubr.msk.bf16.vlgmr.msra.gmra.mrb[136].mxu0 %vm4668_vm4, %v13518_v62  ;;  %v5180_v62 = vld [vmem:[%s14017_s11 + $0x208] sm:$0xff] }
 0x950   : > { %5375 = vmatpush1.bf16.msra.mxu0 %v9492_v1  ;;  %5406 = vmatprep.mubr.bf16.mxu0 %v12216_v0  ;;  %v9495_v26 = vcombine.high %v5180_v62, %v5184_v12  ;;  %v9494_v61 = vcombine.low %v5180_v62, %v5184_v12  ;;  %v11172_v1 = vld [vmem:[#allocation16 + $0x84] ss:$16 sps:$4 sm:$0xff]   ;;  %v11187_v62 = vld [vmem:[#allocation16 + $0xcc] ss:$16 sps:$4 sm:$0xff]  }
 0x951   : > { %5376 = vmatprep.subr.bf16.mxu0 %v9501_v24  ;;  %v11167_v24 = vld [vmem:[#allocation16 + $0x68] ss:$16 sps:$4 sm:$0xff]   ;;  %7210 = vmatprep.subr.bf16.mxu1 %v11172_v1  ;;  %v11190_v12 = vld [vmem:[#allocation16 + $0xe4] ss:$16 sps:$4 sm:$0xff]  }
 0x954   : > { %5377 = vmatpush1.bf16.msra.mxu0 %v9500_v11  ;;  %v11173_v11 = vld [vmem:[#allocation16 + $0x88] ss:$16 sps:$4 sm:$0xff]  }
 0x955   : > { %5378 = vmatprep.subr.bf16.mxu0 %v9509_v38  ;;  %v11176_v38 = vld [vmem:[#allocation16 + $0xa0] ss:$16 sps:$4 sm:$0xff]  }
 0x958   : > { %5379 = vmatpush1.bf16.msra.mxu0 %v9508_v8  ;;  %v11179_v8 = vld [vmem:[#allocation16 + $0xa8] ss:$16 sps:$4 sm:$0xff]  }
 0x959   : > { %5380 = vmatprep.subr.bf16.mxu0 %v9517_v44  ;;  %v11182_v44 = vld [vmem:[#allocation16 + $0xc0] ss:$16 sps:$4 sm:$0xff]  }
 0x95c   : > { %5381 = vmatpush1.bf16.msra.mxu0 %v9516_v13  ;;  %v11185_v13 = vld [vmem:[#allocation16 + $0xc8] ss:$16 sps:$4 sm:$0xff]  }
 0x95d   : > { %5417 = vmatprep.subr.bf16.mxu0 %v9495_v26  ;;  %v11188_v26 = vld [vmem:[#allocation16 + $0xe0] ss:$16 sps:$4 sm:$0xff]  }
 0x95f   : > { %9524 = vmatmul.mubr.msk.bf16.vlgmr.msra.gmra.mrb[128].mxu0 %vm4668_vm4, %v13564_v50 }
 0x960   : > { %5418 = vmatpush1.bf16.msra.mxu0 %v9494_v61  ;;  %5449 = vmatprep.mubr.bf16.mxu0 %v12216_v0  ;;  %v11191_v61 = vld [vmem:[#allocation16 + $0xe8] ss:$16 sps:$4 sm:$0xff]  }
 0x961   : > { %5419 = vmatprep.subr.bf16.mxu0 %v9503_v31  ;;  %v11194_v31 = vld [vmem:[#allocation16 + $0x100] ss:$16 sps:$4 sm:$0xff]  }
 0x964   : > { %5420 = vmatpush1.bf16.msra.mxu0 %v9502_v23  ;;  %v11197_v23 = vld [vmem:[#allocation16 + $0x108] ss:$16 sps:$4 sm:$0xff]  }
 0x965   : > { %5421 = vmatprep.subr.bf16.mxu0 %v9511_v35  ;;  %v11200_v35 = vld [vmem:[#allocation16 + $0x120] ss:$16 sps:$4 sm:$0xff]  }
 0x968   : > { %5422 = vmatpush1.bf16.msra.mxu0 %v9510_v53  ;;  %v11203_v53 = vld [vmem:[#allocation16 + $0x128] ss:$16 sps:$4 sm:$0xff]  }
 0x969   : > { %5423 = vmatprep.subr.bf16.mxu0 %v9519_v54  ;;  %v11206_v54 = vld [vmem:[#allocation16 + $0x140] ss:$16 sps:$4 sm:$0xff]  }
 0x96c   : > { %5424 = vmatpush1.bf16.msra.mxu0 %v9518_v57  ;;  %v11209_v57 = vld [vmem:[#allocation16 + $0x148] ss:$16 sps:$4 sm:$0xff]  }
 0x96d   : > { %5503 = vmatprep.subr.bf16.mxu0 %v9499_v58  ;;  %v11212_v58 = vld [vmem:[#allocation16 + $0x160] ss:$16 sps:$4 sm:$0xff]  }
 0x96f   : > { %9525 = vmatmul.mubr.msk.bf16.vlgmr.msra.gmra.mrb[132].mxu0 %vm4668_vm4, %v13564_v50 }
 0x970   : > { %5504 = vmatpush1.bf16.msra.mxu0 %v9498_v9  ;;  %5535 = vmatprep.mubr.bf16.mxu0 %v12216_v0  ;;  %v11151_v0 = vld [vmem:[#allocation16 + $0xc] ss:$16 sps:$4 sm:$0xff]   ;;  %v11215_v9 = vld [vmem:[#allocation16 + $0x168] ss:$16 sps:$4 sm:$0xff]  }
 0x971   : > { %5505 = vmatprep.subr.bf16.mxu0 %v9507_v14  ;;  %v11218_v14 = vld [vmem:[#allocation16 + $0x180] ss:$16 sps:$4 sm:$0xff]  }
 0x974   : > { %5506 = vmatpush1.bf16.msra.mxu0 %v9506_v34  ;;  %v11221_v34 = vld [vmem:[#allocation16 + $0x188] ss:$16 sps:$4 sm:$0xff]  }
 0x975   : > { %5507 = vmatprep.subr.bf16.mxu0 %v9515_v48  ;;  %v11224_v48 = vld [vmem:[#allocation16 + $0x1a0] ss:$16 sps:$4 sm:$0xff]  }
 0x978   : > { %5508 = vmatpush1.bf16.msra.mxu0 %v9514_v47  ;;  %v11232_v47 = vld [vmem:[#allocation16 + $0x1c4] ss:$16 sps:$4 sm:$0xff]  }
 0x979   : > { %5509 = vmatprep.subr.bf16.mxu0 %v9523_v16  ;;  %v11235_v16 = vld [vmem:[#allocation16 + $0x1cc] ss:$16 sps:$4 sm:$0xff]  }
 0x97c   : > { %5510 = vmatpush1.bf16.msra.mxu0 %v9522_v15  ;;  %v11230_v15 = vld [vmem:[#allocation16 + $0x1c0] ss:$16 sps:$4 sm:$0xff]  }
 0x97d   : > { %7374 = vmatprep.subr.bf16.mxu0 %v11151_v0  ;;  %v11241_v0 = vld [vmem:[#allocation16 + $0x1ec] ss:$16 sps:$4 sm:$0xff]  }
 0x97f   : > { %9527 = vmatmul.mubr.msk.bf16.vlgmr.msra.gmra.mrb[136].mxu0 %vm4668_vm4, %v13564_v50  ;;  %v11170_v50 = vld [vmem:[#allocation16 + $0x80] ss:$16 sps:$4 sm:$0xff]  }
 0x980   : > { %7375 = vmatpush1.bf16.msra.mxu0 %v11149_v45  ;;  %7211 = vmatpush1.bf16.msra.mxu1 %v11170_v50  ;;  %v11239_v45 = vld [vmem:[#allocation16 + $0x1e8] ss:$16 sps:$4 sm:$0xff]  }
 0x981   : > { %7376 = vmatprep.subr.bf16.mxu0 %v11157_v20  ;;  %7212 = vmatprep.subr.bf16.mxu1 %v11178_v52  ;;  %v11247_v20 = vld [vmem:[#allocation16 + $0x20c] ss:$16 sps:$4 sm:$0xff]  }
 0x984   : > { %7377 = vmatpush1.bf16.msra.mxu0 %v11155_v6  ;;  %7213 = vmatpush1.bf16.msra.mxu1 %v11176_v38  ;;  %v13790_v6 = vld [vmem:[%s14018_s12] sm:$0xff] }
 0x985   : > { %7378 = vmatprep.subr.bf16.mxu0 %v11163_v2  ;;  %7214 = vmatprep.subr.bf16.mxu1 %v11184_v7  ;;  %v5583_v2 = vrot.slane %v13790_v6, %v5582_v37  ;;  %v5587_v3 = vrot.slane %v13790_v6, %v5586_v46  ;;  %v11260_v37 = vld [vmem:[#allocation16 + $0x260] ss:$16 sps:$4 sm:$0xff]   ;;  %v11263_v46 = vld [vmem:[#allocation16 + $0x268] ss:$16 sps:$4 sm:$0xff]  }
 0x988   : > { %7379 = vmatpush1.bf16.msra.mxu0 %v11161_v18  ;;  %7215 = vmatpush1.bf16.msra.mxu1 %v11182_v44 }
 0x989   : > { %7380 = vmatprep.subr.bf16.mxu0 %v11169_v42  ;;  %7216 = vmatprep.subr.bf16.mxu1 %v11190_v12  ;;  %v5571_v12 = vrot.slane %v13790_v6, %v12987_v32 }
 0x98c   : > { %7381 = vmatpush1.bf16.msra.mxu0 %v11167_v24  ;;  %7217 = vmatpush1.bf16.msra.mxu1 %v11188_v26 }
 0x98d   : > { %7382 = vmatprep.subr.bf16.mxu0 %v11175_v51  ;;  %7218 = vmatprep.subr.bf16.mxu1 %v11196_v27 }
 0x990   : > { %7383 = vmatpush1.bf16.msra.mxu0 %v11173_v11  ;;  %7219 = vmatpush1.bf16.msra.mxu1 %v11194_v31 }
 0x991   : > { %7384 = vmatprep.subr.bf16.mxu0 %v11181_v39  ;;  %7220 = vmatprep.subr.bf16.mxu1 %v11202_v4 }
 0x994   : > { %7385 = vmatpush1.bf16.msra.mxu0 %v11179_v8  ;;  %7221 = vmatpush1.bf16.msra.mxu1 %v11200_v35 }
 0x995   : > { %7386 = vmatprep.subr.bf16.mxu0 %v11187_v62  ;;  %7222 = vmatprep.subr.bf16.mxu1 %v11208_v49  ;;  %v5567_v62 = vrot.slane %v13790_v6, %v12984_v30 }
 0x998   : > { %7387 = vmatpush1.bf16.msra.mxu0 %v11185_v13  ;;  %7223 = vmatpush1.bf16.msra.mxu1 %v11206_v54 }
 0x999   : > { %7388 = vmatprep.subr.bf16.mxu0 %v11193_v63  ;;  %7224 = vmatprep.subr.bf16.mxu1 %v11214_v56  ;;  %v11245_v56 = vld [vmem:[#allocation16 + $0x208] ss:$16 sps:$4 sm:$0xff]  }
 0x99c   : > { %7389 = vmatpush1.bf16.msra.mxu0 %v11191_v61  ;;  %7225 = vmatpush1.bf16.msra.mxu1 %v11212_v58  ;;  %v11253_v58 = vld [vmem:[#allocation16 + $0x22c] ss:$16 sps:$4 sm:$0xff]  }
 0x99d   : > { %7390 = vmatprep.subr.bf16.mxu0 %v11199_v43  ;;  %7226 = vmatprep.subr.bf16.mxu1 %v11220_v5  ;;  %v5578_v5 = vsub.s32 3, %v12981_v29 }
 0x9a0   : > { %7391 = vmatpush1.bf16.msra.mxu0 %v11197_v23  ;;  %7227 = vmatpush1.bf16.msra.mxu1 %v11218_v14  ;;  %v11251_v14 = vld [vmem:[#allocation16 + $0x228] ss:$16 sps:$4 sm:$0xff]  }
 0x9a1   : > { %7392 = vmatprep.subr.bf16.mxu0 %v11205_v36  ;;  %7228 = vmatprep.subr.bf16.mxu1 %v11226_v33  ;;  %v11256_v33 = vld [vmem:[#allocation16 + $0x244] ss:$16 sps:$4 sm:$0xff]  }
 0x9a4   : > { %7393 = vmatpush1.bf16.msra.mxu0 %v11203_v53  ;;  %7229 = vmatpush1.bf16.msra.mxu1 %v11224_v48  ;;  %v5579_v48 = vrot.slane %v13790_v6, %v5578_v5 }
 0x9a5   : > { %7394 = vmatprep.subr.bf16.mxu0 %v11211_v55  ;;  %7230 = vmatprep.subr.bf16.mxu1 %v11232_v47  ;;  %v11242_v55 = vld [vmem:[#allocation16 + $0x200] ss:$16 sps:$4 sm:$0xff]   ;;  %v11257_v47 = vld [vmem:[#allocation16 + $0x248] ss:$16 sps:$4 sm:$0xff]  }
 0x9a8   : > { %7395 = vmatpush1.bf16.msra.mxu0 %v11209_v57  ;;  %7231 = vmatpush1.bf16.msra.mxu1 %v11230_v15  ;;  %v11250_v57 = vld [vmem:[#allocation16 + $0x224] ss:$16 sps:$4 sm:$0xff]  }
 0x9a9   : > { %7396 = vmatprep.subr.bf16.mxu0 %v11217_v59  ;;  %7232 = vmatprep.subr.bf16.mxu1 %v11238_v41  ;;  %v13804_v59 = vsub.s32 2, %v12981_v29  ;;  %v11265_v41 = vld [vmem:[#allocation16 + $0x26c] ss:$16 sps:$4 sm:$0xff]  }
 0x9ac   : > { %7397 = vmatpush1.bf16.msra.mxu0 %v11215_v9  ;;  %7233 = vmatpush1.bf16.msra.mxu1 %v11236_v60  ;;  %v11248_v9 = vld [vmem:[#allocation16 + $0x220] ss:$16 sps:$4 sm:$0xff]  }
 0x9ad   : > { %7398 = vmatprep.subr.bf16.mxu0 %v11223_v17  ;;  %7245 = vmatprep.subr.bf16.mxu1 %v11244_v19  ;;  %v5575_v17 = vrot.slane %v13790_v6, %v13804_v59 }
 0x9b0   : > { %7399 = vmatpush1.bf16.msra.mxu0 %v11221_v34  ;;  %v11259_v34 = vld [vmem:[#allocation16 + $0x24c] ss:$16 sps:$4 sm:$0xff]  }
 0x9b1   : > { %7400 = vmatprep.subr.bf16.mxu0 %v11229_v22 }
 0x9b4   : > { %7401 = vmatpush1.bf16.msra.mxu0 %v11227_v25  ;;  %v11254_v25 = vld [vmem:[#allocation16 + $0x240] ss:$16 sps:$4 sm:$0xff]  }
 0x9b5   : > { %7402 = vmatprep.subr.bf16.mxu0 %v11235_v16 }
 0x9b8   : > { %7403 = vmatpush1.bf16.msra.mxu0 %v11233_v40  ;;  %v11262_v40 = vld [vmem:[#allocation16 + $0x264] ss:$16 sps:$4 sm:$0xff]  }
 0x9b9   : > { %7404 = vmatprep.subr.bf16.mxu0 %v11241_v0 }
 0x9bc   : > { %7405 = vmatpush1.bf16.msra.mxu0 %v11239_v45 }
 0x9bd   : > { %7417 = vmatprep.subr.bf16.mxu0 %v11247_v20 }
 0x9f2   : > { %v5494_v18 = vpop.f32.mrb[108].mxu1 }
 0x9f3   : > { %v5608_v21 = vadd.f32 %v5583_v2, %v5494_v18  ;;  %v5496_v42 = vpop.f32.mrb[109].mxu1  ;;  %v11268_v18 = vld [vmem:[#allocation16 + $0x284] ss:$16 sps:$4 sm:$0xff]  }
 0x9f4   : > { %v5609_v1 = vadd.f32 %v5587_v3, %v5496_v42  ;;  %v5498_v24 = vpop.f32.mrb[110].mxu1 }
 0x9f5   : > { %v5616_v50 = vadd.f32 %v5583_v2, %v5498_v24  ;;  %v5500_v51 = vpop.f32.mrb[111].mxu1  ;;  %v5624_v11 = vmax.f32 %v5608_v21, 0.0  ;;  %v11271_v21 = vld [vmem:[#allocation16 + $0x28c] ss:$16 sps:$4 sm:$0xff]  }
 0x9f6   : > { %v5617_v52 = vadd.f32 %v5587_v3, %v5500_v51  ;;  %v5625_v39 = vmax.f32 %v5609_v1, 0.0  ;;  %v11266_v51 = vld [vmem:[#allocation16 + $0x280] ss:$16 sps:$4 sm:$0xff]  }
 0x9f7   : > { %v5632_v38 = vmax.f32 %v5616_v50, 0.0 }
 0x9f8   : > { %v5633_v7 = vmax.f32 %v5617_v52, 0.0  ;;  %v11269_v52 = vld [vmem:[#allocation16 + $0x288] ss:$16 sps:$4 sm:$0xff]  }
 0x9f9   : > { %v13795_v8 = vpack.c.bf16 %v5632_v38, %v5624_v11  ;;  %v11274_v11 = vld [vmem:[#allocation16 + $0x2a4] ss:$16 sps:$4 sm:$0xff]   ;;  %v11277_v38 = vld [vmem:[#allocation16 + $0x2ac] ss:$16 sps:$4 sm:$0xff]  }
 0x9fa   : > { %v13797_v44 = vpack.c.bf16 %v5633_v7, %v5625_v39  ;;  %v5590_v39 = vsub.s32 6, %v12981_v29  ;;  %v5594_v7 = vsub.s32 7, %v12981_v29 }
 0xa32   : > { %v5408_v13 = vpop.f32.mrb[128].mxu0 }
 0xa33   : > { %v5604_v26 = vadd.f32 %v5567_v62, %v5408_v13  ;;  %v5410_v63 = vpop.f32.mrb[129].mxu0  ;;  %v5591_v13 = vrot.slane %v13790_v6, %v5590_v39  ;;  %v11326_v39 = vld [vmem:[#allocation16 + $0x3c0] ss:$16 sps:$4 sm:$0xff]  }
 0xa34   : > { %v5605_v27 = vadd.f32 %v5571_v12, %v5410_v63  ;;  %v5412_v61 = vpop.f32.mrb[130].mxu0  ;;  %v11283_v63 = vld [vmem:[#allocation16 + $0x2cc] ss:$16 sps:$4 sm:$0xff]  }
 0xa35   : > { %v5612_v31 = vadd.f32 %v5567_v62, %v5412_v61  ;;  %v5414_v43 = vpop.f32.mrb[131].mxu0  ;;  %v5620_v23 = vmax.f32 %v5604_v26, 0.0  ;;  %v11272_v62 = vld [vmem:[#allocation16 + $0x2a0] ss:$16 sps:$4 sm:$0xff]   ;;  %v11280_v26 = vld [vmem:[#allocation16 + $0x2c4] ss:$16 sps:$4 sm:$0xff]  }
 0xa36   : > { %v5613_v4 = vadd.f32 %v5571_v12, %v5414_v43  ;;  %v5621_v36 = vmax.f32 %v5605_v27, 0.0  ;;  %v11275_v12 = vld [vmem:[#allocation16 + $0x2a8] ss:$16 sps:$4 sm:$0xff]   ;;  %v5595_v27 = vrot.slane %v13790_v6, %v5594_v7 }
 0xa37   : > { %v5628_v35 = vmax.f32 %v5612_v31, 0.0  ;;  %v11278_v31 = vld [vmem:[#allocation16 + $0x2c0] ss:$16 sps:$4 sm:$0xff]   ;;  %v11281_v43 = vld [vmem:[#allocation16 + $0x2c8] ss:$16 sps:$4 sm:$0xff]  }
 0xa38   : > { %v5629_v49 = vmax.f32 %v5613_v4, 0.0  ;;  %v11287_v6 = vld [vmem:[#allocation16 + $0x2e8] ss:$16 sps:$4 sm:$0xff]  }
 0xa39   : > { %v5636_v53 = vpack.c.bf16 %v5628_v35, %v5620_v23  ;;  %v11286_v35 = vld [vmem:[#allocation16 + $0x2e4] ss:$16 sps:$4 sm:$0xff]   ;;  %v11329_v7 = vld [vmem:[#allocation16 + $0x3c8] ss:$16 sps:$4 sm:$0xff]  }
 0xa3a   : > { %v5637_v54 = vpack.c.bf16 %v5629_v49, %v5621_v36  ;;  %v11289_v36 = vld [vmem:[#allocation16 + $0x2ec] ss:$16 sps:$4 sm:$0xff]  }
 0xa3c   : > { %7234 = vmatprep.mubr.bf16.mxu1 %v5637_v54  ;;  %7406 = vmatprep.mubr.bf16.mxu0 %v5637_v54 }
 0xa3d   : > { %7235 = vmatmul.mubr.bf16.vlgmr.msra.gmra.mrb[112].mxu1 %v5636_v53  ;;  %7407 = vmatmul.mubr.bf16.vlgmr.msra.gmra.mrb[140].mxu0 %v5636_v53 }
 0xa3e   : > { %7246 = vmatpush1.bf16.msra.mxu1 %v11242_v55  ;;  %7418 = vmatpush1.bf16.msra.mxu0 %v11245_v56 }
 0xa3f   : > { %7247 = vmatprep.subr.bf16.mxu1 %v11250_v57  ;;  %7419 = vmatprep.subr.bf16.mxu0 %v11253_v58  ;;  %v11284_v57 = vld [vmem:[#allocation16 + $0x2e0] ss:$16 sps:$4 sm:$0xff]  }
 0xa42   : > { %7248 = vmatpush1.bf16.msra.mxu1 %v11248_v9  ;;  %7420 = vmatpush1.bf16.msra.mxu0 %v11251_v14  ;;  %v5451_v22 = vpop.f32.mrb[132].mxu0  ;;  %v11292_v14 = vld [vmem:[#allocation16 + $0x304] ss:$16 sps:$4 sm:$0xff]  }
 0xa43   : > { %v5606_v16 = vadd.f32 %v5575_v17, %v5451_v22  ;;  %v5453_v15 = vpop.f32.mrb[133].mxu0  ;;  %7249 = vmatprep.subr.bf16.mxu1 %v11256_v33  ;;  %7421 = vmatprep.subr.bf16.mxu0 %v11259_v34 }
 0xa44   : > { %v5607_v0 = vadd.f32 %v5579_v48, %v5453_v15  ;;  %v5455_v60 = vpop.f32.mrb[134].mxu0  ;;  %v11301_v15 = vld [vmem:[#allocation16 + $0x32c] ss:$16 sps:$4 sm:$0xff]  }
 0xa45   : > { %v5614_v45 = vadd.f32 %v5575_v17, %v5455_v60  ;;  %v5457_v19 = vpop.f32.mrb[135].mxu0  ;;  %v5622_v2 = vmax.f32 %v5606_v16, 0.0  ;;  %v11295_v17 = vld [vmem:[#allocation16 + $0x30c] ss:$16 sps:$4 sm:$0xff]   ;;  %v11298_v16 = vld [vmem:[#allocation16 + $0x324] ss:$16 sps:$4 sm:$0xff]  }
 0xa46   : > { %v5615_v20 = vadd.f32 %v5579_v48, %v5457_v19  ;;  %7250 = vmatpush1.bf16.msra.mxu1 %v11254_v25  ;;  %7422 = vmatpush1.bf16.msra.mxu0 %v11257_v47  ;;  %v5623_v42 = vmax.f32 %v5607_v0, 0.0  ;;  %v11290_v25 = vld [vmem:[#allocation16 + $0x300] ss:$16 sps:$4 sm:$0xff]   ;;  %v11293_v47 = vld [vmem:[#allocation16 + $0x308] ss:$16 sps:$4 sm:$0xff]  }
 0xa47   : > { %v5630_v3 = vmax.f32 %v5614_v45, 0.0  ;;  %7251 = vmatprep.subr.bf16.mxu1 %v11262_v40  ;;  %7423 = vmatprep.subr.bf16.mxu0 %v11265_v41  ;;  %v11296_v40 = vld [vmem:[#allocation16 + $0x320] ss:$16 sps:$4 sm:$0xff]   ;;  %v11299_v41 = vld [vmem:[#allocation16 + $0x328] ss:$16 sps:$4 sm:$0xff]  }
 0xa48   : > { %v5631_v1 = vmax.f32 %v5615_v20, 0.0  ;;  %v11304_v0 = vld [vmem:[#allocation16 + $0x344] ss:$16 sps:$4 sm:$0xff]   ;;  %v11307_v60 = vld [vmem:[#allocation16 + $0x34c] ss:$16 sps:$4 sm:$0xff]  }
 0xa49   : > { %v13812_v24 = vpack.c.bf16 %v5630_v3, %v5622_v2  ;;  %v11302_v45 = vld [vmem:[#allocation16 + $0x340] ss:$16 sps:$4 sm:$0xff]   ;;  %v11305_v19 = vld [vmem:[#allocation16 + $0x348] ss:$16 sps:$4 sm:$0xff]   ;;  %v11310_v20 = vld [vmem:[#allocation16 + $0x364] ss:$16 sps:$4 sm:$0xff]  }
 0xa4a   : > { %v5639_v50 = vpack.c.bf16 %v5631_v1, %v5623_v42  ;;  %7252 = vmatpush1.bf16.msra.mxu1 %v11260_v37  ;;  %7424 = vmatpush1.bf16.msra.mxu0 %v11263_v46  ;;  %v11313_v37 = vld [vmem:[#allocation16 + $0x36c] ss:$16 sps:$4 sm:$0xff]   ;;  %v11308_v46 = vld [vmem:[#allocation16 + $0x360] ss:$16 sps:$4 sm:$0xff]   ;;  %v11311_v2 = vld [vmem:[#allocation16 + $0x368] ss:$16 sps:$4 sm:$0xff]  }
 0xa4b   : > { %7253 = vmatprep.subr.bf16.mxu1 %v11268_v18  ;;  %7425 = vmatprep.subr.bf16.mxu0 %v11271_v21  ;;  %v11316_v3 = vld [vmem:[#allocation16 + $0x384] ss:$16 sps:$4 sm:$0xff]   ;;  %v11319_v18 = vld [vmem:[#allocation16 + $0x38c] ss:$16 sps:$4 sm:$0xff]   ;;  %v11314_v21 = vld [vmem:[#allocation16 + $0x380] ss:$16 sps:$4 sm:$0xff]  }
 0xa4c   : > { %7277 = vmatprep.mubr.bf16.mxu1 %v5639_v50  ;;  %7449 = vmatprep.mubr.bf16.mxu0 %v5639_v50  ;;  %v11317_v42 = vld [vmem:[#allocation16 + $0x388] ss:$16 sps:$4 sm:$0xff]   ;;  %v11322_v1 = vld [vmem:[#allocation16 + $0x3a4] ss:$16 sps:$4 sm:$0xff]   ;;  %v11325_v50 = vld [vmem:[#allocation16 + $0x3ac] ss:$16 sps:$4 sm:$0xff]  }
 0xa4e   : > { %7254 = vmatpush1.bf16.msra.mxu1 %v11266_v51  ;;  %7426 = vmatpush1.bf16.msra.mxu0 %v11269_v52  ;;  %v11320_v51 = vld [vmem:[#allocation16 + $0x3a0] ss:$16 sps:$4 sm:$0xff]   ;;  %v11323_v52 = vld [vmem:[#allocation16 + $0x3a8] ss:$16 sps:$4 sm:$0xff]  }
 0xa4f   : > { %7255 = vmatprep.subr.bf16.mxu1 %v11274_v11  ;;  %7427 = vmatprep.subr.bf16.mxu0 %v11277_v38  ;;  %v11328_v11 = vld [vmem:[#allocation16 + $0x3c4] ss:$16 sps:$4 sm:$0xff]   ;;  %v11331_v38 = vld [vmem:[#allocation16 + $0x3cc] ss:$16 sps:$4 sm:$0xff]  }
 0xa52   : > { %7256 = vmatpush1.bf16.msra.mxu1 %v11272_v62  ;;  %7428 = vmatpush1.bf16.msra.mxu0 %v11275_v12  ;;  %v5537_v61 = vpop.f32.mrb[136].mxu0  ;;  %v11334_v62 = vld [vmem:[#allocation16 + $0x3e4] ss:$16 sps:$4 sm:$0xff]   ;;  %v11337_v12 = vld [vmem:[#allocation16 + $0x3ec] ss:$16 sps:$4 sm:$0xff]  }
 0xa53   : > { %v5610_v4 = vadd.f32 %v5591_v13, %v5537_v61  ;;  %v5539_v23 = vpop.f32.mrb[137].mxu0  ;;  %7257 = vmatprep.subr.bf16.mxu1 %v11280_v26  ;;  %7429 = vmatprep.subr.bf16.mxu0 %v11283_v63  ;;  %v11335_v26 = vld [vmem:[#allocation16 + $0x3e8] ss:$16 sps:$4 sm:$0xff]   ;;  %v11340_v63 = vld [vmem:[#allocation16 + $0x404] ss:$16 sps:$4 sm:$0xff]  }
 0xa54   : > { %v5611_v49 = vadd.f32 %v5595_v27, %v5539_v23  ;;  %v5541_v53 = vpop.f32.mrb[138].mxu0  ;;  %v11338_v61 = vld [vmem:[#allocation16 + $0x400] ss:$16 sps:$4 sm:$0xff]  }
 0xa55   : > { %v5618_v54 = vadd.f32 %v5591_v13, %v5541_v53  ;;  %v5543_v55 = vpop.f32.mrb[139].mxu0  ;;  %v5626_v58 = vmax.f32 %v5610_v4, 0.0  ;;  %v11332_v13 = vld [vmem:[#allocation16 + $0x3e0] ss:$16 sps:$4 sm:$0xff]   ;;  %v11349_v4 = vld [vmem:[#allocation16 + $0x42c] ss:$16 sps:$4 sm:$0xff]  }
 0xa56   : > { %v5619_v56 = vadd.f32 %v5595_v27, %v5543_v55  ;;  %7258 = vmatpush1.bf16.msra.mxu1 %v11278_v31  ;;  %7430 = vmatpush1.bf16.msra.mxu0 %v11281_v43  ;;  %v5627_v33 = vmax.f32 %v5611_v49, 0.0  ;;  %v11343_v27 = vld [vmem:[#allocation16 + $0x40c] ss:$16 sps:$4 sm:$0xff]   ;;  %v11341_v31 = vld [vmem:[#allocation16 + $0x408] ss:$16 sps:$4 sm:$0xff]  }
 0xa57   : > { %v5634_v9 = vmax.f32 %v5618_v54, 0.0  ;;  %7259 = vmatprep.subr.bf16.mxu1 %v11286_v35  ;;  %7431 = vmatprep.subr.bf16.mxu0 %v11289_v36  ;;  %v11346_v43 = vld [vmem:[#allocation16 + $0x424] ss:$16 sps:$4 sm:$0xff]   ;;  %v11344_v23 = vld [vmem:[#allocation16 + $0x420] ss:$16 sps:$4 sm:$0xff]  }
 0xa58   : > { %v5635_v34 = vmax.f32 %v5619_v56, 0.0  ;;  %v11347_v35 = vld [vmem:[#allocation16 + $0x428] ss:$16 sps:$4 sm:$0xff]   ;;  %v11352_v36 = vld [vmem:[#allocation16 + $0x444] ss:$16 sps:$4 sm:$0xff]  }
 0xa59   : > { %v13818_v48 = vpack.c.bf16 %v5634_v9, %v5626_v58  ;;  %v11355_v49 = vld [vmem:[#allocation16 + $0x44c] ss:$16 sps:$4 sm:$0xff]   ;;  %v11350_v53 = vld [vmem:[#allocation16 + $0x440] ss:$16 sps:$4 sm:$0xff]   ;;  %v11353_v54 = vld [vmem:[#allocation16 + $0x448] ss:$16 sps:$4 sm:$0xff]  }
 0xa5a   : > { %v13820_v22 = vpack.c.bf16 %v5635_v34, %v5627_v33  ;;  %7260 = vmatpush1.bf16.msra.mxu1 %v11284_v57  ;;  %7432 = vmatpush1.bf16.msra.mxu0 %v11287_v6  ;;  %v11358_v55 = vld [vmem:[#allocation16 + $0x464] ss:$16 sps:$4 sm:$0xff]   ;;  %v11356_v56 = vld [vmem:[#allocation16 + $0x460] ss:$16 sps:$4 sm:$0xff]   ;;  %v11359_v57 = vld [vmem:[#allocation16 + $0x468] ss:$16 sps:$4 sm:$0xff]  }
 0xa5b   : > { %7261 = vmatprep.subr.bf16.mxu1 %v11292_v14  ;;  %7433 = vmatprep.subr.bf16.mxu0 %v11295_v17  ;;  %v11364_v6 = vld [vmem:[#allocation16 + $0x484] ss:$16 sps:$4 sm:$0xff]   ;;  %v11362_v58 = vld [vmem:[#allocation16 + $0x480] ss:$16 sps:$4 sm:$0xff]   ;;  %v11365_v9 = vld [vmem:[#allocation16 + $0x488] ss:$16 sps:$4 sm:$0xff]  }
 0xa5c   : > { %v11370_v14 = vld [vmem:[#allocation16 + $0x4a4] ss:$16 sps:$4 sm:$0xff]   ;;  %v11373_v17 = vld [vmem:[#allocation16 + $0x4ac] ss:$16 sps:$4 sm:$0xff]   ;;  %v11368_v33 = vld [vmem:[#allocation16 + $0x4a0] ss:$16 sps:$4 sm:$0xff]  }
 0xa5d   : > { %v11371_v34 = vld [vmem:[#allocation16 + $0x4a8] ss:$16 sps:$4 sm:$0xff]  }
 0xa5e   : > { %7262 = vmatpush1.bf16.msra.mxu1 %v11290_v25  ;;  %7434 = vmatpush1.bf16.msra.mxu0 %v11293_v47  ;;  %v11376_v25 = vld [vmem:[#allocation16 + $0x4c4] ss:$16 sps:$4 sm:$0xff]   ;;  %v11379_v47 = vld [vmem:[#allocation16 + $0x4cc] ss:$16 sps:$4 sm:$0xff]  }
 0xa5f   : > { %7263 = vmatprep.subr.bf16.mxu1 %v11298_v16  ;;  %7435 = vmatprep.subr.bf16.mxu0 %v11301_v15  ;;  %v11374_v16 = vld [vmem:[#allocation16 + $0x4c0] ss:$16 sps:$4 sm:$0xff]   ;;  %v11377_v15 = vld [vmem:[#allocation16 + $0x4c8] ss:$16 sps:$4 sm:$0xff]  }
 0xa62   : > { %7264 = vmatpush1.bf16.msra.mxu1 %v11296_v40  ;;  %7436 = vmatpush1.bf16.msra.mxu0 %v11299_v41  ;;  %v11382_v40 = vld [vmem:[#allocation16 + $0x4e4] ss:$16 sps:$4 sm:$0xff]   ;;  %v11385_v41 = vld [vmem:[#allocation16 + $0x4ec] ss:$16 sps:$4 sm:$0xff]  }
 0xa63   : > { %7265 = vmatprep.subr.bf16.mxu1 %v11304_v0  ;;  %7437 = vmatprep.subr.bf16.mxu0 %v11307_v60  ;;  %v11380_v0 = vld [vmem:[#allocation16 + $0x4e0] ss:$16 sps:$4 sm:$0xff]   ;;  %v11383_v60 = vld [vmem:[#allocation16 + $0x4e8] ss:$16 sps:$4 sm:$0xff]  }
 0xa66   : > { %7266 = vmatpush1.bf16.msra.mxu1 %v11302_v45  ;;  %7438 = vmatpush1.bf16.msra.mxu0 %v11305_v19  ;;  %v11388_v45 = vld [vmem:[#allocation16 + $0x504] ss:$16 sps:$4 sm:$0xff]   ;;  %v11391_v19 = vld [vmem:[#allocation16 + $0x50c] ss:$16 sps:$4 sm:$0xff]  }
 0xa67   : > { %7267 = vmatprep.subr.bf16.mxu1 %v11310_v20  ;;  %7439 = vmatprep.subr.bf16.mxu0 %v11313_v37  ;;  %v11386_v20 = vld [vmem:[#allocation16 + $0x500] ss:$16 sps:$4 sm:$0xff]   ;;  %v11389_v37 = vld [vmem:[#allocation16 + $0x508] ss:$16 sps:$4 sm:$0xff]  }
 0xa6a   : > { %7268 = vmatpush1.bf16.msra.mxu1 %v11308_v46  ;;  %7440 = vmatpush1.bf16.msra.mxu0 %v11311_v2  ;;  %v11394_v46 = vld [vmem:[#allocation16 + $0x524] ss:$16 sps:$4 sm:$0xff]   ;;  %v11397_v2 = vld [vmem:[#allocation16 + $0x52c] ss:$16 sps:$4 sm:$0xff]  }
 0xa6b   : > { %7269 = vmatprep.subr.bf16.mxu1 %v11316_v3  ;;  %7441 = vmatprep.subr.bf16.mxu0 %v11319_v18  ;;  %v11392_v3 = vld [vmem:[#allocation16 + $0x520] ss:$16 sps:$4 sm:$0xff]   ;;  %v11395_v18 = vld [vmem:[#allocation16 + $0x528] ss:$16 sps:$4 sm:$0xff]  }
 0xa6e   : > { %7270 = vmatpush1.bf16.msra.mxu1 %v11314_v21  ;;  %7442 = vmatpush1.bf16.msra.mxu0 %v11317_v42  ;;  %v11400_v21 = vld [vmem:[#allocation16 + $0x544] ss:$16 sps:$4 sm:$0xff]   ;;  %v11403_v42 = vld [vmem:[#allocation16 + $0x54c] ss:$16 sps:$4 sm:$0xff]  }
 0xa6f   : > { %7271 = vmatprep.subr.bf16.mxu1 %v11322_v1  ;;  %7443 = vmatprep.subr.bf16.mxu0 %v11325_v50  ;;  %v11398_v1 = vld [vmem:[#allocation16 + $0x540] ss:$16 sps:$4 sm:$0xff]   ;;  %v11401_v50 = vld [vmem:[#allocation16 + $0x548] ss:$16 sps:$4 sm:$0xff]  }
 0xa72   : > { %7272 = vmatpush1.bf16.msra.mxu1 %v11320_v51  ;;  %7444 = vmatpush1.bf16.msra.mxu0 %v11323_v52  ;;  %v11406_v51 = vld [vmem:[#allocation16 + $0x564] ss:$16 sps:$4 sm:$0xff]   ;;  %v11409_v52 = vld [vmem:[#allocation16 + $0x56c] ss:$16 sps:$4 sm:$0xff]  }
 0xa73   : > { %7273 = vmatprep.subr.bf16.mxu1 %v11328_v11  ;;  %7445 = vmatprep.subr.bf16.mxu0 %v11331_v38  ;;  %v11404_v11 = vld [vmem:[#allocation16 + $0x560] ss:$16 sps:$4 sm:$0xff]   ;;  %v11407_v38 = vld [vmem:[#allocation16 + $0x568] ss:$16 sps:$4 sm:$0xff]  }
 0xa76   : > { %7274 = vmatpush1.bf16.msra.mxu1 %v11326_v39  ;;  %7446 = vmatpush1.bf16.msra.mxu0 %v11329_v7  ;;  %v11412_v39 = vld [vmem:[#allocation16 + $0x584] ss:$16 sps:$4 sm:$0xff]   ;;  %v11415_v7 = vld [vmem:[#allocation16 + $0x58c] ss:$16 sps:$4 sm:$0xff]  }
 0xa77   : > { %7275 = vmatprep.subr.bf16.mxu1 %v11334_v62  ;;  %7447 = vmatprep.subr.bf16.mxu0 %v11337_v12  ;;  %v11410_v62 = vld [vmem:[#allocation16 + $0x580] ss:$16 sps:$4 sm:$0xff]   ;;  %v11413_v12 = vld [vmem:[#allocation16 + $0x588] ss:$16 sps:$4 sm:$0xff]  }
 0xa7a   : > { %7276 = vmatpush1.bf16.msra.mxu1 %v11332_v13  ;;  %7448 = vmatpush1.bf16.msra.mxu0 %v11335_v26  ;;  %v11418_v13 = vld [vmem:[#allocation16 + $0x5a4] ss:$16 sps:$4 sm:$0xff]   ;;  %v11421_v26 = vld [vmem:[#allocation16 + $0x5ac] ss:$16 sps:$4 sm:$0xff]  }
 0xa7b   : > { %7288 = vmatprep.subr.bf16.mxu1 %v11340_v63  ;;  %7460 = vmatprep.subr.bf16.mxu0 %v11343_v27  ;;  %v11416_v63 = vld [vmem:[#allocation16 + $0x5a0] ss:$16 sps:$4 sm:$0xff]   ;;  %v11419_v27 = vld [vmem:[#allocation16 + $0x5a8] ss:$16 sps:$4 sm:$0xff]  }
 0xa7d   : > { %7278 = vmatmul.mubr.bf16.vlgmr.msra.gmra.mrb[112].mxu1 %v13812_v24  ;;  %7450 = vmatmul.mubr.bf16.vlgmr.msra.gmra.mrb[140].mxu0 %v13812_v24  ;;  %v11361_v24 = vld [vmem:[#allocation16 + $0x46c] ss:$16 sps:$4 sm:$0xff]  }
 0xa7e   : > { %7289 = vmatpush1.bf16.msra.mxu1 %v11338_v61  ;;  %7320 = vmatprep.mubr.bf16.mxu1 %v13797_v44  ;;  %v11424_v61 = vld [vmem:[#allocation16 + $0x5c4] ss:$16 sps:$4 sm:$0xff]  }
 0xa7f   : > { %7461 = vmatpush1.bf16.msra.mxu0 %v11341_v31  ;;  %7492 = vmatprep.mubr.bf16.mxu0 %v13797_v44  ;;  %v11367_v44 = vld [vmem:[#allocation16 + $0x48c] ss:$16 sps:$4 sm:$0xff]  }
 0xa80   : > { %7290 = vmatprep.subr.bf16.mxu1 %v11346_v43  ;;  %7462 = vmatprep.subr.bf16.mxu0 %v11349_v4  ;;  %v11427_v31 = vld [vmem:[#allocation16 + $0x5cc] ss:$16 sps:$4 sm:$0xff]   ;;  %v11422_v43 = vld [vmem:[#allocation16 + $0x5c0] ss:$16 sps:$4 sm:$0xff]   ;;  %v11425_v4 = vld [vmem:[#allocation16 + $0x5c8] ss:$16 sps:$4 sm:$0xff]  }
 0xa82   : > { %7291 = vmatpush1.bf16.msra.mxu1 %v11344_v23  ;;  %v11430_v23 = vld [vmem:[#allocation16 + $0x5e4] ss:$16 sps:$4 sm:$0xff]  }
 0xa83   : > { %7463 = vmatpush1.bf16.msra.mxu0 %v11347_v35  ;;  %7292 = vmatprep.subr.bf16.mxu1 %v11352_v36  ;;  %v11433_v35 = vld [vmem:[#allocation16 + $0x5ec] ss:$16 sps:$4 sm:$0xff]   ;;  %v11428_v36 = vld [vmem:[#allocation16 + $0x5e0] ss:$16 sps:$4 sm:$0xff]  }
 0xa84   : > { %7464 = vmatprep.subr.bf16.mxu0 %v11355_v49  ;;  %v11431_v49 = vld [vmem:[#allocation16 + $0x5e8] ss:$16 sps:$4 sm:$0xff]  }
 0xa86   : > { %7293 = vmatpush1.bf16.msra.mxu1 %v11350_v53  ;;  %v11436_v53 = vld [vmem:[#allocation16 + $0x604] ss:$16 sps:$4 sm:$0xff]  }
 0xa87   : > { %7465 = vmatpush1.bf16.msra.mxu0 %v11353_v54  ;;  %7294 = vmatprep.subr.bf16.mxu1 %v11358_v55  ;;  %v11439_v54 = vld [vmem:[#allocation16 + $0x60c] ss:$16 sps:$4 sm:$0xff]   ;;  %v11434_v55 = vld [vmem:[#allocation16 + $0x600] ss:$16 sps:$4 sm:$0xff]  }
 0xa88   : > { %7466 = vmatprep.subr.bf16.mxu0 %v11361_v24  ;;  %v11437_v24 = vld [vmem:[#allocation16 + $0x608] ss:$16 sps:$4 sm:$0xff]  }
 0xa8a   : > { %7295 = vmatpush1.bf16.msra.mxu1 %v11356_v56  ;;  %v11442_v56 = vld [vmem:[#allocation16 + $0x624] ss:$16 sps:$4 sm:$0xff]  }
 0xa8b   : > { %7467 = vmatpush1.bf16.msra.mxu0 %v11359_v57  ;;  %7296 = vmatprep.subr.bf16.mxu1 %v11364_v6  ;;  %v11445_v57 = vld [vmem:[#allocation16 + $0x62c] ss:$16 sps:$4 sm:$0xff]   ;;  %v11440_v6 = vld [vmem:[#allocation16 + $0x620] ss:$16 sps:$4 sm:$0xff]  }
 0xa8c   : > { %7468 = vmatprep.subr.bf16.mxu0 %v11367_v44  ;;  %v11443_v44 = vld [vmem:[#allocation16 + $0x628] ss:$16 sps:$4 sm:$0xff]  }
 0xa8e   : > { %7297 = vmatpush1.bf16.msra.mxu1 %v11362_v58  ;;  %v11448_v58 = vld [vmem:[#allocation16 + $0x644] ss:$16 sps:$4 sm:$0xff]  }
 0xa8f   : > { %7469 = vmatpush1.bf16.msra.mxu0 %v11365_v9  ;;  %7298 = vmatprep.subr.bf16.mxu1 %v11370_v14  ;;  %v11451_v9 = vld [vmem:[#allocation16 + $0x64c] ss:$16 sps:$4 sm:$0xff]   ;;  %v11446_v14 = vld [vmem:[#allocation16 + $0x640] ss:$16 sps:$4 sm:$0xff]  }
 0xa90   : > { %7470 = vmatprep.subr.bf16.mxu0 %v11373_v17  ;;  %v11449_v17 = vld [vmem:[#allocation16 + $0x648] ss:$16 sps:$4 sm:$0xff]  }
 0xa92   : > { %7299 = vmatpush1.bf16.msra.mxu1 %v11368_v33  ;;  %v11454_v33 = vld [vmem:[#allocation16 + $0x664] ss:$16 sps:$4 sm:$0xff]  }
 0xa93   : > { %7471 = vmatpush1.bf16.msra.mxu0 %v11371_v34  ;;  %7300 = vmatprep.subr.bf16.mxu1 %v11376_v25  ;;  %v11452_v34 = vld [vmem:[#allocation16 + $0x660] ss:$16 sps:$4 sm:$0xff]   ;;  %v11455_v25 = vld [vmem:[#allocation16 + $0x668] ss:$16 sps:$4 sm:$0xff]  }
 0xa94   : > { %7472 = vmatprep.subr.bf16.mxu0 %v11379_v47  ;;  %v11460_v47 = vld [vmem:[#allocation16 + $0x684] ss:$16 sps:$4 sm:$0xff]  }
 0xa96   : > { %7301 = vmatpush1.bf16.msra.mxu1 %v11374_v16  ;;  %v11463_v16 = vld [vmem:[#allocation16 + $0x68c] ss:$16 sps:$4 sm:$0xff]  }
 0xa97   : > { %7473 = vmatpush1.bf16.msra.mxu0 %v11377_v15  ;;  %7302 = vmatprep.subr.bf16.mxu1 %v11382_v40  ;;  %v11461_v15 = vld [vmem:[#allocation16 + $0x688] ss:$16 sps:$4 sm:$0xff]   ;;  %v11466_v40 = vld [vmem:[#allocation16 + $0x6a4] ss:$16 sps:$4 sm:$0xff]  }
 0xa98   : > { %7474 = vmatprep.subr.bf16.mxu0 %v11385_v41  ;;  %v11469_v41 = vld [vmem:[#allocation16 + $0x6ac] ss:$16 sps:$4 sm:$0xff]  }
 0xa9a   : > { %7303 = vmatpush1.bf16.msra.mxu1 %v11380_v0  ;;  %v11464_v0 = vld [vmem:[#allocation16 + $0x6a0] ss:$16 sps:$4 sm:$0xff]  }
 0xa9b   : > { %7475 = vmatpush1.bf16.msra.mxu0 %v11383_v60  ;;  %7304 = vmatprep.subr.bf16.mxu1 %v11388_v45  ;;  %v11467_v60 = vld [vmem:[#allocation16 + $0x6a8] ss:$16 sps:$4 sm:$0xff]   ;;  %v11472_v45 = vld [vmem:[#allocation16 + $0x6c4] ss:$16 sps:$4 sm:$0xff]  }
 0xa9c   : > { %7476 = vmatprep.subr.bf16.mxu0 %v11391_v19  ;;  %v11475_v19 = vld [vmem:[#allocation16 + $0x6cc] ss:$16 sps:$4 sm:$0xff]  }
 0xa9e   : > { %7305 = vmatpush1.bf16.msra.mxu1 %v11386_v20  ;;  %v11470_v20 = vld [vmem:[#allocation16 + $0x6c0] ss:$16 sps:$4 sm:$0xff]  }
 0xa9f   : > { %7477 = vmatpush1.bf16.msra.mxu0 %v11389_v37  ;;  %7306 = vmatprep.subr.bf16.mxu1 %v11394_v46  ;;  %v11473_v37 = vld [vmem:[#allocation16 + $0x6c8] ss:$16 sps:$4 sm:$0xff]   ;;  %v11478_v46 = vld [vmem:[#allocation16 + $0x6e4] ss:$16 sps:$4 sm:$0xff]  }
 0xaa0   : > { %7478 = vmatprep.subr.bf16.mxu0 %v11397_v2  ;;  %v11481_v2 = vld [vmem:[#allocation16 + $0x6ec] ss:$16 sps:$4 sm:$0xff]  }
 0xaa2   : > { %7307 = vmatpush1.bf16.msra.mxu1 %v11392_v3  ;;  %v11476_v3 = vld [vmem:[#allocation16 + $0x6e0] ss:$16 sps:$4 sm:$0xff]  }
 0xaa3   : > { %7479 = vmatpush1.bf16.msra.mxu0 %v11395_v18  ;;  %7308 = vmatprep.subr.bf16.mxu1 %v11400_v21  ;;  %v11479_v18 = vld [vmem:[#allocation16 + $0x6e8] ss:$16 sps:$4 sm:$0xff]   ;;  %v11484_v21 = vld [vmem:[#allocation16 + $0x704] ss:$16 sps:$4 sm:$0xff]  }
 0xaa4   : > { %7480 = vmatprep.subr.bf16.mxu0 %v11403_v42  ;;  %v11487_v42 = vld [vmem:[#allocation16 + $0x70c] ss:$16 sps:$4 sm:$0xff]  }
 0xaa6   : > { %7309 = vmatpush1.bf16.msra.mxu1 %v11398_v1  ;;  %v11482_v1 = vld [vmem:[#allocation16 + $0x700] ss:$16 sps:$4 sm:$0xff]  }
 0xaa7   : > { %7481 = vmatpush1.bf16.msra.mxu0 %v11401_v50  ;;  %7310 = vmatprep.subr.bf16.mxu1 %v11406_v51  ;;  %v11485_v50 = vld [vmem:[#allocation16 + $0x708] ss:$16 sps:$4 sm:$0xff]   ;;  %v11490_v51 = vld [vmem:[#allocation16 + $0x724] ss:$16 sps:$4 sm:$0xff]  }
 0xaa8   : > { %7482 = vmatprep.subr.bf16.mxu0 %v11409_v52  ;;  %v11493_v52 = vld [vmem:[#allocation16 + $0x72c] ss:$16 sps:$4 sm:$0xff]  }
 0xaaa   : > { %7311 = vmatpush1.bf16.msra.mxu1 %v11404_v11  ;;  %v11488_v11 = vld [vmem:[#allocation16 + $0x720] ss:$16 sps:$4 sm:$0xff]  }
 0xaab   : > { %7483 = vmatpush1.bf16.msra.mxu0 %v11407_v38  ;;  %7312 = vmatprep.subr.bf16.mxu1 %v11412_v39  ;;  %v11491_v38 = vld [vmem:[#allocation16 + $0x728] ss:$16 sps:$4 sm:$0xff]   ;;  %v11496_v39 = vld [vmem:[#allocation16 + $0x744] ss:$16 sps:$4 sm:$0xff]  }
 0xaac   : > { %7484 = vmatprep.subr.bf16.mxu0 %v11415_v7  ;;  %v11499_v7 = vld [vmem:[#allocation16 + $0x74c] ss:$16 sps:$4 sm:$0xff]  }
 0xaae   : > { %7313 = vmatpush1.bf16.msra.mxu1 %v11410_v62  ;;  %v11494_v62 = vld [vmem:[#allocation16 + $0x740] ss:$16 sps:$4 sm:$0xff]  }
 0xaaf   : > { %7485 = vmatpush1.bf16.msra.mxu0 %v11413_v12  ;;  %7314 = vmatprep.subr.bf16.mxu1 %v11418_v13  ;;  %v11497_v12 = vld [vmem:[#allocation16 + $0x748] ss:$16 sps:$4 sm:$0xff]   ;;  %v11502_v13 = vld [vmem:[#allocation16 + $0x764] ss:$16 sps:$4 sm:$0xff]  }
 0xab0   : > { %7486 = vmatprep.subr.bf16.mxu0 %v11421_v26  ;;  %v11505_v26 = vld [vmem:[#allocation16 + $0x76c] ss:$16 sps:$4 sm:$0xff]  }
 0xab2   : > { %7315 = vmatpush1.bf16.msra.mxu1 %v11416_v63  ;;  %v11500_v63 = vld [vmem:[#allocation16 + $0x760] ss:$16 sps:$4 sm:$0xff]  }
 0xab3   : > { %7487 = vmatpush1.bf16.msra.mxu0 %v11419_v27  ;;  %7316 = vmatprep.subr.bf16.mxu1 %v11424_v61  ;;  %v11503_v27 = vld [vmem:[#allocation16 + $0x768] ss:$16 sps:$4 sm:$0xff]   ;;  %v11508_v61 = vld [vmem:[#allocation16 + $0x784] ss:$16 sps:$4 sm:$0xff]  }
 0xab4   : > { %7488 = vmatprep.subr.bf16.mxu0 %v11427_v31  ;;  %v11511_v31 = vld [vmem:[#allocation16 + $0x78c] ss:$16 sps:$4 sm:$0xff]  }
 0xab6   : > { %7317 = vmatpush1.bf16.msra.mxu1 %v11422_v43  ;;  %v11506_v43 = vld [vmem:[#allocation16 + $0x780] ss:$16 sps:$4 sm:$0xff]  }
 0xab7   : > { %7489 = vmatpush1.bf16.msra.mxu0 %v11425_v4  ;;  %7318 = vmatprep.subr.bf16.mxu1 %v11430_v23  ;;  %v11509_v4 = vld [vmem:[#allocation16 + $0x788] ss:$16 sps:$4 sm:$0xff]   ;;  %v11514_v23 = vld [vmem:[#allocation16 + $0x7a4] ss:$16 sps:$4 sm:$0xff]  }
 0xab8   : > { %7490 = vmatprep.subr.bf16.mxu0 %v11433_v35  ;;  %v11517_v35 = vld [vmem:[#allocation16 + $0x7ac] ss:$16 sps:$4 sm:$0xff]  }
 0xaba   : > { %7319 = vmatpush1.bf16.msra.mxu1 %v11428_v36  ;;  %v11512_v36 = vld [vmem:[#allocation16 + $0x7a0] ss:$16 sps:$4 sm:$0xff]  }
 0xabb   : > { %7491 = vmatpush1.bf16.msra.mxu0 %v11431_v49  ;;  %7331 = vmatprep.subr.bf16.mxu1 %v11436_v53  ;;  %v11515_v49 = vld [vmem:[#allocation16 + $0x7a8] ss:$16 sps:$4 sm:$0xff]   ;;  %v11520_v53 = vld [vmem:[#allocation16 + $0x7c4] ss:$16 sps:$4 sm:$0xff]  }
 0xabc   : > { %7503 = vmatprep.subr.bf16.mxu0 %v11439_v54  ;;  %v11523_v54 = vld [vmem:[#allocation16 + $0x7cc] ss:$16 sps:$4 sm:$0xff]  }
 0xabd   : > { %7321 = vmatmul.mubr.bf16.vlgmr.msra.gmra.mrb[112].mxu1 %v13795_v8 }
 0xabe   : > { %7493 = vmatmul.mubr.bf16.vlgmr.msra.gmra.mrb[140].mxu0 %v13795_v8  ;;  %7332 = vmatpush1.bf16.msra.mxu1 %v11434_v55  ;;  %v11457_v8 = vld [vmem:[#allocation16 + $0x66c] ss:$16 sps:$4 sm:$0xff]   ;;  %v11518_v55 = vld [vmem:[#allocation16 + $0x7c0] ss:$16 sps:$4 sm:$0xff]  }
 0xabf   : > { %7363 = vmatprep.mubr.bf16.mxu1 %v13820_v22  ;;  %7504 = vmatpush1.bf16.msra.mxu0 %v11437_v24  ;;  %v11521_v24 = vld [vmem:[#allocation16 + $0x7c8] ss:$16 sps:$4 sm:$0xff]  }
 0xac0   : > { %7535 = vmatprep.mubr.bf16.mxu0 %v13820_v22  ;;  %7333 = vmatprep.subr.bf16.mxu1 %v11442_v56  ;;  %v11458_v22 = vld [vmem:[#allocation16 + $0x680] ss:$16 sps:$4 sm:$0xff]   ;;  %v11526_v56 = vld [vmem:[#allocation16 + $0x7e4] ss:$16 sps:$4 sm:$0xff]  }
 0xac1   : > { %7505 = vmatprep.subr.bf16.mxu0 %v11445_v57  ;;  %v11529_v57 = vld [vmem:[#allocation16 + $0x7ec] ss:$16 sps:$4 sm:$0xff]  }
 0xac2   : > { %7334 = vmatpush1.bf16.msra.mxu1 %v11440_v6  ;;  %v11524_v6 = vld [vmem:[#allocation16 + $0x7e0] ss:$16 sps:$4 sm:$0xff]  }
 0xac3   : > { %7506 = vmatpush1.bf16.msra.mxu0 %v11443_v44  ;;  %7335 = vmatprep.subr.bf16.mxu1 %v11448_v58  ;;  %v11527_v44 = vld [vmem:[#allocation16 + $0x7e8] ss:$16 sps:$4 sm:$0xff]  }
 0xac4   : > { %7507 = vmatprep.subr.bf16.mxu0 %v11451_v9  ;;  %v11532_v58 = vld [vmem:[#allocation19 + $0x4] ss:$12 sps:$4 sm:$0xff]   ;;  %v11557_v9 = vld [vmem:[#allocation19 + $0xc8] ss:$12 sps:$4 sm:$0xff]  }
 0xac6   : > { %7336 = vmatpush1.bf16.msra.mxu1 %v11446_v14  ;;  %v11530_v14 = vld [vmem:[#allocation19] ss:$12 sps:$4 sm:$0xff]  }
 0xac7   : > { %7508 = vmatpush1.bf16.msra.mxu0 %v11449_v17  ;;  %7337 = vmatprep.subr.bf16.mxu1 %v11454_v33  ;;  %v11535_v17 = vld [vmem:[#allocation19 + $0x1c] ss:$12 sps:$4 sm:$0xff]  }
 0xac8   : > { %7509 = vmatprep.subr.bf16.mxu0 %v11457_v8  ;;  %v11558_v33 = vld [vmem:[#allocation19 + $0x8] ss:$12 sps:$4 sm:$0xff]   ;;  %v11562_v8 = vld [vmem:[#allocation19 + $0xe0] ss:$12 sps:$4 sm:$0xff]  }
 0xaca   : > { %7338 = vmatpush1.bf16.msra.mxu1 %v11452_v34  ;;  %v11533_v34 = vld [vmem:[#allocation19 + $0x18] ss:$12 sps:$4 sm:$0xff]  }
 0xacb   : > { %7510 = vmatpush1.bf16.msra.mxu0 %v11455_v25  ;;  %7339 = vmatprep.subr.bf16.mxu1 %v11460_v47  ;;  %v11538_v25 = vld [vmem:[#allocation19 + $0x34] ss:$12 sps:$4 sm:$0xff]  }
 0xacc   : > { %7511 = vmatprep.subr.bf16.mxu0 %v11463_v16  ;;  %v11563_v47 = vld [vmem:[#allocation19 + $0x20] ss:$12 sps:$4 sm:$0xff]   ;;  %v11567_v16 = vld [vmem:[#allocation19 + $0xf8] ss:$12 sps:$4 sm:$0xff]  }
 0xace   : > { %7340 = vmatpush1.bf16.msra.mxu1 %v11458_v22  ;;  %v11536_v22 = vld [vmem:[#allocation19 + $0x30] ss:$12 sps:$4 sm:$0xff]  }
 0xacf   : > { %7512 = vmatpush1.bf16.msra.mxu0 %v11461_v15  ;;  %7341 = vmatprep.subr.bf16.mxu1 %v11466_v40  ;;  %v11541_v15 = vld [vmem:[#allocation19 + $0x4c] ss:$12 sps:$4 sm:$0xff]  }
 0xad0   : > { %7513 = vmatprep.subr.bf16.mxu0 %v11469_v41  ;;  %v11568_v40 = vld [vmem:[#allocation19 + $0x38] ss:$12 sps:$4 sm:$0xff]   ;;  %v11572_v41 = vld [vmem:[#allocation19 + $0x110] ss:$12 sps:$4 sm:$0xff]  }
 0xad2   : > { %7342 = vmatpush1.bf16.msra.mxu1 %v11464_v0  ;;  %v11539_v0 = vld [vmem:[#allocation19 + $0x48] ss:$12 sps:$4 sm:$0xff]  }
 0xad3   : > { %7514 = vmatpush1.bf16.msra.mxu0 %v11467_v60  ;;  %7343 = vmatprep.subr.bf16.mxu1 %v11472_v45  ;;  %v11573_v60 = vld [vmem:[#allocation19 + $0x50] ss:$12 sps:$4 sm:$0xff]   ;;  %v11577_v45 = vld [vmem:[#allocation19 + $0x128] ss:$12 sps:$4 sm:$0xff]  }
 0xad4   : > { %7515 = vmatprep.subr.bf16.mxu0 %v11475_v19  ;;  %v11542_v19 = vld [vmem:[#allocation19 + $0x60] ss:$12 sps:$4 sm:$0xff]  }
 0xad6   : > { %7344 = vmatpush1.bf16.msra.mxu1 %v11470_v20  ;;  %v11547_v20 = vld [vmem:[#allocation19 + $0x7c] ss:$12 sps:$4 sm:$0xff]  }
 0xad7   : > { %7516 = vmatpush1.bf16.msra.mxu0 %v11473_v37  ;;  %7345 = vmatprep.subr.bf16.mxu1 %v11478_v46  ;;  %v11578_v37 = vld [vmem:[#allocation19 + $0x68] ss:$12 sps:$4 sm:$0xff]   ;;  %v11582_v46 = vld [vmem:[#allocation19 + $0x140] ss:$12 sps:$4 sm:$0xff]  }
 0xad8   : > { %7517 = vmatprep.subr.bf16.mxu0 %v11481_v2  ;;  %v11545_v2 = vld [vmem:[#allocation19 + $0x78] ss:$12 sps:$4 sm:$0xff]  }
 0xada   : > { %7346 = vmatpush1.bf16.msra.mxu1 %v11476_v3  ;;  %v11550_v3 = vld [vmem:[#allocation19 + $0x94] ss:$12 sps:$4 sm:$0xff]  }
 0xadb   : > { %7518 = vmatpush1.bf16.msra.mxu0 %v11479_v18  ;;  %7347 = vmatprep.subr.bf16.mxu1 %v11484_v21  ;;  %v11583_v18 = vld [vmem:[#allocation19 + $0x80] ss:$12 sps:$4 sm:$0xff]   ;;  %v11548_v21 = vld [vmem:[#allocation19 + $0x90] ss:$12 sps:$4 sm:$0xff]  }
 0xadc   : > { %7519 = vmatprep.subr.bf16.mxu0 %v11487_v42  ;;  %v11553_v42 = vld [vmem:[#allocation19 + $0xac] ss:$12 sps:$4 sm:$0xff]  }
 0xade   : > { %7348 = vmatpush1.bf16.msra.mxu1 %v11482_v1  ;;  %v11551_v1 = vld [vmem:[#allocation19 + $0xa8] ss:$12 sps:$4 sm:$0xff]  }
 0xadf   : > { %7520 = vmatpush1.bf16.msra.mxu0 %v11485_v50  ;;  %7349 = vmatprep.subr.bf16.mxu1 %v11490_v51  ;;  %v11556_v50 = vld [vmem:[#allocation19 + $0xc4] ss:$12 sps:$4 sm:$0xff]   ;;  %v11554_v51 = vld [vmem:[#allocation19 + $0xc0] ss:$12 sps:$4 sm:$0xff]  }
 0xae0   : > { %7521 = vmatprep.subr.bf16.mxu0 %v11493_v52  ;;  %v11561_v52 = vld [vmem:[#allocation19 + $0xdc] ss:$12 sps:$4 sm:$0xff]  }
 0xae2   : > { %7350 = vmatpush1.bf16.msra.mxu1 %v11488_v11  ;;  %v11559_v11 = vld [vmem:[#allocation19 + $0xd8] ss:$12 sps:$4 sm:$0xff]  }
 0xae3   : > { %7522 = vmatpush1.bf16.msra.mxu0 %v11491_v38  ;;  %7351 = vmatprep.subr.bf16.mxu1 %v11496_v39  ;;  %v11566_v38 = vld [vmem:[#allocation19 + $0xf4] ss:$12 sps:$4 sm:$0xff]   ;;  %v11564_v39 = vld [vmem:[#allocation19 + $0xf0] ss:$12 sps:$4 sm:$0xff]  }
 0xae4   : > { %7523 = vmatprep.subr.bf16.mxu0 %v11499_v7  ;;  %v11571_v7 = vld [vmem:[#allocation19 + $0x10c] ss:$12 sps:$4 sm:$0xff]  }
 0xae6   : > { %7352 = vmatpush1.bf16.msra.mxu1 %v11494_v62  ;;  %v11569_v62 = vld [vmem:[#allocation19 + $0x108] ss:$12 sps:$4 sm:$0xff]  }
 0xae7   : > { %7524 = vmatpush1.bf16.msra.mxu0 %v11497_v12  ;;  %7353 = vmatprep.subr.bf16.mxu1 %v11502_v13  ;;  %v11576_v12 = vld [vmem:[#allocation19 + $0x124] ss:$12 sps:$4 sm:$0xff]   ;;  %v11574_v13 = vld [vmem:[#allocation19 + $0x120] ss:$12 sps:$4 sm:$0xff]  }
 0xae8   : > { %7525 = vmatprep.subr.bf16.mxu0 %v11505_v26  ;;  %v11581_v26 = vld [vmem:[#allocation19 + $0x13c] ss:$12 sps:$4 sm:$0xff]  }
 0xaea   : > { %7354 = vmatpush1.bf16.msra.mxu1 %v11500_v63  ;;  %v11579_v63 = vld [vmem:[#allocation19 + $0x138] ss:$12 sps:$4 sm:$0xff]  }
 0xaeb   : > { %7526 = vmatpush1.bf16.msra.mxu0 %v11503_v27  ;;  %7355 = vmatprep.subr.bf16.mxu1 %v11508_v61  ;;  %v11586_v27 = vld [vmem:[#allocation19 + $0x154] ss:$12 sps:$4 sm:$0xff]   ;;  %v11587_v61 = vld [vmem:[#allocation19 + $0x158] ss:$12 sps:$4 sm:$0xff]  }
 0xaec   : > { %7527 = vmatprep.subr.bf16.mxu0 %v11511_v31  ;;  %v11584_v31 = vld [vmem:[#allocation19 + $0x150] ss:$12 sps:$4 sm:$0xff]  }
 0xaee   : > { %7356 = vmatpush1.bf16.msra.mxu1 %v11506_v43  ;;  %v11588_v43 = vld [vmem:[#allocation19 + $0x98] ss:$12 sps:$4 sm:$0xff]  }
 0xaef   : > { %7528 = vmatpush1.bf16.msra.mxu0 %v11509_v4  ;;  %7357 = vmatprep.subr.bf16.mxu1 %v11514_v23  ;;  %v11591_v4 = vld [vmem:[#allocation19 + $0x16c] ss:$12 sps:$4 sm:$0xff]   ;;  %v11592_v23 = vld [vmem:[#allocation19 + $0x170] ss:$12 sps:$4 sm:$0xff]  }
 0xaf0   : > { %7529 = vmatprep.subr.bf16.mxu0 %v11517_v35  ;;  %v11589_v35 = vld [vmem:[#allocation19 + $0x168] ss:$12 sps:$4 sm:$0xff]  }
 0xaf2   : > { %7358 = vmatpush1.bf16.msra.mxu1 %v11512_v36  ;;  %v11593_v36 = vld [vmem:[#allocation19 + $0xb0] ss:$12 sps:$4 sm:$0xff]  }
 0xaf3   : > { %7530 = vmatpush1.bf16.msra.mxu0 %v11515_v49  ;;  %7359 = vmatprep.subr.bf16.mxu1 %v11520_v53  ;;  %v11596_v49 = vld [vmem:[#allocation19 + $0x184] ss:$12 sps:$4 sm:$0xff]   ;;  %v11597_v53 = vld [vmem:[#allocation19 + $0x248] ss:$12 sps:$4 sm:$0xff]  }
 0xaf4   : > { %7531 = vmatprep.subr.bf16.mxu0 %v11523_v54  ;;  %v5900_v54 = vld [vmem:[#allocation17] sm:$0xf] }
 0xaf6   : > { %7360 = vmatpush1.bf16.msra.mxu1 %v11518_v55  ;;  %v5905_v55 = vrot.slane %v5900_v54, %v12984_v30 }
 0xaf7   : > { %7532 = vmatpush1.bf16.msra.mxu0 %v11521_v24  ;;  %7361 = vmatprep.subr.bf16.mxu1 %v11526_v56  ;;  %v5913_v24 = vrot.slane %v5900_v54, %v13804_v59  ;;  %v5909_v56 = vrot.slane %v5900_v54, %v12987_v32 }
 0xaf8   : > { %7533 = vmatprep.subr.bf16.mxu0 %v11529_v57  ;;  %v5917_v57 = vrot.slane %v5900_v54, %v5578_v5  ;;  %v11631_v54 = vld [vmem:[#allocation19 + $0x22c] ss:$12 sps:$4 sm:$0xff]  }
 0xafa   : > { %7362 = vmatpush1.bf16.msra.mxu1 %v11524_v6 }
 0xafb   : > { %7534 = vmatpush1.bf16.msra.mxu0 %v11527_v44  ;;  %8215 = vmatprep.subr.bf16.mxu1 %v11532_v58 }
 0xafc   : > { %10121 = vmatprep.subr.bf16.mxu0 %v11557_v9 }
 0xafd   : > { %7364 = vmatmul.mubr.bf16.vlgmr.msra.gmra.mrb[112].mxu1 %v13818_v48 }
 0xafe   : > { %7536 = vmatmul.mubr.bf16.vlgmr.msra.gmra.mrb[140].mxu0 %v13818_v48  ;;  %8216 = vmatpush1.bf16.msra.mxu1 %v11530_v14  ;;  %v11544_v48 = vld [vmem:[#allocation19 + $0x64] ss:$12 sps:$4 sm:$0xff]  }
 0xaff   : > { %8217 = vmatprep.subr.bf16.mxu1 %v11535_v17  ;;  %10122 = vmatpush3.bf16.msra.mxu0 %v11558_v33 }
 0xb00   : > { %10123 = vmatprep.subr.bf16.mxu0 %v11562_v8 }
 0xb02   : > { %8218 = vmatpush1.bf16.msra.mxu1 %v11533_v34 }
 0xb03   : > { %8219 = vmatprep.subr.bf16.mxu1 %v11538_v25  ;;  %10124 = vmatpush3.bf16.msra.mxu0 %v11563_v47 }
 0xb04   : > { %10125 = vmatprep.subr.bf16.mxu0 %v11567_v16 }
 0xb06   : > { %8220 = vmatpush1.bf16.msra.mxu1 %v11536_v22 }
 0xb07   : > { %8221 = vmatprep.subr.bf16.mxu1 %v11541_v15  ;;  %10126 = vmatpush3.bf16.msra.mxu0 %v11568_v40 }
 0xb08   : > { %10127 = vmatprep.subr.bf16.mxu0 %v11572_v41 }
 0xb0a   : > { %8222 = vmatpush1.bf16.msra.mxu1 %v11539_v0 }
 0xb0b   : > { %8223 = vmatprep.subr.bf16.mxu1 %v11544_v48  ;;  %10128 = vmatpush3.bf16.msra.mxu0 %v11573_v60 }
 0xb0c   : > { %10129 = vmatprep.subr.bf16.mxu0 %v11577_v45 }
 0xb0e   : > { %8224 = vmatpush1.bf16.msra.mxu1 %v11542_v19 }
 0xb0f   : > { %8225 = vmatprep.subr.bf16.mxu1 %v11547_v20  ;;  %10130 = vmatpush3.bf16.msra.mxu0 %v11578_v37 }
 0xb10   : > { %10131 = vmatprep.subr.bf16.mxu0 %v11582_v46 }
 0xb12   : > { %8226 = vmatpush1.bf16.msra.mxu1 %v11545_v2 }
 0xb13   : > { %8227 = vmatprep.subr.bf16.mxu1 %v11550_v3  ;;  %10132 = vmatpush3.bf16.msra.mxu0 %v11583_v18  ;;  %v11594_v3 = vld [vmem:[#allocation19 + $0x180] ss:$12 sps:$4 sm:$0xff]   ;;  %v11598_v18 = vld [vmem:[#allocation19 + $0x188] ss:$12 sps:$4 sm:$0xff]  }
 0xb14   : > { %10133 = vmatprep.subr.bf16.mxu0 %v11587_v61  ;;  %v11618_v61 = vld [vmem:[#allocation19 + $0x1e8] ss:$12 sps:$4 sm:$0xff]  }
 0xb16   : > { %8228 = vmatpush1.bf16.msra.mxu1 %v11548_v21 }
 0xb17   : > { %8229 = vmatprep.subr.bf16.mxu1 %v11553_v42  ;;  %10134 = vmatpush3.bf16.msra.mxu0 %v11588_v43  ;;  %v11601_v42 = vld [vmem:[#allocation19 + $0x19c] ss:$12 sps:$4 sm:$0xff]   ;;  %v11622_v43 = vld [vmem:[#allocation19 + $0x2c0] ss:$12 sps:$4 sm:$0xff]  }
 0xb18   : > { %10135 = vmatprep.subr.bf16.mxu0 %v11592_v23  ;;  %v11623_v23 = vld [vmem:[#allocation19 + $0x200] ss:$12 sps:$4 sm:$0xff]  }
 0xb1a   : > { %8230 = vmatpush1.bf16.msra.mxu1 %v11551_v1  ;;  %v11602_v1 = vld [vmem:[#allocation19 + $0x260] ss:$12 sps:$4 sm:$0xff]  }
 0xb1b   : > { %8231 = vmatprep.subr.bf16.mxu1 %v11556_v50  ;;  %10136 = vmatpush3.bf16.msra.mxu0 %v11593_v36  ;;  %v11599_v50 = vld [vmem:[#allocation19 + $0x198] ss:$12 sps:$4 sm:$0xff]  }
 0xb1c   : > { %10143 = vmatprep.subr.bf16.mxu0 %v11597_v53  ;;  %v11627_v36 = vld [vmem:[#allocation19 + $0x2d8] ss:$12 sps:$4 sm:$0xff]  }
 0xb1d   : > { %v11628_v53 = vld [vmem:[#allocation19 + $0x218] ss:$12 sps:$4 sm:$0xff]  }
 0xb1e   : > { %8232 = vmatpush1.bf16.msra.mxu1 %v11554_v51  ;;  %v11603_v51 = vld [vmem:[#allocation19 + $0x1a0] ss:$12 sps:$4 sm:$0xff]  }
 0xb1f   : > { %8233 = vmatprep.subr.bf16.mxu1 %v11561_v52  ;;  %v11606_v52 = vld [vmem:[#allocation19 + $0x1b4] ss:$12 sps:$4 sm:$0xff]  }
 0xb22   : > { %8234 = vmatpush1.bf16.msra.mxu1 %v11559_v11  ;;  %v11607_v11 = vld [vmem:[#allocation19 + $0x278] ss:$12 sps:$4 sm:$0xff]  }
 0xb23   : > { %8235 = vmatprep.subr.bf16.mxu1 %v11566_v38  ;;  %v11604_v38 = vld [vmem:[#allocation19 + $0x1b0] ss:$12 sps:$4 sm:$0xff]  }
 0xb26   : > { %8236 = vmatpush1.bf16.msra.mxu1 %v11564_v39  ;;  %v11608_v39 = vld [vmem:[#allocation19 + $0x1b8] ss:$12 sps:$4 sm:$0xff]  }
 0xb27   : > { %8237 = vmatprep.subr.bf16.mxu1 %v11571_v7  ;;  %v11611_v7 = vld [vmem:[#allocation19 + $0x1cc] ss:$12 sps:$4 sm:$0xff]  }
 0xb2a   : > { %8238 = vmatpush1.bf16.msra.mxu1 %v11569_v62  ;;  %v11612_v62 = vld [vmem:[#allocation19 + $0x290] ss:$12 sps:$4 sm:$0xff]  }
 0xb2b   : > { %8239 = vmatprep.subr.bf16.mxu1 %v11576_v12  ;;  %v11609_v12 = vld [vmem:[#allocation19 + $0x1c8] ss:$12 sps:$4 sm:$0xff]  }
 0xb2e   : > { %8240 = vmatpush1.bf16.msra.mxu1 %v11574_v13  ;;  %v11613_v13 = vld [vmem:[#allocation19 + $0x1d0] ss:$12 sps:$4 sm:$0xff]  }
 0xb2f   : > { %8241 = vmatprep.subr.bf16.mxu1 %v11581_v26  ;;  %v11616_v26 = vld [vmem:[#allocation19 + $0x1e4] ss:$12 sps:$4 sm:$0xff]  }
 0xb32   : > { %8242 = vmatpush1.bf16.msra.mxu1 %v11579_v63  ;;  %v11617_v63 = vld [vmem:[#allocation19 + $0x2a8] ss:$12 sps:$4 sm:$0xff]  }
 0xb33   : > { %8243 = vmatprep.subr.bf16.mxu1 %v11586_v27  ;;  %v11614_v27 = vld [vmem:[#allocation19 + $0x1e0] ss:$12 sps:$4 sm:$0xff]  }
 0xb36   : > { %8244 = vmatpush1.bf16.msra.mxu1 %v11584_v31  ;;  %v11621_v31 = vld [vmem:[#allocation19 + $0x1fc] ss:$12 sps:$4 sm:$0xff]  }
 0xb37   : > { %8245 = vmatprep.subr.bf16.mxu1 %v11591_v4  ;;  %v11619_v4 = vld [vmem:[#allocation19 + $0x1f8] ss:$12 sps:$4 sm:$0xff]  }
 0xb3a   : > { %8246 = vmatpush1.bf16.msra.mxu1 %v11589_v35  ;;  %v11626_v35 = vld [vmem:[#allocation19 + $0x214] ss:$12 sps:$4 sm:$0xff]  }
 0xb3b   : > { %8258 = vmatprep.subr.bf16.mxu1 %v11596_v49  ;;  %v11624_v49 = vld [vmem:[#allocation19 + $0x210] ss:$12 sps:$4 sm:$0xff]  }
 0xbd0   : > { %v7365_v6 = vpop.f32.mrb[112].mxu1 }
 0xbd1   : > { %v10414_v44 = vadd.f32 %v7365_v6, %v5905_v55  ;;  %v7537_v58 = vpop.f32.mrb[140].mxu0  ;;  %v7367_v9 = vpop.f32.mrb[113].mxu1  ;;  %v11634_v6 = vld [vmem:[#allocation19 + $0x240] ss:$12 sps:$4 sm:$0xff]  }
 0xbd2   : > { %v10418_v14 = vadd.f32 %v7537_v58, %v5913_v24  ;;  %v10415_v17 = vadd.f32 %v7367_v9, %v5909_v56  ;;  %v7539_v33 = vpop.f32.mrb[141].mxu0  ;;  %v7369_v8 = vpop.f32.mrb[114].mxu1  ;;  %v11637_v58 = vld [vmem:[#allocation19 + $0x258] ss:$12 sps:$4 sm:$0xff]   ;;  %v11642_v9 = vld [vmem:[#allocation19 + $0x274] ss:$12 sps:$4 sm:$0xff]  }
 0xbd3   : > { %v10419_v34 = vadd.f32 %v7539_v33, %v5917_v57  ;;  %v10416_v25 = vadd.f32 %v7369_v8, %v5905_v55  ;;  %v7541_v47 = vpop.f32.mrb[142].mxu0  ;;  %v7371_v16 = vpop.f32.mrb[115].mxu1  ;;  %v7546_v41 = vmax.f32 %v10414_v44, 0.0  ;;  %v11632_v55 = vld [vmem:[#allocation19 + $0x2f0] ss:$12 sps:$4 sm:$0xff]  }
 0xbd4   : > { %v10420_v22 = vadd.f32 %v7541_v47, %v5913_v24  ;;  %v10417_v15 = vadd.f32 %v7371_v16, %v5909_v56  ;;  %v7543_v40 = vpop.f32.mrb[143].mxu0  ;;  %v7548_v29 = vmax.f32 %v10418_v14, 0.0  ;;  %v7547_v5 = vmax.f32 %v10415_v17, 0.0  ;;  %v11629_v24 = vld [vmem:[#allocation19 + $0x228] ss:$12 sps:$4 sm:$0xff]  }
 0xbd5   : > { %v7550_v0 = vmax.f32 %v10416_v25, 0.0  ;;  %v10421_v48 = vadd.f32 %v7543_v40, %v5917_v57  ;;  %v7549_v19 = vmax.f32 %v10419_v34, 0.0  ;;  %v11633_v56 = vld [vmem:[#allocation19 + $0x230] ss:$12 sps:$4 sm:$0xff]   ;;  %v11645_v17 = vld [vmem:[#allocation19 + $0x28c] ss:$12 sps:$4 sm:$0xff]  }
 0xbd6   : > { %v7552_v60 = vmax.f32 %v10420_v22, 0.0  ;;  %v7551_v45 = vmax.f32 %v10417_v15, 0.0  ;;  %v11636_v57 = vld [vmem:[#allocation19 + $0x244] ss:$12 sps:$4 sm:$0xff]   ;;  %v11639_v44 = vld [vmem:[#allocation19 + $0x25c] ss:$12 sps:$4 sm:$0xff]  }
 0xbd7   : > { %v7554_v20 = vpack.c.bf16 %v7550_v0, %v7546_v41  ;;  %v7553_v37 = vmax.f32 %v10421_v48, 0.0  ;;  %v11640_v14 = vld [vmem:[#allocation19 + $0x270] ss:$12 sps:$4 sm:$0xff]   ;;  %v11643_v33 = vld [vmem:[#allocation19 + $0x288] ss:$12 sps:$4 sm:$0xff]  }
 0xbd8   : > { %v13837_v46 = vpack.c.bf16 %v7552_v60, %v7548_v29  ;;  %v7555_v2 = vpack.c.bf16 %v7551_v45, %v7547_v5  ;;  %v11648_v8 = vld [vmem:[#allocation19 + $0x2a4] ss:$12 sps:$4 sm:$0xff]   ;;  %v11646_v34 = vld [vmem:[#allocation19 + $0x2a0] ss:$12 sps:$4 sm:$0xff]   ;;  %v11651_v25 = vld [vmem:[#allocation19 + $0x2bc] ss:$12 sps:$4 sm:$0xff]  }
 0xbd9   : > { %v7557_v21 = vpack.c.bf16 %v7553_v37, %v7549_v19  ;;  %v11649_v47 = vld [vmem:[#allocation19 + $0x2b8] ss:$12 sps:$4 sm:$0xff]   ;;  %v11654_v16 = vld [vmem:[#allocation19 + $0x2d4] ss:$12 sps:$4 sm:$0xff]   ;;  %v11652_v22 = vld [vmem:[#allocation19 + $0x2d0] ss:$12 sps:$4 sm:$0xff]  }
 0xbda   : > { %8247 = vmatprep.mubr.bf16.mxu1 %v7555_v2  ;;  %8333 = vmatprep.mubr.bf16.mxu0 %v7555_v2  ;;  %v11657_v15 = vld [vmem:[#allocation19 + $0x2ec] ss:$12 sps:$4 sm:$0xff]   ;;  %v11655_v40 = vld [vmem:[#allocation19 + $0x2e8] ss:$12 sps:$4 sm:$0xff]   ;;  %v11661_v29 = vld [vmem:[%s14120_s14 + $0x98] sm:$0xff]  }
 0xbdb   : > { %8248 = vmatmul.mubr.bf16.vlgmr.msra.gmra.mrb[116].mxu1 %v7554_v20  ;;  %8334 = vmatmul.mubr.bf16.vlgmr.msra.gmra.mrb[144].mxu0 %v7554_v20  ;;  %v11658_v41 = vld [vmem:[%s14120_s14 + $0x80] sm:$0xff]   ;;  %v11659_v0 = vld [vmem:[%s14120_s14 + $0x88] sm:$0xff]   ;;  %v11660_v48 = vld [vmem:[%s14120_s14 + $0x90] sm:$0xff]  }
 0xbdc   : > { %8259 = vmatpush1.bf16.msra.mxu1 %v11594_v3  ;;  %10144 = vmatpush3.bf16.msra.mxu0 %v11598_v18  ;;  %v11662_v5 = vld [vmem:[%s14120_s14 + $0xa0] sm:$0xff]   ;;  %v11663_v60 = vld [vmem:[%s14120_s14 + $0xa8] sm:$0xff]   ;;  %v11664_v45 = vld [vmem:[%s14120_s14 + $0xb0] sm:$0xff]  }
 0xbdd   : > { %8290 = vmatprep.mubr.bf16.mxu1 %v7557_v21  ;;  %8374 = vmatprep.mubr.bf16.mxu0 %v7557_v21  ;;  %v11665_v19 = vld [vmem:[%s14120_s14 + $0xb8] sm:$0xff]   ;;  %v11666_v20 = vld [vmem:[%s14120_s14 + $0x40] sm:$0xff]   ;;  %v11669_v2 = vld [vmem:[%s14120_s14 + $0x8] sm:$0xff]  }
 0xbde   : > { %8260 = vmatprep.subr.bf16.mxu1 %v11601_v42  ;;  %10145 = vmatprep.subr.bf16.mxu0 %v11602_v1  ;;  %v11667_v37 = vld [vmem:[%s14120_s14] sm:$0xff]   ;;  %v11670_v3 = vld [vmem:[%s14120_s14 + $0x50] sm:$0xff]   ;;  %v11672_v21 = vld [vmem:[%s14120_s14 + $0x58] sm:$0xff]  }
 0xbdf   : > { %v11671_v18 = vld [vmem:[%s14120_s14 + $0x10] sm:$0xff]   ;;  %v11673_v42 = vld [vmem:[%s14120_s14 + $0x18] sm:$0xff]   ;;  %v11674_v1 = vld [vmem:[%s14120_s14 + $0x60] sm:$0xff]  }
 0xbe0   : > { %8261 = vmatpush1.bf16.msra.mxu1 %v11599_v50  ;;  %10146 = vmatpush3.bf16.msra.mxu0 %v11603_v51  ;;  %v11675_v50 = vld [vmem:[%s14120_s14 + $0x20] sm:$0xff]   ;;  %v11676_v51 = vld [vmem:[%s14120_s14 + $0x68] sm:$0xff]  }
 0xbe1   : > { %8262 = vmatprep.subr.bf16.mxu1 %v11606_v52  ;;  %10147 = vmatprep.subr.bf16.mxu0 %v11607_v11  ;;  %v11677_v52 = vld [vmem:[%s14120_s14 + $0x28] sm:$0xff]   ;;  %v11678_v11 = vld [vmem:[%s14120_s14 + $0x70] sm:$0xff]  }
 0xbe4   : > { %8263 = vmatpush1.bf16.msra.mxu1 %v11604_v38  ;;  %10148 = vmatpush3.bf16.msra.mxu0 %v11608_v39  ;;  %v11679_v38 = vld [vmem:[%s14120_s14 + $0x30] sm:$0xff]   ;;  %v11680_v39 = vld [vmem:[%s14120_s14 + $0x78] sm:$0xff]  }
 0xbe5   : > { %8264 = vmatprep.subr.bf16.mxu1 %v11611_v7  ;;  %10149 = vmatprep.subr.bf16.mxu0 %v11612_v62  ;;  %v11681_v7 = vld [vmem:[%s14120_s14 + $0x38] sm:$0xff]  }
 0xbe8   : > { %8265 = vmatpush1.bf16.msra.mxu1 %v11609_v12  ;;  %10150 = vmatpush3.bf16.msra.mxu0 %v11613_v13 }
 0xbe9   : > { %8266 = vmatprep.subr.bf16.mxu1 %v11616_v26  ;;  %10151 = vmatprep.subr.bf16.mxu0 %v11617_v63 }
 0xbec   : > { %8267 = vmatpush1.bf16.msra.mxu1 %v11614_v27  ;;  %10152 = vmatpush3.bf16.msra.mxu0 %v11618_v61  ;;  %v7686_v61 = vld [vmem:[#allocation20] sm:$0x7] }
 0xbed   : > { %8268 = vmatprep.subr.bf16.mxu1 %v11621_v31  ;;  %10153 = vmatprep.subr.bf16.mxu0 %v11622_v43  ;;  %v7699_v31 = vrot.slane %v7686_v61, %v13804_v59  ;;  %v7695_v59 = vrot.slane %v7686_v61, %v12987_v32  ;;  %v11683_v32 = vld [vmem:[#allocation22 + $0x8] sm:$0xff]  }
 0xbf0   : > { %8269 = vmatpush1.bf16.msra.mxu1 %v11619_v4  ;;  %10154 = vmatpush3.bf16.msra.mxu0 %v11623_v23 }
 0xbf1   : > { %8270 = vmatprep.subr.bf16.mxu1 %v11626_v35  ;;  %10155 = vmatprep.subr.bf16.mxu0 %v11627_v36 }
 0xbf4   : > { %8271 = vmatpush1.bf16.msra.mxu1 %v11624_v49  ;;  %10156 = vmatpush3.bf16.msra.mxu0 %v11628_v53 }
 0xbf5   : > { %8272 = vmatprep.subr.bf16.mxu1 %v11631_v54  ;;  %10157 = vmatprep.subr.bf16.mxu0 %v11632_v55 }
 0xbf8   : > { %8273 = vmatpush1.bf16.msra.mxu1 %v11629_v24  ;;  %10158 = vmatpush3.bf16.msra.mxu0 %v11633_v56 }
 0xbf9   : > { %8274 = vmatprep.subr.bf16.mxu1 %v11636_v57  ;;  %10354 = vmatprep.subr.bf16.mxu0 %v12217_v10 }
 0xbfb   : > { %8375 = vmatmul.mubr.bf16.vlgmr.msra.gmra.mrb[148].mxu0 %v13837_v46 }
 0xbfc   : > { %8275 = vmatpush1.bf16.msra.mxu1 %v11634_v6  ;;  %10370 = vmatprep.mubr.msk.bf16.mxu0 %vm12218_vm3, %v12217_v10 }
 0xbfd   : > { %8276 = vmatprep.subr.bf16.mxu1 %v11639_v44  ;;  %10355 = vmatpush3.bf16.msra.mxu0 %v11658_v41  ;;  %v7691_v44 = vrot.slane %v7686_v61, %v12984_v30  ;;  %v11682_v30 = vld [vmem:[#allocation22] sm:$0xff]  }
 0xbfe   : > { %10356 = vmatprep.subr.bf16.mxu0 %v12217_v10 }
 0xc00   : > { %8277 = vmatpush1.bf16.msra.mxu1 %v11637_v58 }
 0xc01   : > { %8278 = vmatprep.subr.bf16.mxu1 %v11642_v9  ;;  %10357 = vmatpush3.bf16.msra.mxu0 %v11659_v0  ;;  %v11684_v0 = vld [vmem:[#allocation22 + $0x10] sm:$0xff]  }
 0xc02   : > { %10358 = vmatprep.subr.bf16.mxu0 %v12217_v10 }
 0xc04   : > { %8279 = vmatpush1.bf16.msra.mxu1 %v11640_v14 }
 0xc05   : > { %8280 = vmatprep.subr.bf16.mxu1 %v11645_v17  ;;  %10359 = vmatpush3.bf16.msra.mxu0 %v11660_v48  ;;  %v11685_v48 = vld [vmem:[#allocation22 + $0x18] sm:$0xff]  }
 0xc06   : > { %10360 = vmatprep.subr.bf16.mxu0 %v12217_v10 }
 0xc08   : > { %8281 = vmatpush1.bf16.msra.mxu1 %v11643_v33 }
 0xc09   : > { %8282 = vmatprep.subr.bf16.mxu1 %v11648_v8  ;;  %10361 = vmatpush3.bf16.msra.mxu0 %v11661_v29  ;;  %v11686_v29 = vld [vmem:[#allocation22 + $0x20] sm:$0xff]  }
 0xc0a   : > { %10362 = vmatprep.subr.bf16.mxu0 %v12217_v10 }
 0xc0c   : > { %8283 = vmatpush1.bf16.msra.mxu1 %v11646_v34 }
 0xc0d   : > { %8284 = vmatprep.subr.bf16.mxu1 %v11651_v25  ;;  %10363 = vmatpush3.bf16.msra.mxu0 %v11662_v5  ;;  %v11687_v5 = vld [vmem:[#allocation22 + $0x28] sm:$0xff]  }
 0xc0e   : > { %10364 = vmatprep.subr.bf16.mxu0 %v12217_v10 }
 0xc10   : > { %8285 = vmatpush1.bf16.msra.mxu1 %v11649_v47 }
 0xc11   : > { %8286 = vmatprep.subr.bf16.mxu1 %v11654_v16  ;;  %10365 = vmatpush3.bf16.msra.mxu0 %v11663_v60  ;;  %v11688_v60 = vld [vmem:[#allocation22 + $0x30] sm:$0xff]  }
 0xc12   : > { %10366 = vmatprep.subr.bf16.mxu0 %v12217_v10 }
 0xc14   : > { %8287 = vmatpush1.bf16.msra.mxu1 %v11652_v22 }
 0xc15   : > { %8288 = vmatprep.subr.bf16.mxu1 %v11657_v15  ;;  %10367 = vmatpush3.bf16.msra.mxu0 %v11664_v45  ;;  %v11689_v45 = vld [vmem:[#allocation22 + $0x38] sm:$0xff]  }
 0xc16   : > { %10368 = vmatprep.subr.bf16.mxu0 %v12217_v10 }
 0xc18   : > { %8289 = vmatpush1.bf16.msra.mxu1 %v11655_v40 }
 0xc19   : > { %10369 = vmatpush3.bf16.msra.mxu0 %v11665_v19  ;;  %10165 = vmatprep.subr.bf16.mxu1 %v11666_v20  ;;  %v11690_v19 = vld [vmem:[#allocation23] sm:$0xff]   ;;  %v11691_v20 = vld [vmem:[#allocation23 + $0x8] sm:$0xff]  }
 0xc1a   : > { %10394 = vmatprep.subr.bf16.mxu0 %v12217_v10 }
 0xc1b   : > { %8291 = vmatmul.mubr.bf16.vlgmr.msra.gmra.mrb[116].mxu1 %v13837_v46  ;;  %v11668_v46 = vld [vmem:[%s14120_s14 + $0x48] sm:$0xff]  }
 0xc1c   : > { %10166 = vmatpush3.bf16.msra.mxu1 %v11667_v37  ;;  %v11692_v37 = vld [vmem:[#allocation23 + $0x10] sm:$0xff]  }
 0xc1d   : > { %10167 = vmatprep.subr.bf16.mxu1 %v11668_v46  ;;  %v11693_v46 = vld [vmem:[#allocation23 + $0x18] sm:$0xff]  }
 0xc20   : > { %10168 = vmatpush3.bf16.msra.mxu1 %v11669_v2  ;;  %v11694_v2 = vld [vmem:[#allocation23 + $0x20] sm:$0xff]  }
 0xc21   : > { %10169 = vmatprep.subr.bf16.mxu1 %v11670_v3  ;;  %v11695_v3 = vld [vmem:[#allocation23 + $0x28] sm:$0xff]  }
 0xc24   : > { %10170 = vmatpush3.bf16.msra.mxu1 %v11671_v18 }
 0xc25   : > { %10171 = vmatprep.subr.bf16.mxu1 %v11672_v21 }
 0xc28   : > { %10172 = vmatpush3.bf16.msra.mxu1 %v11673_v42 }
 0xc29   : > { %10173 = vmatprep.subr.bf16.mxu1 %v11674_v1 }
 0xc2c   : > { %10174 = vmatpush3.bf16.msra.mxu1 %v11675_v50 }
 0xc2d   : > { %10175 = vmatprep.subr.bf16.mxu1 %v11676_v51  ;;  %v9880_v51 = vld [vmem:[%s14121_s29] ss:$0 sm:$0xff]  ;;  %s13965_s29 = scalar_lea.sflag [#allocation4], %s896_s25 }
 0xc30   : > { %10176 = vmatpush3.bf16.msra.mxu1 %v11677_v52 }
 0xc31   : > { %10177 = vmatprep.subr.bf16.mxu1 %v11678_v11 }
 0xc34   : > { %10178 = vmatpush3.bf16.msra.mxu1 %v11679_v38 }
 0xc35   : > { %10179 = vmatprep.subr.bf16.mxu1 %v11680_v39 }
 0xc38   : > { %10180 = vmatpush3.bf16.msra.mxu1 %v11681_v7 }
 0xc39   : > { %10374 = vmatprep.subr.bf16.mxu1 %v12217_v10 }
 0xcae   : > { %v10137_v62 = vpop.f32.mrb[144].mxu0 }
 0xcaf   : > { %v10138_v12 = vpop.f32.mrb[145].mxu0 }
 0xcb0   : > { %v10139_v13 = vadd.f32 %v10138_v12, %v10137_v62  ;;  %v10140_v26 = vpop.f32.mrb[146].mxu0 }
 0xcb1   : > { %v10141_v63 = vpop.f32.mrb[147].mxu0 }
 0xcb2   : > { %v10142_v27 = vadd.f32 %v10141_v63, %v10140_v26  ;;  %v8336_v23 = vadd.f32 %v10139_v13, %v7699_v31 }
 0xcb4   : > { %v8339_v53 = vadd.f32 %v10142_v27, %v7699_v31  ;;  %v11696_v31 = vld [vmem:[#allocation23 + $0x30] sm:$0xff]  }
 0xcce   : > { %v10159_v43 = vpop.f32.mrb[148].mxu0 }
 0xccf   : > { %v10160_v4 = vpop.f32.mrb[149].mxu0 }
 0xcd0   : > { %v10161_v35 = vadd.f32 %v10160_v4, %v10159_v43  ;;  %v10162_v36 = vpop.f32.mrb[150].mxu0  ;;  %v11697_v43 = vld [vmem:[#allocation23 + $0x38] sm:$0xff]   ;;  %v9905_v4 = vld [vmem:[%s14122_s26] ss:$0 sm:$0xff]  ;;  %s12104_s26 = scalar_lea.vmem %s12103_s1, 512 }
 0xcd1   : > { %v10163_v49 = vpop.f32.mrb[151].mxu0  ;;  %p12106_p3 = scmp.lt.s32.totalorder %s12104_s26, %s12098_s6 }
 0xcd2   : > { %v8377_v54 = vadd.f32 %v10161_v35, %v8336_v23  ;;  %v10164_v55 = vadd.f32 %v10163_v49, %v10162_v36 }
 0xcd3   : > { %p12107_p4 = por %p12106_p3, %p12105_p2 }
 0xcd4   : > { %v8380_v24 = vadd.f32 %v10164_v55, %v8339_v53  ;;  %v8385_v56 = vmax.f32 %v8377_v54, 0.0 }
 0xcd5   : > { %p12108_p7 = pnand %p12107_p4, %p12101_p10 }
 0xcd6   : > { %v8388_v57 = vmax.f32 %v8380_v24, 0.0 }
 0xcd8   : > { %v8391_v6 = vpack.c.bf16 %v8388_v57, %v8385_v56  ;;  %v8906_v57 = vand.u32 127, %v1792_v28 }
 0xcda   : > { %10371 = vmatmul.mubr.bf16.vlgmr.msra.gmra.mrb[152].mxu0 %v8391_v6  ;;  %vm8907_vm5 = vcmp.lt.s32.totalorder %v8906_v57, 3 }
 0xcdb   : > { %10410 = vmatprep.mubr.msk.bf16.mxu0 %vm12218_vm3, %v12217_v10  ;;  %10395 = vmatpush3.bf16.msra.mxu0 %v11690_v19 }
 0xcdc   : > { %10396 = vmatprep.subr.bf16.mxu0 %v12217_v10 }
 0xcdf   : > { %10397 = vmatpush3.bf16.msra.mxu0 %v11691_v20 }
 0xce0   : > { %10398 = vmatprep.subr.bf16.mxu0 %v12217_v10 }
 0xce3   : > { %10399 = vmatpush3.bf16.msra.mxu0 %v11692_v37 }
 0xce4   : > { %10400 = vmatprep.subr.bf16.mxu0 %v12217_v10 }
 0xce7   : > { %10401 = vmatpush3.bf16.msra.mxu0 %v11693_v46 }
 0xce8   : > { %10402 = vmatprep.subr.bf16.mxu0 %v12217_v10 }
 0xceb   : > { %10403 = vmatpush3.bf16.msra.mxu0 %v11694_v2 }
 0xcec   : > { %10404 = vmatprep.subr.bf16.mxu0 %v12217_v10 }
 0xcee   : > { %v8292_v58 = vpop.f32.mrb[116].mxu1 }
 0xcef   : > { %v10422_v9 = vadd.f32 %v8292_v58, %v7691_v44  ;;  %v8294_v14 = vpop.f32.mrb[117].mxu1  ;;  %10405 = vmatpush3.bf16.msra.mxu0 %v11695_v3 }
 0xcf0   : > { %v10423_v17 = vadd.f32 %v8294_v14, %v7695_v59  ;;  %v8296_v33 = vpop.f32.mrb[118].mxu1  ;;  %10406 = vmatprep.subr.bf16.mxu0 %v12217_v10 }
 0xcf1   : > { %v10424_v8 = vadd.f32 %v8296_v33, %v7691_v44  ;;  %v8298_v34 = vpop.f32.mrb[119].mxu1  ;;  %v8383_v47 = vmax.f32 %v10422_v9, 0.0 }
 0xcf2   : > { %v10425_v25 = vadd.f32 %v8298_v34, %v7695_v59  ;;  %v8384_v22 = vmax.f32 %v10423_v17, 0.0 }
 0xcf3   : > { %v8386_v16 = vmax.f32 %v10424_v8, 0.0  ;;  %10407 = vmatpush3.bf16.msra.mxu0 %v11696_v31 }
 0xcf4   : > { %v8387_v15 = vmax.f32 %v10425_v25, 0.0  ;;  %10408 = vmatprep.subr.bf16.mxu0 %v12217_v10 }
 0xcf5   : > { %v8389_v40 = vpack.c.bf16 %v8386_v16, %v8383_v47 }
 0xcf6   : > { %v8390_v41 = vpack.c.bf16 %v8387_v15, %v8384_v22 }
 0xcf7   : > { %10409 = vmatpush3.bf16.msra.mxu0 %v11697_v43 }
 0xcf8   : > { %8623 = vmatprep.mubr.bf16.mxu1 %v8390_v41 }
 0xcf9   : > { %8624 = vmatmul.mubr.bf16.vlgmr.msra.gmra.mrb[120].mxu1 %v8389_v40 }
 0xcfa   : > { %10390 = vmatprep.mubr.msk.bf16.mxu1 %vm12218_vm3, %v12217_v10  ;;  %10375 = vmatpush3.bf16.msra.mxu1 %v11682_v30 }
 0xcfb   : > { %10376 = vmatprep.subr.bf16.mxu1 %v12217_v10 }
 0xcfe   : > { %10377 = vmatpush3.bf16.msra.mxu1 %v11683_v32 }
 0xcff   : > { %10378 = vmatprep.subr.bf16.mxu1 %v12217_v10 }
 0xd02   : > { %10379 = vmatpush3.bf16.msra.mxu1 %v11684_v0 }
 0xd03   : > { %10380 = vmatprep.subr.bf16.mxu1 %v12217_v10 }
 0xd06   : > { %10381 = vmatpush3.bf16.msra.mxu1 %v11685_v48 }
 0xd07   : > { %10382 = vmatprep.subr.bf16.mxu1 %v12217_v10 }
 0xd0a   : > { %10383 = vmatpush3.bf16.msra.mxu1 %v11686_v29 }
 0xd0b   : > { %10384 = vmatprep.subr.bf16.mxu1 %v12217_v10 }
 0xd0e   : > { %10385 = vmatpush3.bf16.msra.mxu1 %v11687_v5 }
 0xd0f   : > { %10386 = vmatprep.subr.bf16.mxu1 %v12217_v10 }
 0xd12   : > { %10387 = vmatpush3.bf16.msra.mxu1 %v11688_v60 }
 0xd13   : > { %10388 = vmatprep.subr.bf16.mxu1 %v12217_v10  ;;  %v9914_v10 = vld [vmem:[%s14123_s3] ss:$0 sm:$0xff] }
 0xd16   : > { %10389 = vmatpush3.bf16.msra.mxu1 %v11689_v45 }
 0xdad   : > { %v8666_v18 = vpop.f32.mrb[152].mxu0 }
 0xdae   : > { %v10372_v21 = vpop.f32.mrb[153].mxu0 }
 0xdaf   : > { %v8669_v42 = vpop.f32.mrb[154].mxu0 }
 0xdb0   : > { %v10373_v1 = vpop.f32.mrb[155].mxu0 }
 0xdcc   : > { %v10181_v50 = vpop.f32.mrb[120].mxu1 }
 0xdcd   : > { %v10182_v52 = vpop.f32.mrb[121].mxu1 }
 0xdce   : > { %v10183_v11 = vadd.f32 %v10182_v52, %v10181_v50  ;;  %v10184_v38 = vpop.f32.mrb[122].mxu1 }
 0xdcf   : > { %v10185_v39 = vpop.f32.mrb[123].mxu1 }
 0xdd0   : > { %v8626_v7 = vadd.f32 %v10183_v11, %v9880_v51  ;;  %v10186_v62 = vadd.f32 %v10185_v39, %v10184_v38 }
 0xdd2   : > { %v8667_v12 = vadd.f32 %v8666_v18, %v8626_v7  ;;  %v8629_v13 = vadd.f32 %v10186_v62, %v9880_v51 }
 0xdd4   : > { %v8670_v26 = vadd.f32 %v8669_v42, %v8629_v13  ;;  %v8673_v63 = vmax.f32 %v8667_v12, 0.0 }
 0xdd6   : > { %v8674_v27 = vmax.f32 %v8670_v26, 0.0 }
 0xdd8   : > { %v8675_v61 = vpack.c.bf16 %v8674_v27, %v8673_v63 }
 0xdda   : > { %10391 = vmatmul.mubr.bf16.vlgmr.msra.gmra.mrb[124].mxu1 %v8675_v61 }
 0xead   : > { %v8781_v23 = vpop.f32.mrb[124].mxu1 }
 0xeae   : > { %v8782_v35 = vadd.f32 %v9905_v4, %v8781_v23  ;;  %v10392_v36 = vpop.f32.mrb[125].mxu1 }
 0xeaf   : > { %v8784_v49 = vpop.f32.mrb[126].mxu1 }
 0xeb0   : > { %v8785_v53 = vadd.f32 %v9905_v4, %v8784_v49  ;;  %v10393_v54 = vpop.f32.mrb[127].mxu1  ;;  %v8788_v55 = vmax.f32 %v8782_v35, 0.0 }
 0xeb2   : > { %v8789_v24 = vmax.f32 %v8785_v53, 0.0 }
 0xeb4   : > { %v8790_v56 = vpack.c.bf16 %v8789_v24, %v8788_v55 }
 0xeb6   : > { %10411 = vmatmul.mubr.bf16.vlgmr.msra.gmra.mrb[156].mxu0 %v8790_v56 }
 0xf89   : > { %v8896_v6 = vpop.f32.mrb[156].mxu0 }
 0xf8a   : > { %v8897_v44 = vadd.f32 %v9914_v10, %v8896_v6  ;;  %v10412_v59 = vpop.f32.mrb[157].mxu0 }
 0xf8b   : > { %v8899_v58 = vpop.f32.mrb[158].mxu0 }
 0xf8c   : > { %v8903_v9 = vmax.f32 %v8897_v44, 0.0  ;;  %v8900_v14 = vadd.f32 %v9914_v10, %v8899_v58  ;;  %v10413_v17 = vpop.f32.mrb[159].mxu0 }
 0xf8e   : > { %v8904_v33 = vmax.f32 %v8900_v14, 0.0  ;;  %v8908_v8 = vsel %vm8907_vm5, %v8903_v9, -1e+30 }
 0xf8f   : > { %8910 = vmax.xlane.f32.xlu0 %v8908_v8 }
 0xf90   : > { %v8909_v34 = vsel %vm8907_vm5, %v8904_v33, -1e+30 }
 0xf93   : > { %8912 = vmax.xlane.f32.xlu0 %v8909_v34 }
0x101c   : > { %v8911_v25 = vpop.xlane.xlu0 %8910 }
0x101d   : > { %v8914_v47 = vsub.f32 %v8908_v8, %v8911_v25 }
0x101f   : > { %v8916_v16 = vmul.f32 1.442695, %v8914_v47 }
0x1020   : > { %v8913_v22 = vpop.xlane.xlu0 %8912 }
0x1021   : > { %11698 = vpow2.f32 %v8916_v16  ;;  %v8915_v28 = vsub.f32 %v8909_v34, %v8913_v22 }
0x1023   : > { %v8918_v15 = vmul.f32 1.442695, %v8915_v28 }
0x1025   : > { %11700 = vpow2.f32 %v8918_v15 }
0x102b   : > { %v11699_v40 = vpop.eup %11698 }
0x102c   : > { %8920 = vadd.xlane.f32.xlu1 %v11699_v40 }
0x102f   : > { %v11701_v41 = vpop.eup %11700 }
0x1030   : > { %8922 = vadd.xlane.f32.xlu1 %v11701_v41 }
0x10b9   : > { %v8921_v30 = vpop.xlane.xlu1 %8920 }
0x10ba   : > { %11702 = vrcp.f32 %v8921_v30 }
0x10bd   : > { %v8923_v32 = vpop.xlane.xlu1 %8922 }
0x10be   : > { %11704 = vrcp.f32 %v8923_v32 }
0x10c4   : > { %v11703_v0 = vpop.eup %11702 }
0x10c5   : > { %v8925_v48 = vmul.f32 %v11703_v0, %v11699_v40 }
0x10c7   : > { %8928 = vst [vmem:[%s898_s23] sm:$0xff] %v8925_v48 }
0x10c8   : > { %v11705_v29 = vpop.eup %11704 }
0x10c9   : > { %v8927_v5 = vmul.f32 %v11705_v29, %v11701_v41 }
0x10cb   : > { %8929 = vst [vmem:[%s898_s23 + $0x8] sm:$0xff] %v8927_v5 }
0x10cc   : > { %12111 = shalt.err (!%p12108_p7)
}
0x10cd   : > { %s12112_s22 = scalar_lea.hbm %s13961_s2, 256  ;;  %s12116_s7 = scalar_lea.hbm %s14126_s28, 512 }
0x10ce   : > { %p12113_p8 = scmp.ne.s32.totalorder %s13961_s2, %s12112_s22  ;;  %p12117_p0 = scmp.lt.u32.totalorder %s13961_s2, %s14126_s28 }
0x10cf   : > { %p12118_p1 = scmp.lt.u32.totalorder %s12116_s7, %s12112_s22  ;;  %p12120_p5 = scmp.lt.u32.totalorder %s12112_s22, %s13961_s2 }
0x10d0   : > { %p12114_p11 = pnand %p12113_p8, %p14127_p9 }
0x10d1   : > { %p12119_p6 = por %p12118_p1, %p12117_p0 }
0x10d2   : > { %p12115_p13 = pneg %p12114_p11 }
0x10d3   : > { %p12121_p12 = por %p12120_p5, %p12119_p6 }
0x10d5   : > { %p12122_p10 = pnand %p12121_p12, %p12115_p13 }
0x10d7   : > { %12125 = shalt.err (!%p12122_p10)
}
0x10d8   : > { %s12220_s24 = smov 128   ;;  %s12221_s23 = smov 8  }
0x10d9   : > { %10838 = dma.vmem_to_hbm [thread:$0]  (%p14127_p9), %s13963_s4, 256, %s13961_s2, %s13965_s29, %s12220_s24, %s12220_s24, %s12221_s23  }
0x10da PF: > { %s14128_s8 = sld [smem:[#allocation38_spill]]  ;;  %s14129_s16 = sld [smem:[#allocation35_spill]] }
0x10db   : > { %s14130_s6 = sld [smem:[#allocation42_spill]] }
0x10e0   : > { %p10915_p2 = scmp.ge.s32.totalorder %s14128_s8, 2  ;;  %s8959_s5 = sand.u32 1, %s14129_s16  }
0x10e1   : > { %p14131_p3 = scmp.ne.s32.totalorder %s14130_s6, 0  ;;  %s8960_s1 = scalar_lea.sflag [#allocation4], %s8959_s5 }
0x10e3   : > { %p10884_p4 = pnand %p10915_p2, %p14131_p3 }
0x10e5   : > { %12175 = dma.done.wait (!%p10884_p4), %s8960_s1, 256  }
0x10e6   : > { %12177 = vsyncadd (!%p10884_p4), %s8960_s1, 4294967040  ;;  %s14132_s25 = sld [smem:[#allocation39_spill]]  ;;  %s14133_s4 = sld [smem:[#allocation36_spill]] }
0x10e7   : > { %s14134_s30 = sld [smem:[#allocation37_spill]]  ;;  %s14135_s24 = sld [smem:[#allocation40_spill]] }
0x10ec   : > { %p41_p7 = scmp.ge.s32.totalorder %s14132_s25, 4  }
0x10ee   :  { %43 = sbr.rel (!%p41_p7) target bundleno = 28 (0x1c), region = 210 }
0x10f5   :  { %8965 = vsyncpa [#allocation3], 1 }
0x10f6   :  { %8967 = vsyncpa [#allocation3 + $0x1], 1 }
0x10f7   :  { %8968 = vsyncpa [#allocation6], 1 }
0x10f8   :  { %8969 = vsyncpa [#allocation9], 1 }
0x10f9   :  { %8970 = vsyncpa [#allocation12], 1 }
0x10fa   :  { %8971 = vsyncpa [#allocation15], 1 }
0x10fb   :  { %8972 = vsyncpa [#allocation18], 1 }
0x10fc   :  { %8973 = vsyncpa [#allocation21], 1 }
0x10fd   :  { %8974 = vsyncpa [#allocation24], 1 }
0x10fe   :  { %8975 = vsyncpa [#allocation4], 1 }
0x10ff   :  { %8977 = vsyncpa [#allocation4 + $0x1], 1 }

</bundles_post_ra>
